<compile_context>
chip_gen: v7x
topology: tpu7x:2x2x1
jax: 0.10.0
libtpu: 0.0.40
codegen_flags: <defaults>
</compile_context>

<pallas_src>
import jax
import jax.numpy as jnp
from jax.experimental import pallas as pl
from jax.experimental.pallas import tpu as pltpu

# ---------------- config (small, deterministic mini-BERT) ----------------
B = 2            # batch
S = 16           # sequence length
H = 128          # hidden size (stands in for 768)
NH = 4           # attention heads
DH = H // NH     # head dim
FF = 256         # FFN intermediate size
L = 2            # encoder layers
VOCAB = 64
NUM_CLASSES = 2
CLS_PAD = 128    # lane-padded classifier output width
LN_EPS = 1e-12
BS = B * S


# ---------------- in-kernel helpers ----------------
def _layernorm(x, g, b):
    mean = jnp.mean(x, axis=-1, keepdims=True)
    xc = x - mean
    var = jnp.mean(xc * xc, axis=-1, keepdims=True)
    return xc * jax.lax.rsqrt(var + LN_EPS) * g + b


def _gelu(x):
    # TODO(synk): tanh-approx GELU; PyTorch/BERT default is the exact erf form
    # (~1e-3 divergence).
    c = 0.7978845608028654  # sqrt(2/pi)
    return 0.5 * x * (1.0 + jnp.tanh(c * (x + 0.044715 * x * x * x)))


# ---------------- fused encoder + pooler + classifier kernel ----------------
def _encoder_kernel(emb_ref, mask_ref, emb_g_ref, emb_b_ref,
                    wqkv_ref, bqkv_ref, wo_ref, bo_ref,
                    ln1_g_ref, ln1_b_ref,
                    w1_ref, b1_ref, w2_ref, b2_ref,
                    ln2_g_ref, ln2_b_ref,
                    pool_w_ref, pool_b_ref, cls_w_ref, cls_b_ref,
                    logits_ref,
                    x_scr, ctx_scr):
    l = pl.program_id(0)

    # Embedding LayerNorm only on the first grid step; x_scr carries the
    # residual stream across layers (VMEM-resident, never leaves the chip).
    @pl.when(l == 0)
    def _():
        x_scr[...] = _layernorm(emb_ref[...], emb_g_ref[...], emb_b_ref[...])

    x = x_scr[...]                                   # (BS, H) f32
    xb = x.astype(jnp.bfloat16)

    # --- fused QKV projection: (BS, H) x (H, 3H), bf16 in / f32 acc ---
    qkv = jnp.dot(xb, wqkv_ref[...], preferred_element_type=jnp.float32)
    qkv = qkv + bqkv_ref[...]
    q = qkv[:, 0 * H:1 * H].astype(jnp.bfloat16)
    k = qkv[:, 1 * H:2 * H].astype(jnp.bfloat16)
    v = qkv[:, 2 * H:3 * H].astype(jnp.bfloat16)

    # --- multi-head attention, all heads/batches on VMEM-resident tiles ---
    scale = 1.0 / (DH ** 0.5)
    for b in range(B):                               # unrolled (B=2)
        r0 = b * S
        m_b = mask_ref[b:b + 1, :]                   # (1, S) additive mask
        for h in range(NH):                          # unrolled (NH=4)
            c0 = h * DH
            q_h = q[r0:r0 + S, c0:c0 + DH]
            k_h = k[r0:r0 + S, c0:c0 + DH]
            v_h = v[r0:r0 + S, c0:c0 + DH]
            # q_h @ k_h^T without an explicit transpose (contract last dims).
            s = jax.lax.dot_general(q_h, k_h, (((1,), (1,)), ((), ())),
                                    preferred_element_type=jnp.float32)
            s = s * scale + m_b
            s = s - jnp.max(s, axis=-1, keepdims=True)
            p = jnp.exp(s)
            p = p * pl.reciprocal(jnp.sum(p, axis=-1, keepdims=True),
                                  approx=True)
            ctx_scr[r0:r0 + S, c0:c0 + DH] = jnp.dot(
                p.astype(jnp.bfloat16), v_h, preferred_element_type=jnp.float32)

    # --- output projection + residual LN ---
    attn = jnp.dot(ctx_scr[...].astype(jnp.bfloat16), wo_ref[...],
                   preferred_element_type=jnp.float32) + bo_ref[...]
    x1 = _layernorm(attn + x, ln1_g_ref[...], ln1_b_ref[...])

    # --- FFN + residual LN ---
    h1 = jnp.dot(x1.astype(jnp.bfloat16), w1_ref[...],
                 preferred_element_type=jnp.float32) + b1_ref[...]
    h1 = _gelu(h1)
    ffn = jnp.dot(h1.astype(jnp.bfloat16), w2_ref[...],
                  preferred_element_type=jnp.float32) + b2_ref[...]
    x2 = _layernorm(ffn + x1, ln2_g_ref[...], ln2_b_ref[...])
    x_scr[...] = x2

    # --- pooler (CLS, dense+tanh) + dropout(identity) + classifier + ReLU ---
    @pl.when(l == pl.num_programs(0) - 1)
    def _():
        cls = jnp.concatenate([x2[b * S:b * S + 1, :] for b in range(B)],
                              axis=0)                # (B, H)
        pooled = jnp.tanh(
            jnp.dot(cls.astype(jnp.bfloat16), pool_w_ref[...],
                    preferred_element_type=jnp.float32) + pool_b_ref[...])
        # TODO(synk): nn.Dropout(0.5) realized as identity (eval-mode
        # semantics); training-mode Bernoulli masking not implemented.
        logits = jnp.dot(pooled.astype(jnp.bfloat16), cls_w_ref[...],
                         preferred_element_type=jnp.float32) + cls_b_ref[...]
        logits_ref[...] = jnp.maximum(logits, 0.0)   # (B, CLS_PAD)


def bert_encoder_classifier(emb, addmask, packed):
    const2 = lambda l: (0, 0)
    stacked = lambda l: (l, 0, 0)
    full2 = lambda shape: pl.BlockSpec(shape, const2)
    stk = lambda shape: pl.BlockSpec((None,) + shape, stacked)

    return pl.pallas_call(
        _encoder_kernel,
        out_shape=jax.ShapeDtypeStruct((B, CLS_PAD), jnp.float32),
        grid=(L,),
        in_specs=[
            full2((BS, H)),                 # emb (post word+pos+type sum)
            full2((B, S)),                  # additive attention mask
            full2((1, H)), full2((1, H)),   # embedding LN gamma / beta
            stk((H, 3 * H)), stk((1, 3 * H)),   # wqkv, bqkv (stacked over L)
            stk((H, H)), stk((1, H)),           # wo, bo
            stk((1, H)), stk((1, H)),           # ln1 gamma / beta
            stk((H, FF)), stk((1, FF)),         # w1, b1
            stk((FF, H)), stk((1, H)),          # w2, b2
            stk((1, H)), stk((1, H)),           # ln2 gamma / beta
            full2((H, H)), full2((1, H)),       # pooler W, b
            full2((H, CLS_PAD)), full2((1, CLS_PAD)),  # classifier (padded)
        ],
        out_specs=pl.BlockSpec((B, CLS_PAD), const2),
        scratch_shapes=[pltpu.VMEM((BS, H), jnp.float32),   # residual stream
                        pltpu.VMEM((BS, H), jnp.float32)],  # attention ctx
        compiler_params=pltpu.CompilerParams(
            dimension_semantics=("arbitrary",)),            # layers: sequential
    )(emb, addmask,
      packed["emb_ln_g"], packed["emb_ln_b"],
      packed["wqkv"], packed["bqkv"], packed["wo"], packed["bo"],
      packed["ln1_g"], packed["ln1_b"],
      packed["w1"], packed["b1"], packed["w2"], packed["b2"],
      packed["ln2_g"], packed["ln2_b"],
      packed["pool_w"], packed["pool_b"], packed["cls_w"], packed["cls_b"])


# ---------------- deterministic parameter init + packing ----------------
def init_params(key):
    def norm(k, shape):
        return 0.02 * jax.random.normal(k, shape, jnp.float32)

    keys = iter(jax.random.split(key, 64))
    p = {
        "word_emb": norm(next(keys), (VOCAB, H)),
        "pos_emb": norm(next(keys), (S, H)),
        "type_emb": norm(next(keys), (2, H)),
        "emb_ln_g": jnp.ones((H,), jnp.float32),
        "emb_ln_b": jnp.zeros((H,), jnp.float32),
        "layers": [],
    }
    for _ in range(L):
        p["layers"].append({
            "wq": norm(next(keys), (H, H)), "bq": jnp.zeros((H,), jnp.float32),
            "wk": norm(next(keys), (H, H)), "bk": jnp.zeros((H,), jnp.float32),
            "wv": norm(next(keys), (H, H)), "bv": jnp.zeros((H,), jnp.float32),
            "wo": norm(next(keys), (H, H)), "bo": jnp.zeros((H,), jnp.float32),
            "ln1_g": jnp.ones((H,), jnp.float32), "ln1_b": jnp.zeros((H,), jnp.float32),
            "w1": norm(next(keys), (H, FF)), "b1": jnp.zeros((FF,), jnp.float32),
            "w2": norm(next(keys), (FF, H)), "b2": jnp.zeros((H,), jnp.float32),
            "ln2_g": jnp.ones((H,), jnp.float32), "ln2_b": jnp.zeros((H,), jnp.float32),
        })
    p["pool_w"] = norm(next(keys), (H, H))
    p["pool_b"] = jnp.zeros((H,), jnp.float32)
    p["cls_w"] = norm(next(keys), (H, NUM_CLASSES))
    p["cls_b"] = jnp.zeros((NUM_CLASSES,), jnp.float32)
    return p


def pack_params(p):
    """Stack per-layer weights over L; matmul weights -> bf16 (f32 accumulate)."""
    bf = jnp.bfloat16

    def stack(fn):
        return jnp.stack([fn(lp) for lp in p["layers"]], axis=0)

    return {
        "word_emb": p["word_emb"],
        "pos_emb": p["pos_emb"],
        "type_emb0": p["type_emb"][0],
        "emb_ln_g": p["emb_ln_g"].reshape(1, H),
        "emb_ln_b": p["emb_ln_b"].reshape(1, H),
        "wqkv": stack(lambda lp: jnp.concatenate(
            [lp["wq"], lp["wk"], lp["wv"]], axis=1)).astype(bf),
        "bqkv": stack(lambda lp: jnp.concatenate(
            [lp["bq"], lp["bk"], lp["bv"]], axis=0).reshape(1, 3 * H)),
        "wo": stack(lambda lp: lp["wo"]).astype(bf),
        "bo": stack(lambda lp: lp["bo"].reshape(1, H)),
        "ln1_g": stack(lambda lp: lp["ln1_g"].reshape(1, H)),
        "ln1_b": stack(lambda lp: lp["ln1_b"].reshape(1, H)),
        "w1": stack(lambda lp: lp["w1"]).astype(bf),
        "b1": stack(lambda lp: lp["b1"].reshape(1, FF)),
        "w2": stack(lambda lp: lp["w2"]).astype(bf),
        "b2": stack(lambda lp: lp["b2"].reshape(1, H)),
        "ln2_g": stack(lambda lp: lp["ln2_g"].reshape(1, H)),
        "ln2_b": stack(lambda lp: lp["ln2_b"].reshape(1, H)),
        "pool_w": p["pool_w"].astype(bf),
        "pool_b": p["pool_b"].reshape(1, H),
        "cls_w": jnp.zeros((H, CLS_PAD), jnp.float32)
                   .at[:, :NUM_CLASSES].set(p["cls_w"]).astype(bf),
        "cls_b": jnp.zeros((1, CLS_PAD), jnp.float32)
                   .at[0, :NUM_CLASSES].set(p["cls_b"]),
    }


# ---------------- forward pass ----------------
@jax.jit
def bert_classifier_forward(packed, input_ids, attention_mask):
    # Embedding lookup (gather) + sums stay in XLA; everything else is one
    # fused Pallas kernel.
    emb = (packed["word_emb"][input_ids]
           + packed["pos_emb"][None, :, :]
           + packed["type_emb0"][None, None, :]).reshape(BS, H)
    addmask = (1.0 - attention_mask.astype(jnp.float32)) * -1e9   # (B, S)
    logits_pad = bert_encoder_classifier(emb, addmask, packed)    # (B, 128)
    return logits_pad[:, :NUM_CLASSES]                            # (B, 2)


if __name__ == "__main__":
    key = jax.random.PRNGKey(0)
    pkey, ikey = jax.random.split(key)
    params = init_params(pkey)
    packed = pack_params(params)
    input_ids = jax.random.randint(ikey, (B, S), 0, VOCAB, dtype=jnp.int32)
    attention_mask = jnp.ones((B, S), jnp.int32).at[:, -4:].set(0)  # pad last 4

    out = bert_classifier_forward(packed, input_ids, attention_mask)
    out = jax.block_until_ready(out)
    assert out.shape == (B, NUM_CLASSES) and out.dtype == jnp.float32
    assert bool(jnp.all(out >= 0.0))  # ReLU output
    print("KERNEL_OK")
</pallas_src>

<mosaic_0001>
module attributes {stable_mosaic.version = 11 : i64} {
  func.func @_encoder_kernel(%arg0: i32, %arg1: memref<32x128xf32, #tpu.memory_space<vmem>>, %arg2: memref<2x16xf32, #tpu.memory_space<vmem>>, %arg3: memref<1x128xf32, #tpu.memory_space<vmem>>, %arg4: memref<1x128xf32, #tpu.memory_space<vmem>>, %arg5: memref<1x128x384xbf16, #tpu.memory_space<vmem>>, %arg6: memref<1x1x384xf32, #tpu.memory_space<vmem>>, %arg7: memref<1x128x128xbf16, #tpu.memory_space<vmem>>, %arg8: memref<1x1x128xf32, #tpu.memory_space<vmem>>, %arg9: memref<1x1x128xf32, #tpu.memory_space<vmem>>, %arg10: memref<1x1x128xf32, #tpu.memory_space<vmem>>, %arg11: memref<1x128x256xbf16, #tpu.memory_space<vmem>>, %arg12: memref<1x1x256xf32, #tpu.memory_space<vmem>>, %arg13: memref<1x256x128xbf16, #tpu.memory_space<vmem>>, %arg14: memref<1x1x128xf32, #tpu.memory_space<vmem>>, %arg15: memref<1x1x128xf32, #tpu.memory_space<vmem>>, %arg16: memref<1x1x128xf32, #tpu.memory_space<vmem>>, %arg17: memref<128x128xbf16, #tpu.memory_space<vmem>>, %arg18: memref<1x128xf32, #tpu.memory_space<vmem>>, %arg19: memref<128x128xbf16, #tpu.memory_space<vmem>>, %arg20: memref<1x128xf32, #tpu.memory_space<vmem>>, %arg21: memref<2x128xf32, #tpu.memory_space<vmem>>, %arg22: memref<32x128xf32, #tpu.memory_space<vmem>>, %arg23: memref<32x128xf32, #tpu.memory_space<vmem>>) attributes {dimension_semantics = [#tpu.dimension_semantics<arbitrary>], iteration_bounds = array<i64: 2>, scalar_prefetch = 0 : i64, scratch_operands = 2 : i64, tpu.core_type = #tpu.core_type<tc>, window_params = [{pipeline_mode = #tpu.pipeline_mode<synchronous>, transform_indices = @transform_0, window_bounds = array<i64: 32, 128>}, {pipeline_mode = #tpu.pipeline_mode<synchronous>, transform_indices = @transform_1, window_bounds = array<i64: 2, 16>}, {pipeline_mode = #tpu.pipeline_mode<synchronous>, transform_indices = @transform_2, window_bounds = array<i64: 1, 128>}, {pipeline_mode = #tpu.pipeline_mode<synchronous>, transform_indices = @transform_3, window_bounds = array<i64: 1, 128>}, {transform_indices = @transform_4, window_bounds = array<i64: 1, 128, 384>}, {transform_indices = @transform_5, window_bounds = array<i64: 1, 1, 384>}, {transform_indices = @transform_6, window_bounds = array<i64: 1, 128, 128>}, {transform_indices = @transform_7, window_bounds = array<i64: 1, 1, 128>}, {transform_indices = @transform_8, window_bounds = array<i64: 1, 1, 128>}, {transform_indices = @transform_9, window_bounds = array<i64: 1, 1, 128>}, {transform_indices = @transform_10, window_bounds = array<i64: 1, 128, 256>}, {transform_indices = @transform_11, window_bounds = array<i64: 1, 1, 256>}, {transform_indices = @transform_12, window_bounds = array<i64: 1, 256, 128>}, {transform_indices = @transform_13, window_bounds = array<i64: 1, 1, 128>}, {transform_indices = @transform_14, window_bounds = array<i64: 1, 1, 128>}, {transform_indices = @transform_15, window_bounds = array<i64: 1, 1, 128>}, {pipeline_mode = #tpu.pipeline_mode<synchronous>, transform_indices = @transform_16, window_bounds = array<i64: 128, 128>}, {pipeline_mode = #tpu.pipeline_mode<synchronous>, transform_indices = @transform_17, window_bounds = array<i64: 1, 128>}, {pipeline_mode = #tpu.pipeline_mode<synchronous>, transform_indices = @transform_18, window_bounds = array<i64: 128, 128>}, {pipeline_mode = #tpu.pipeline_mode<synchronous>, transform_indices = @transform_19, window_bounds = array<i64: 1, 128>}, {pipeline_mode = #tpu.pipeline_mode<synchronous>, transform_indices = @transform_20, window_bounds = array<i64: 2, 128>}]} {
    %c0_i32 = arith.constant 0 : i32
    %0 = arith.cmpi eq, %arg0, %c0_i32 : i32
    %1 = arith.extui %0 : i1 to i32
    %c0_i32_0 = arith.constant 0 : i32
    %2 = arith.cmpi ne, %1, %c0_i32_0 : i32
    scf.if %2 {
      %c0_115 = arith.constant 0 : index
      %c0_116 = arith.constant 0 : index
      %280 = vector.load %arg1[%c0_115, %c0_116] : memref<32x128xf32, #tpu.memory_space<vmem>>, vector<32x128xf32>
      %c0_117 = arith.constant 0 : index
      %c0_118 = arith.constant 0 : index
      %281 = vector.load %arg3[%c0_117, %c0_118] : memref<1x128xf32, #tpu.memory_space<vmem>>, vector<1x128xf32>
      %c0_119 = arith.constant 0 : index
      %c0_120 = arith.constant 0 : index
      %282 = vector.load %arg4[%c0_119, %c0_120] : memref<1x128xf32, #tpu.memory_space<vmem>>, vector<1x128xf32>
      %cst_121 = arith.constant dense<0.000000e+00> : vector<32xf32>
      %283 = vector.multi_reduction <add>, %280, %cst_121 [1] : vector<32x128xf32> to vector<32xf32>
      %284 = vector.shape_cast %283 : vector<32xf32> to vector<32x1xf32>
      %cst_122 = arith.constant 1.280000e+02 : f32
      %285 = vector.broadcast %cst_122 : f32 to vector<32x1xf32>
      %286 = arith.divf %284, %285 : vector<32x1xf32>
      %287 = vector.broadcast %286 : vector<32x1xf32> to vector<32x128xf32>
      %288 = arith.subf %280, %287 : vector<32x128xf32>
      %289 = arith.mulf %288, %288 : vector<32x128xf32>
      %cst_123 = arith.constant dense<0.000000e+00> : vector<32xf32>
      %290 = vector.multi_reduction <add>, %289, %cst_123 [1] : vector<32x128xf32> to vector<32xf32>
      %291 = vector.shape_cast %290 : vector<32xf32> to vector<32x1xf32>
      %cst_124 = arith.constant 1.280000e+02 : f32
      %292 = vector.broadcast %cst_124 : f32 to vector<32x1xf32>
      %293 = arith.divf %291, %292 : vector<32x1xf32>
      %cst_125 = arith.constant 9.99999996E-13 : f32
      %294 = vector.broadcast %cst_125 : f32 to vector<32x1xf32>
      %295 = arith.addf %293, %294 : vector<32x1xf32>
      %296 = math.rsqrt %295 : vector<32x1xf32>
      %297 = vector.broadcast %296 : vector<32x1xf32> to vector<32x128xf32>
      %298 = arith.mulf %288, %297 : vector<32x128xf32>
      %299 = vector.broadcast %281 : vector<1x128xf32> to vector<32x128xf32>
      %300 = arith.mulf %298, %299 : vector<32x128xf32>
      %301 = vector.broadcast %282 : vector<1x128xf32> to vector<32x128xf32>
      %302 = arith.addf %300, %301 : vector<32x128xf32>
      %c0_126 = arith.constant 0 : index
      %c0_127 = arith.constant 0 : index
      %303 = vector.load %arg22[%c0_126, %c0_127] : memref<32x128xf32, #tpu.memory_space<vmem>>, vector<32x128xf32>
      tpu.vector_store %arg22[%c0_126, %c0_127], %302 {strides = array<i32>} : memref<32x128xf32, #tpu.memory_space<vmem>>, vector<32x128xf32>,
    } else {
    }
    %c0 = arith.constant 0 : index
    %c0_1 = arith.constant 0 : index
    %3 = vector.load %arg22[%c0, %c0_1] : memref<32x128xf32, #tpu.memory_space<vmem>>, vector<32x128xf32>
    %4 = arith.truncf %3 : vector<32x128xf32> to vector<32x128xbf16>
    %c0_2 = arith.constant 0 : index
    %c0_3 = arith.constant 0 : index
    %c0_4 = arith.constant 0 : index
    %5 = vector.load %arg5[%c0_2, %c0_3, %c0_4] : memref<1x128x384xbf16, #tpu.memory_space<vmem>>, vector<1x128x384xbf16>
    %6 = vector.shape_cast %5 : vector<1x128x384xbf16> to vector<128x384xbf16>
    %cst = arith.constant dense<0.000000e+00> : vector<32x384xf32>
    %7 = tpu.matmul %4, %6, %cst {dimension_numbers = #tpu.dot_dimension_numbers<[1], [0], [0], [1], [0, 0, 1, 1], [], []>} : vector<32x128xbf16>, vector<128x384xbf16>, vector<32x384xf32> -> vector<32x384xf32>
    %c0_5 = arith.constant 0 : index
    %c0_6 = arith.constant 0 : index
    %c0_7 = arith.constant 0 : index
    %8 = vector.load %arg6[%c0_5, %c0_6, %c0_7] : memref<1x1x384xf32, #tpu.memory_space<vmem>>, vector<1x1x384xf32>
    %9 = vector.shape_cast %8 : vector<1x1x384xf32> to vector<1x384xf32>
    %10 = vector.broadcast %9 : vector<1x384xf32> to vector<32x384xf32>
    %11 = arith.addf %7, %10 : vector<32x384xf32>
    %12 = vector.extract_strided_slice %11 {offsets = [0, 0], sizes = [32, 128], strides = [1, 1]} : vector<32x384xf32> to vector<32x128xf32>
    %13 = arith.truncf %12 : vector<32x128xf32> to vector<32x128xbf16>
    %14 = vector.extract_strided_slice %11 {offsets = [0, 128], sizes = [32, 128], strides = [1, 1]} : vector<32x384xf32> to vector<32x128xf32>
    %15 = arith.truncf %14 : vector<32x128xf32> to vector<32x128xbf16>
    %16 = vector.extract_strided_slice %11 {offsets = [0, 256], sizes = [32, 128], strides = [1, 1]} : vector<32x384xf32> to vector<32x128xf32>
    %17 = arith.truncf %16 : vector<32x128xf32> to vector<32x128xbf16>
    %c0_8 = arith.constant 0 : index
    %c0_9 = arith.constant 0 : index
    %18 = vector.load %arg2[%c0_8, %c0_9] : memref<2x16xf32, #tpu.memory_space<vmem>>, vector<1x16xf32>
    %19 = vector.extract_strided_slice %13 {offsets = [0, 0], sizes = [16, 32], strides = [1, 1]} : vector<32x128xbf16> to vector<16x32xbf16>
    %20 = vector.extract_strided_slice %15 {offsets = [0, 0], sizes = [16, 32], strides = [1, 1]} : vector<32x128xbf16> to vector<16x32xbf16>
    %21 = vector.extract_strided_slice %17 {offsets = [0, 0], sizes = [16, 32], strides = [1, 1]} : vector<32x128xbf16> to vector<16x32xbf16>
    %cst_10 = arith.constant dense<0.000000e+00> : vector<16x16xf32>
    %22 = tpu.matmul %19, %20, %cst_10 {dimension_numbers = #tpu.dot_dimension_numbers<[1], [1], [0], [0], [0, 0, 1, 0], [], []>} : vector<16x32xbf16>, vector<16x32xbf16>, vector<16x16xf32> -> vector<16x16xf32>
    %cst_11 = arith.constant 0.176776692 : f32
    %23 = vector.broadcast %cst_11 : f32 to vector<16x16xf32>
    %24 = arith.mulf %22, %23 : vector<16x16xf32>
    %25 = vector.broadcast %18 : vector<1x16xf32> to vector<16x16xf32>
    %26 = arith.addf %24, %25 : vector<16x16xf32>
    %cst_12 = arith.constant dense<0xFF800000> : vector<16xf32>
    %27 = vector.multi_reduction <maximumf>, %26, %cst_12 [1] : vector<16x16xf32> to vector<16xf32>
    %28 = vector.shape_cast %27 : vector<16xf32> to vector<16x1xf32>
    %29 = vector.broadcast %28 : vector<16x1xf32> to vector<16x16xf32>
    %30 = arith.subf %26, %29 : vector<16x16xf32>
    %31 = math.exp %30 : vector<16x16xf32>
    %cst_13 = arith.constant dense<0.000000e+00> : vector<16xf32>
    %32 = vector.multi_reduction <add>, %31, %cst_13 [1] : vector<16x16xf32> to vector<16xf32>
    %33 = vector.shape_cast %32 : vector<16xf32> to vector<16x1xf32>
    %34 = tpu.reciprocal %33 {approx = true} : vector<16x1xf32> -> vector<16x1xf32>
    %35 = vector.broadcast %34 : vector<16x1xf32> to vector<16x16xf32>
    %36 = arith.mulf %31, %35 : vector<16x16xf32>
    %37 = arith.truncf %36 : vector<16x16xf32> to vector<16x16xbf16>
    %cst_14 = arith.constant dense<0.000000e+00> : vector<16x32xf32>
    %38 = tpu.matmul %37, %21, %cst_14 {dimension_numbers = #tpu.dot_dimension_numbers<[1], [0], [0], [1], [0, 0, 1, 1], [], []>} : vector<16x16xbf16>, vector<16x32xbf16>, vector<16x32xf32> -> vector<16x32xf32>
    %c0_15 = arith.constant 0 : index
    %c0_16 = arith.constant 0 : index
    %39 = vector.load %arg23[%c0_15, %c0_16] : memref<32x128xf32, #tpu.memory_space<vmem>>, vector<16x32xf32>
    tpu.vector_store %arg23[%c0_15, %c0_16], %38 {strides = array<i32>} : memref<32x128xf32, #tpu.memory_space<vmem>>, vector<16x32xf32>,
    %40 = vector.extract_strided_slice %13 {offsets = [0, 32], sizes = [16, 32], strides = [1, 1]} : vector<32x128xbf16> to vector<16x32xbf16>
    %41 = vector.extract_strided_slice %15 {offsets = [0, 32], sizes = [16, 32], strides = [1, 1]} : vector<32x128xbf16> to vector<16x32xbf16>
    %42 = vector.extract_strided_slice %17 {offsets = [0, 32], sizes = [16, 32], strides = [1, 1]} : vector<32x128xbf16> to vector<16x32xbf16>
    %cst_17 = arith.constant dense<0.000000e+00> : vector<16x16xf32>
    %43 = tpu.matmul %40, %41, %cst_17 {dimension_numbers = #tpu.dot_dimension_numbers<[1], [1], [0], [0], [0, 0, 1, 0], [], []>} : vector<16x32xbf16>, vector<16x32xbf16>, vector<16x16xf32> -> vector<16x16xf32>
    %cst_18 = arith.constant 0.176776692 : f32
    %44 = vector.broadcast %cst_18 : f32 to vector<16x16xf32>
    %45 = arith.mulf %43, %44 : vector<16x16xf32>
    %46 = vector.broadcast %18 : vector<1x16xf32> to vector<16x16xf32>
    %47 = arith.addf %45, %46 : vector<16x16xf32>
    %cst_19 = arith.constant dense<0xFF800000> : vector<16xf32>
    %48 = vector.multi_reduction <maximumf>, %47, %cst_19 [1] : vector<16x16xf32> to vector<16xf32>
    %49 = vector.shape_cast %48 : vector<16xf32> to vector<16x1xf32>
    %50 = vector.broadcast %49 : vector<16x1xf32> to vector<16x16xf32>
    %51 = arith.subf %47, %50 : vector<16x16xf32>
    %52 = math.exp %51 : vector<16x16xf32>
    %cst_20 = arith.constant dense<0.000000e+00> : vector<16xf32>
    %53 = vector.multi_reduction <add>, %52, %cst_20 [1] : vector<16x16xf32> to vector<16xf32>
    %54 = vector.shape_cast %53 : vector<16xf32> to vector<16x1xf32>
    %55 = tpu.reciprocal %54 {approx = true} : vector<16x1xf32> -> vector<16x1xf32>
    %56 = vector.broadcast %55 : vector<16x1xf32> to vector<16x16xf32>
    %57 = arith.mulf %52, %56 : vector<16x16xf32>
    %58 = arith.truncf %57 : vector<16x16xf32> to vector<16x16xbf16>
    %cst_21 = arith.constant dense<0.000000e+00> : vector<16x32xf32>
    %59 = tpu.matmul %58, %42, %cst_21 {dimension_numbers = #tpu.dot_dimension_numbers<[1], [0], [0], [1], [0, 0, 1, 1], [], []>} : vector<16x16xbf16>, vector<16x32xbf16>, vector<16x32xf32> -> vector<16x32xf32>
    %c0_22 = arith.constant 0 : index
    %c32 = arith.constant 32 : index
    %60 = vector.load %arg23[%c0_22, %c32] : memref<32x128xf32, #tpu.memory_space<vmem>>, vector<16x32xf32>
    tpu.vector_store %arg23[%c0_22, %c32], %59 {strides = array<i32>} : memref<32x128xf32, #tpu.memory_space<vmem>>, vector<16x32xf32>,
    %61 = vector.extract_strided_slice %13 {offsets = [0, 64], sizes = [16, 32], strides = [1, 1]} : vector<32x128xbf16> to vector<16x32xbf16>
    %62 = vector.extract_strided_slice %15 {offsets = [0, 64], sizes = [16, 32], strides = [1, 1]} : vector<32x128xbf16> to vector<16x32xbf16>
    %63 = vector.extract_strided_slice %17 {offsets = [0, 64], sizes = [16, 32], strides = [1, 1]} : vector<32x128xbf16> to vector<16x32xbf16>
    %cst_23 = arith.constant dense<0.000000e+00> : vector<16x16xf32>
    %64 = tpu.matmul %61, %62, %cst_23 {dimension_numbers = #tpu.dot_dimension_numbers<[1], [1], [0], [0], [0, 0, 1, 0], [], []>} : vector<16x32xbf16>, vector<16x32xbf16>, vector<16x16xf32> -> vector<16x16xf32>
    %cst_24 = arith.constant 0.176776692 : f32
    %65 = vector.broadcast %cst_24 : f32 to vector<16x16xf32>
    %66 = arith.mulf %64, %65 : vector<16x16xf32>
    %67 = vector.broadcast %18 : vector<1x16xf32> to vector<16x16xf32>
    %68 = arith.addf %66, %67 : vector<16x16xf32>
    %cst_25 = arith.constant dense<0xFF800000> : vector<16xf32>
    %69 = vector.multi_reduction <maximumf>, %68, %cst_25 [1] : vector<16x16xf32> to vector<16xf32>
    %70 = vector.shape_cast %69 : vector<16xf32> to vector<16x1xf32>
    %71 = vector.broadcast %70 : vector<16x1xf32> to vector<16x16xf32>
    %72 = arith.subf %68, %71 : vector<16x16xf32>
    %73 = math.exp %72 : vector<16x16xf32>
    %cst_26 = arith.constant dense<0.000000e+00> : vector<16xf32>
    %74 = vector.multi_reduction <add>, %73, %cst_26 [1] : vector<16x16xf32> to vector<16xf32>
    %75 = vector.shape_cast %74 : vector<16xf32> to vector<16x1xf32>
    %76 = tpu.reciprocal %75 {approx = true} : vector<16x1xf32> -> vector<16x1xf32>
    %77 = vector.broadcast %76 : vector<16x1xf32> to vector<16x16xf32>
    %78 = arith.mulf %73, %77 : vector<16x16xf32>
    %79 = arith.truncf %78 : vector<16x16xf32> to vector<16x16xbf16>
    %cst_27 = arith.constant dense<0.000000e+00> : vector<16x32xf32>
    %80 = tpu.matmul %79, %63, %cst_27 {dimension_numbers = #tpu.dot_dimension_numbers<[1], [0], [0], [1], [0, 0, 1, 1], [], []>} : vector<16x16xbf16>, vector<16x32xbf16>, vector<16x32xf32> -> vector<16x32xf32>
    %c0_28 = arith.constant 0 : index
    %c64 = arith.constant 64 : index
    %81 = vector.load %arg23[%c0_28, %c64] : memref<32x128xf32, #tpu.memory_space<vmem>>, vector<16x32xf32>
    tpu.vector_store %arg23[%c0_28, %c64], %80 {strides = array<i32>} : memref<32x128xf32, #tpu.memory_space<vmem>>, vector<16x32xf32>,
    %82 = vector.extract_strided_slice %13 {offsets = [0, 96], sizes = [16, 32], strides = [1, 1]} : vector<32x128xbf16> to vector<16x32xbf16>
    %83 = vector.extract_strided_slice %15 {offsets = [0, 96], sizes = [16, 32], strides = [1, 1]} : vector<32x128xbf16> to vector<16x32xbf16>
    %84 = vector.extract_strided_slice %17 {offsets = [0, 96], sizes = [16, 32], strides = [1, 1]} : vector<32x128xbf16> to vector<16x32xbf16>
    %cst_29 = arith.constant dense<0.000000e+00> : vector<16x16xf32>
    %85 = tpu.matmul %82, %83, %cst_29 {dimension_numbers = #tpu.dot_dimension_numbers<[1], [1], [0], [0], [0, 0, 1, 0], [], []>} : vector<16x32xbf16>, vector<16x32xbf16>, vector<16x16xf32> -> vector<16x16xf32>
    %cst_30 = arith.constant 0.176776692 : f32
    %86 = vector.broadcast %cst_30 : f32 to vector<16x16xf32>
    %87 = arith.mulf %85, %86 : vector<16x16xf32>
    %88 = vector.broadcast %18 : vector<1x16xf32> to vector<16x16xf32>
    %89 = arith.addf %87, %88 : vector<16x16xf32>
    %cst_31 = arith.constant dense<0xFF800000> : vector<16xf32>
    %90 = vector.multi_reduction <maximumf>, %89, %cst_31 [1] : vector<16x16xf32> to vector<16xf32>
    %91 = vector.shape_cast %90 : vector<16xf32> to vector<16x1xf32>
    %92 = vector.broadcast %91 : vector<16x1xf32> to vector<16x16xf32>
    %93 = arith.subf %89, %92 : vector<16x16xf32>
    %94 = math.exp %93 : vector<16x16xf32>
    %cst_32 = arith.constant dense<0.000000e+00> : vector<16xf32>
    %95 = vector.multi_reduction <add>, %94, %cst_32 [1] : vector<16x16xf32> to vector<16xf32>
    %96 = vector.shape_cast %95 : vector<16xf32> to vector<16x1xf32>
    %97 = tpu.reciprocal %96 {approx = true} : vector<16x1xf32> -> vector<16x1xf32>
    %98 = vector.broadcast %97 : vector<16x1xf32> to vector<16x16xf32>
    %99 = arith.mulf %94, %98 : vector<16x16xf32>
    %100 = arith.truncf %99 : vector<16x16xf32> to vector<16x16xbf16>
    %cst_33 = arith.constant dense<0.000000e+00> : vector<16x32xf32>
    %101 = tpu.matmul %100, %84, %cst_33 {dimension_numbers = #tpu.dot_dimension_numbers<[1], [0], [0], [1], [0, 0, 1, 1], [], []>} : vector<16x16xbf16>, vector<16x32xbf16>, vector<16x32xf32> -> vector<16x32xf32>
    %c0_34 = arith.constant 0 : index
    %c96 = arith.constant 96 : index
    %102 = vector.load %arg23[%c0_34, %c96] : memref<32x128xf32, #tpu.memory_space<vmem>>, vector<16x32xf32>
    tpu.vector_store %arg23[%c0_34, %c96], %101 {strides = array<i32>} : memref<32x128xf32, #tpu.memory_space<vmem>>, vector<16x32xf32>,
    %c1 = arith.constant 1 : index
    %c0_35 = arith.constant 0 : index
    %103 = vector.load %arg2[%c1, %c0_35] : memref<2x16xf32, #tpu.memory_space<vmem>>, vector<1x16xf32>
    %104 = vector.extract_strided_slice %13 {offsets = [16, 0], sizes = [16, 32], strides = [1, 1]} : vector<32x128xbf16> to vector<16x32xbf16>
    %105 = vector.extract_strided_slice %15 {offsets = [16, 0], sizes = [16, 32], strides = [1, 1]} : vector<32x128xbf16> to vector<16x32xbf16>
    %106 = vector.extract_strided_slice %17 {offsets = [16, 0], sizes = [16, 32], strides = [1, 1]} : vector<32x128xbf16> to vector<16x32xbf16>
    %cst_36 = arith.constant dense<0.000000e+00> : vector<16x16xf32>
    %107 = tpu.matmul %104, %105, %cst_36 {dimension_numbers = #tpu.dot_dimension_numbers<[1], [1], [0], [0], [0, 0, 1, 0], [], []>} : vector<16x32xbf16>, vector<16x32xbf16>, vector<16x16xf32> -> vector<16x16xf32>
    %cst_37 = arith.constant 0.176776692 : f32
    %108 = vector.broadcast %cst_37 : f32 to vector<16x16xf32>
    %109 = arith.mulf %107, %108 : vector<16x16xf32>
    %110 = vector.broadcast %103 : vector<1x16xf32> to vector<16x16xf32>
    %111 = arith.addf %109, %110 : vector<16x16xf32>
    %cst_38 = arith.constant dense<0xFF800000> : vector<16xf32>
    %112 = vector.multi_reduction <maximumf>, %111, %cst_38 [1] : vector<16x16xf32> to vector<16xf32>
    %113 = vector.shape_cast %112 : vector<16xf32> to vector<16x1xf32>
    %114 = vector.broadcast %113 : vector<16x1xf32> to vector<16x16xf32>
    %115 = arith.subf %111, %114 : vector<16x16xf32>
    %116 = math.exp %115 : vector<16x16xf32>
    %cst_39 = arith.constant dense<0.000000e+00> : vector<16xf32>
    %117 = vector.multi_reduction <add>, %116, %cst_39 [1] : vector<16x16xf32> to vector<16xf32>
    %118 = vector.shape_cast %117 : vector<16xf32> to vector<16x1xf32>
    %119 = tpu.reciprocal %118 {approx = true} : vector<16x1xf32> -> vector<16x1xf32>
    %120 = vector.broadcast %119 : vector<16x1xf32> to vector<16x16xf32>
    %121 = arith.mulf %116, %120 : vector<16x16xf32>
    %122 = arith.truncf %121 : vector<16x16xf32> to vector<16x16xbf16>
    %cst_40 = arith.constant dense<0.000000e+00> : vector<16x32xf32>
    %123 = tpu.matmul %122, %106, %cst_40 {dimension_numbers = #tpu.dot_dimension_numbers<[1], [0], [0], [1], [0, 0, 1, 1], [], []>} : vector<16x16xbf16>, vector<16x32xbf16>, vector<16x32xf32> -> vector<16x32xf32>
    %c16 = arith.constant 16 : index
    %c0_41 = arith.constant 0 : index
    %124 = vector.load %arg23[%c16, %c0_41] : memref<32x128xf32, #tpu.memory_space<vmem>>, vector<16x32xf32>
    tpu.vector_store %arg23[%c16, %c0_41], %123 {strides = array<i32>} : memref<32x128xf32, #tpu.memory_space<vmem>>, vector<16x32xf32>,
    %125 = vector.extract_strided_slice %13 {offsets = [16, 32], sizes = [16, 32], strides = [1, 1]} : vector<32x128xbf16> to vector<16x32xbf16>
    %126 = vector.extract_strided_slice %15 {offsets = [16, 32], sizes = [16, 32], strides = [1, 1]} : vector<32x128xbf16> to vector<16x32xbf16>
    %127 = vector.extract_strided_slice %17 {offsets = [16, 32], sizes = [16, 32], strides = [1, 1]} : vector<32x128xbf16> to vector<16x32xbf16>
    %cst_42 = arith.constant dense<0.000000e+00> : vector<16x16xf32>
    %128 = tpu.matmul %125, %126, %cst_42 {dimension_numbers = #tpu.dot_dimension_numbers<[1], [1], [0], [0], [0, 0, 1, 0], [], []>} : vector<16x32xbf16>, vector<16x32xbf16>, vector<16x16xf32> -> vector<16x16xf32>
    %cst_43 = arith.constant 0.176776692 : f32
    %129 = vector.broadcast %cst_43 : f32 to vector<16x16xf32>
    %130 = arith.mulf %128, %129 : vector<16x16xf32>
    %131 = vector.broadcast %103 : vector<1x16xf32> to vector<16x16xf32>
    %132 = arith.addf %130, %131 : vector<16x16xf32>
    %cst_44 = arith.constant dense<0xFF800000> : vector<16xf32>
    %133 = vector.multi_reduction <maximumf>, %132, %cst_44 [1] : vector<16x16xf32> to vector<16xf32>
    %134 = vector.shape_cast %133 : vector<16xf32> to vector<16x1xf32>
    %135 = vector.broadcast %134 : vector<16x1xf32> to vector<16x16xf32>
    %136 = arith.subf %132, %135 : vector<16x16xf32>
    %137 = math.exp %136 : vector<16x16xf32>
    %cst_45 = arith.constant dense<0.000000e+00> : vector<16xf32>
    %138 = vector.multi_reduction <add>, %137, %cst_45 [1] : vector<16x16xf32> to vector<16xf32>
    %139 = vector.shape_cast %138 : vector<16xf32> to vector<16x1xf32>
    %140 = tpu.reciprocal %139 {approx = true} : vector<16x1xf32> -> vector<16x1xf32>
    %141 = vector.broadcast %140 : vector<16x1xf32> to vector<16x16xf32>
    %142 = arith.mulf %137, %141 : vector<16x16xf32>
    %143 = arith.truncf %142 : vector<16x16xf32> to vector<16x16xbf16>
    %cst_46 = arith.constant dense<0.000000e+00> : vector<16x32xf32>
    %144 = tpu.matmul %143, %127, %cst_46 {dimension_numbers = #tpu.dot_dimension_numbers<[1], [0], [0], [1], [0, 0, 1, 1], [], []>} : vector<16x16xbf16>, vector<16x32xbf16>, vector<16x32xf32> -> vector<16x32xf32>
    %c16_47 = arith.constant 16 : index
    %c32_48 = arith.constant 32 : index
    %145 = vector.load %arg23[%c16_47, %c32_48] : memref<32x128xf32, #tpu.memory_space<vmem>>, vector<16x32xf32>
    tpu.vector_store %arg23[%c16_47, %c32_48], %144 {strides = array<i32>} : memref<32x128xf32, #tpu.memory_space<vmem>>, vector<16x32xf32>,
    %146 = vector.extract_strided_slice %13 {offsets = [16, 64], sizes = [16, 32], strides = [1, 1]} : vector<32x128xbf16> to vector<16x32xbf16>
    %147 = vector.extract_strided_slice %15 {offsets = [16, 64], sizes = [16, 32], strides = [1, 1]} : vector<32x128xbf16> to vector<16x32xbf16>
    %148 = vector.extract_strided_slice %17 {offsets = [16, 64], sizes = [16, 32], strides = [1, 1]} : vector<32x128xbf16> to vector<16x32xbf16>
    %cst_49 = arith.constant dense<0.000000e+00> : vector<16x16xf32>
    %149 = tpu.matmul %146, %147, %cst_49 {dimension_numbers = #tpu.dot_dimension_numbers<[1], [1], [0], [0], [0, 0, 1, 0], [], []>} : vector<16x32xbf16>, vector<16x32xbf16>, vector<16x16xf32> -> vector<16x16xf32>
    %cst_50 = arith.constant 0.176776692 : f32
    %150 = vector.broadcast %cst_50 : f32 to vector<16x16xf32>
    %151 = arith.mulf %149, %150 : vector<16x16xf32>
    %152 = vector.broadcast %103 : vector<1x16xf32> to vector<16x16xf32>
    %153 = arith.addf %151, %152 : vector<16x16xf32>
    %cst_51 = arith.constant dense<0xFF800000> : vector<16xf32>
    %154 = vector.multi_reduction <maximumf>, %153, %cst_51 [1] : vector<16x16xf32> to vector<16xf32>
    %155 = vector.shape_cast %154 : vector<16xf32> to vector<16x1xf32>
    %156 = vector.broadcast %155 : vector<16x1xf32> to vector<16x16xf32>
    %157 = arith.subf %153, %156 : vector<16x16xf32>
    %158 = math.exp %157 : vector<16x16xf32>
    %cst_52 = arith.constant dense<0.000000e+00> : vector<16xf32>
    %159 = vector.multi_reduction <add>, %158, %cst_52 [1] : vector<16x16xf32> to vector<16xf32>
    %160 = vector.shape_cast %159 : vector<16xf32> to vector<16x1xf32>
    %161 = tpu.reciprocal %160 {approx = true} : vector<16x1xf32> -> vector<16x1xf32>
    %162 = vector.broadcast %161 : vector<16x1xf32> to vector<16x16xf32>
    %163 = arith.mulf %158, %162 : vector<16x16xf32>
    %164 = arith.truncf %163 : vector<16x16xf32> to vector<16x16xbf16>
    %cst_53 = arith.constant dense<0.000000e+00> : vector<16x32xf32>
    %165 = tpu.matmul %164, %148, %cst_53 {dimension_numbers = #tpu.dot_dimension_numbers<[1], [0], [0], [1], [0, 0, 1, 1], [], []>} : vector<16x16xbf16>, vector<16x32xbf16>, vector<16x32xf32> -> vector<16x32xf32>
    %c16_54 = arith.constant 16 : index
    %c64_55 = arith.constant 64 : index
    %166 = vector.load %arg23[%c16_54, %c64_55] : memref<32x128xf32, #tpu.memory_space<vmem>>, vector<16x32xf32>
    tpu.vector_store %arg23[%c16_54, %c64_55], %165 {strides = array<i32>} : memref<32x128xf32, #tpu.memory_space<vmem>>, vector<16x32xf32>,
    %167 = vector.extract_strided_slice %13 {offsets = [16, 96], sizes = [16, 32], strides = [1, 1]} : vector<32x128xbf16> to vector<16x32xbf16>
    %168 = vector.extract_strided_slice %15 {offsets = [16, 96], sizes = [16, 32], strides = [1, 1]} : vector<32x128xbf16> to vector<16x32xbf16>
    %169 = vector.extract_strided_slice %17 {offsets = [16, 96], sizes = [16, 32], strides = [1, 1]} : vector<32x128xbf16> to vector<16x32xbf16>
    %cst_56 = arith.constant dense<0.000000e+00> : vector<16x16xf32>
    %170 = tpu.matmul %167, %168, %cst_56 {dimension_numbers = #tpu.dot_dimension_numbers<[1], [1], [0], [0], [0, 0, 1, 0], [], []>} : vector<16x32xbf16>, vector<16x32xbf16>, vector<16x16xf32> -> vector<16x16xf32>
    %cst_57 = arith.constant 0.176776692 : f32
    %171 = vector.broadcast %cst_57 : f32 to vector<16x16xf32>
    %172 = arith.mulf %170, %171 : vector<16x16xf32>
    %173 = vector.broadcast %103 : vector<1x16xf32> to vector<16x16xf32>
    %174 = arith.addf %172, %173 : vector<16x16xf32>
    %cst_58 = arith.constant dense<0xFF800000> : vector<16xf32>
    %175 = vector.multi_reduction <maximumf>, %174, %cst_58 [1] : vector<16x16xf32> to vector<16xf32>
    %176 = vector.shape_cast %175 : vector<16xf32> to vector<16x1xf32>
    %177 = vector.broadcast %176 : vector<16x1xf32> to vector<16x16xf32>
    %178 = arith.subf %174, %177 : vector<16x16xf32>
    %179 = math.exp %178 : vector<16x16xf32>
    %cst_59 = arith.constant dense<0.000000e+00> : vector<16xf32>
    %180 = vector.multi_reduction <add>, %179, %cst_59 [1] : vector<16x16xf32> to vector<16xf32>
    %181 = vector.shape_cast %180 : vector<16xf32> to vector<16x1xf32>
    %182 = tpu.reciprocal %181 {approx = true} : vector<16x1xf32> -> vector<16x1xf32>
    %183 = vector.broadcast %182 : vector<16x1xf32> to vector<16x16xf32>
    %184 = arith.mulf %179, %183 : vector<16x16xf32>
    %185 = arith.truncf %184 : vector<16x16xf32> to vector<16x16xbf16>
    %cst_60 = arith.constant dense<0.000000e+00> : vector<16x32xf32>
    %186 = tpu.matmul %185, %169, %cst_60 {dimension_numbers = #tpu.dot_dimension_numbers<[1], [0], [0], [1], [0, 0, 1, 1], [], []>} : vector<16x16xbf16>, vector<16x32xbf16>, vector<16x32xf32> -> vector<16x32xf32>
    %c16_61 = arith.constant 16 : index
    %c96_62 = arith.constant 96 : index
    %187 = vector.load %arg23[%c16_61, %c96_62] : memref<32x128xf32, #tpu.memory_space<vmem>>, vector<16x32xf32>
    tpu.vector_store %arg23[%c16_61, %c96_62], %186 {strides = array<i32>} : memref<32x128xf32, #tpu.memory_space<vmem>>, vector<16x32xf32>,
    %c0_63 = arith.constant 0 : index
    %c0_64 = arith.constant 0 : index
    %188 = vector.load %arg23[%c0_63, %c0_64] : memref<32x128xf32, #tpu.memory_space<vmem>>, vector<32x128xf32>
    %189 = arith.truncf %188 : vector<32x128xf32> to vector<32x128xbf16>
    %c0_65 = arith.constant 0 : index
    %c0_66 = arith.constant 0 : index
    %c0_67 = arith.constant 0 : index
    %190 = vector.load %arg7[%c0_65, %c0_66, %c0_67] : memref<1x128x128xbf16, #tpu.memory_space<vmem>>, vector<1x128x128xbf16>
    %191 = vector.shape_cast %190 : vector<1x128x128xbf16> to vector<128x128xbf16>
    %cst_68 = arith.constant dense<0.000000e+00> : vector<32x128xf32>
    %192 = tpu.matmul %189, %191, %cst_68 {dimension_numbers = #tpu.dot_dimension_numbers<[1], [0], [0], [1], [0, 0, 1, 1], [], []>} : vector<32x128xbf16>, vector<128x128xbf16>, vector<32x128xf32> -> vector<32x128xf32>
    %c0_69 = arith.constant 0 : index
    %c0_70 = arith.constant 0 : index
    %c0_71 = arith.constant 0 : index
    %193 = vector.load %arg8[%c0_69, %c0_70, %c0_71] : memref<1x1x128xf32, #tpu.memory_space<vmem>>, vector<1x1x128xf32>
    %194 = vector.shape_cast %193 : vector<1x1x128xf32> to vector<1x128xf32>
    %195 = vector.broadcast %194 : vector<1x128xf32> to vector<32x128xf32>
    %196 = arith.addf %192, %195 : vector<32x128xf32>
    %197 = arith.addf %196, %3 : vector<32x128xf32>
    %c0_72 = arith.constant 0 : index
    %c0_73 = arith.constant 0 : index
    %c0_74 = arith.constant 0 : index
    %198 = vector.load %arg9[%c0_72, %c0_73, %c0_74] : memref<1x1x128xf32, #tpu.memory_space<vmem>>, vector<1x1x128xf32>
    %199 = vector.shape_cast %198 : vector<1x1x128xf32> to vector<1x128xf32>
    %c0_75 = arith.constant 0 : index
    %c0_76 = arith.constant 0 : index
    %c0_77 = arith.constant 0 : index
    %200 = vector.load %arg10[%c0_75, %c0_76, %c0_77] : memref<1x1x128xf32, #tpu.memory_space<vmem>>, vector<1x1x128xf32>
    %201 = vector.shape_cast %200 : vector<1x1x128xf32> to vector<1x128xf32>
    %cst_78 = arith.constant dense<0.000000e+00> : vector<32xf32>
    %202 = vector.multi_reduction <add>, %197, %cst_78 [1] : vector<32x128xf32> to vector<32xf32>
    %203 = vector.shape_cast %202 : vector<32xf32> to vector<32x1xf32>
    %cst_79 = arith.constant 1.280000e+02 : f32
    %204 = vector.broadcast %cst_79 : f32 to vector<32x1xf32>
    %205 = arith.divf %203, %204 : vector<32x1xf32>
    %206 = vector.broadcast %205 : vector<32x1xf32> to vector<32x128xf32>
    %207 = arith.subf %197, %206 : vector<32x128xf32>
    %208 = arith.mulf %207, %207 : vector<32x128xf32>
    %cst_80 = arith.constant dense<0.000000e+00> : vector<32xf32>
    %209 = vector.multi_reduction <add>, %208, %cst_80 [1] : vector<32x128xf32> to vector<32xf32>
    %210 = vector.shape_cast %209 : vector<32xf32> to vector<32x1xf32>
    %cst_81 = arith.constant 1.280000e+02 : f32
    %211 = vector.broadcast %cst_81 : f32 to vector<32x1xf32>
    %212 = arith.divf %210, %211 : vector<32x1xf32>
    %cst_82 = arith.constant 9.99999996E-13 : f32
    %213 = vector.broadcast %cst_82 : f32 to vector<32x1xf32>
    %214 = arith.addf %212, %213 : vector<32x1xf32>
    %215 = math.rsqrt %214 : vector<32x1xf32>
    %216 = vector.broadcast %215 : vector<32x1xf32> to vector<32x128xf32>
    %217 = arith.mulf %207, %216 : vector<32x128xf32>
    %218 = vector.broadcast %199 : vector<1x128xf32> to vector<32x128xf32>
    %219 = arith.mulf %217, %218 : vector<32x128xf32>
    %220 = vector.broadcast %201 : vector<1x128xf32> to vector<32x128xf32>
    %221 = arith.addf %219, %220 : vector<32x128xf32>
    %222 = arith.truncf %221 : vector<32x128xf32> to vector<32x128xbf16>
    %c0_83 = arith.constant 0 : index
    %c0_84 = arith.constant 0 : index
    %c0_85 = arith.constant 0 : index
    %223 = vector.load %arg11[%c0_83, %c0_84, %c0_85] : memref<1x128x256xbf16, #tpu.memory_space<vmem>>, vector<1x128x256xbf16>
    %224 = vector.shape_cast %223 : vector<1x128x256xbf16> to vector<128x256xbf16>
    %cst_86 = arith.constant dense<0.000000e+00> : vector<32x256xf32>
    %225 = tpu.matmul %222, %224, %cst_86 {dimension_numbers = #tpu.dot_dimension_numbers<[1], [0], [0], [1], [0, 0, 1, 1], [], []>} : vector<32x128xbf16>, vector<128x256xbf16>, vector<32x256xf32> -> vector<32x256xf32>
    %c0_87 = arith.constant 0 : index
    %c0_88 = arith.constant 0 : index
    %c0_89 = arith.constant 0 : index
    %226 = vector.load %arg12[%c0_87, %c0_88, %c0_89] : memref<1x1x256xf32, #tpu.memory_space<vmem>>, vector<1x1x256xf32>
    %227 = vector.shape_cast %226 : vector<1x1x256xf32> to vector<1x256xf32>
    %228 = vector.broadcast %227 : vector<1x256xf32> to vector<32x256xf32>
    %229 = arith.addf %225, %228 : vector<32x256xf32>
    %cst_90 = arith.constant 5.000000e-01 : f32
    %230 = vector.broadcast %cst_90 : f32 to vector<32x256xf32>
    %231 = arith.mulf %230, %229 : vector<32x256xf32>
    %cst_91 = arith.constant 4.471500e-02 : f32
    %232 = vector.broadcast %cst_91 : f32 to vector<32x256xf32>
    %233 = arith.mulf %232, %229 : vector<32x256xf32>
    %234 = arith.mulf %233, %229 : vector<32x256xf32>
    %235 = arith.mulf %234, %229 : vector<32x256xf32>
    %236 = arith.addf %229, %235 : vector<32x256xf32>
    %cst_92 = arith.constant 0.797884583 : f32
    %237 = vector.broadcast %cst_92 : f32 to vector<32x256xf32>
    %238 = arith.mulf %237, %236 : vector<32x256xf32>
    %239 = math.tanh %238 : vector<32x256xf32>
    %cst_93 = arith.constant 1.000000e+00 : f32
    %240 = vector.broadcast %cst_93 : f32 to vector<32x256xf32>
    %241 = arith.addf %240, %239 : vector<32x256xf32>
    %242 = arith.mulf %231, %241 : vector<32x256xf32>
    %243 = arith.truncf %242 : vector<32x256xf32> to vector<32x256xbf16>
    %c0_94 = arith.constant 0 : index
    %c0_95 = arith.constant 0 : index
    %c0_96 = arith.constant 0 : index
    %244 = vector.load %arg13[%c0_94, %c0_95, %c0_96] : memref<1x256x128xbf16, #tpu.memory_space<vmem>>, vector<1x256x128xbf16>
    %245 = vector.shape_cast %244 : vector<1x256x128xbf16> to vector<256x128xbf16>
    %cst_97 = arith.constant dense<0.000000e+00> : vector<32x128xf32>
    %246 = tpu.matmul %243, %245, %cst_97 {dimension_numbers = #tpu.dot_dimension_numbers<[1], [0], [0], [1], [0, 0, 1, 1], [], []>} : vector<32x256xbf16>, vector<256x128xbf16>, vector<32x128xf32> -> vector<32x128xf32>
    %c0_98 = arith.constant 0 : index
    %c0_99 = arith.constant 0 : index
    %c0_100 = arith.constant 0 : index
    %247 = vector.load %arg14[%c0_98, %c0_99, %c0_100] : memref<1x1x128xf32, #tpu.memory_space<vmem>>, vector<1x1x128xf32>
    %248 = vector.shape_cast %247 : vector<1x1x128xf32> to vector<1x128xf32>
    %249 = vector.broadcast %248 : vector<1x128xf32> to vector<32x128xf32>
    %250 = arith.addf %246, %249 : vector<32x128xf32>
    %251 = arith.addf %250, %221 : vector<32x128xf32>
    %c0_101 = arith.constant 0 : index
    %c0_102 = arith.constant 0 : index
    %c0_103 = arith.constant 0 : index
    %252 = vector.load %arg15[%c0_101, %c0_102, %c0_103] : memref<1x1x128xf32, #tpu.memory_space<vmem>>, vector<1x1x128xf32>
    %253 = vector.shape_cast %252 : vector<1x1x128xf32> to vector<1x128xf32>
    %c0_104 = arith.constant 0 : index
    %c0_105 = arith.constant 0 : index
    %c0_106 = arith.constant 0 : index
    %254 = vector.load %arg16[%c0_104, %c0_105, %c0_106] : memref<1x1x128xf32, #tpu.memory_space<vmem>>, vector<1x1x128xf32>
    %255 = vector.shape_cast %254 : vector<1x1x128xf32> to vector<1x128xf32>
    %cst_107 = arith.constant dense<0.000000e+00> : vector<32xf32>
    %256 = vector.multi_reduction <add>, %251, %cst_107 [1] : vector<32x128xf32> to vector<32xf32>
    %257 = vector.shape_cast %256 : vector<32xf32> to vector<32x1xf32>
    %cst_108 = arith.constant 1.280000e+02 : f32
    %258 = vector.broadcast %cst_108 : f32 to vector<32x1xf32>
    %259 = arith.divf %257, %258 : vector<32x1xf32>
    %260 = vector.broadcast %259 : vector<32x1xf32> to vector<32x128xf32>
    %261 = arith.subf %251, %260 : vector<32x128xf32>
    %262 = arith.mulf %261, %261 : vector<32x128xf32>
    %cst_109 = arith.constant dense<0.000000e+00> : vector<32xf32>
    %263 = vector.multi_reduction <add>, %262, %cst_109 [1] : vector<32x128xf32> to vector<32xf32>
    %264 = vector.shape_cast %263 : vector<32xf32> to vector<32x1xf32>
    %cst_110 = arith.constant 1.280000e+02 : f32
    %265 = vector.broadcast %cst_110 : f32 to vector<32x1xf32>
    %266 = arith.divf %264, %265 : vector<32x1xf32>
    %cst_111 = arith.constant 9.99999996E-13 : f32
    %267 = vector.broadcast %cst_111 : f32 to vector<32x1xf32>
    %268 = arith.addf %266, %267 : vector<32x1xf32>
    %269 = math.rsqrt %268 : vector<32x1xf32>
    %270 = vector.broadcast %269 : vector<32x1xf32> to vector<32x128xf32>
    %271 = arith.mulf %261, %270 : vector<32x128xf32>
    %272 = vector.broadcast %253 : vector<1x128xf32> to vector<32x128xf32>
    %273 = arith.mulf %271, %272 : vector<32x128xf32>
    %274 = vector.broadcast %255 : vector<1x128xf32> to vector<32x128xf32>
    %275 = arith.addf %273, %274 : vector<32x128xf32>
    %c0_112 = arith.constant 0 : index
    %c0_113 = arith.constant 0 : index
    %276 = vector.load %arg22[%c0_112, %c0_113] : memref<32x128xf32, #tpu.memory_space<vmem>>, vector<32x128xf32>
    tpu.vector_store %arg22[%c0_112, %c0_113], %275 {strides = array<i32>} : memref<32x128xf32, #tpu.memory_space<vmem>>, vector<32x128xf32>,
    %c1_i32 = arith.constant 1 : i32
    %277 = arith.cmpi eq, %arg0, %c1_i32 : i32
    %278 = arith.extui %277 : i1 to i32
    %c0_i32_114 = arith.constant 0 : i32
    %279 = arith.cmpi ne, %278, %c0_i32_114 : i32
    scf.if %279 {
      %280 = vector.extract_strided_slice %275 {offsets = [0, 0], sizes = [1, 128], strides = [1, 1]} : vector<32x128xf32> to vector<1x128xf32>
      %281 = vector.extract_strided_slice %275 {offsets = [16, 0], sizes = [1, 128], strides = [1, 1]} : vector<32x128xf32> to vector<1x128xf32>
      %282 = tpu.concatenate %280, %281 in 0 : vector<1x128xf32>, vector<1x128xf32> -> vector<2x128xf32>
      %283 = arith.truncf %282 : vector<2x128xf32> to vector<2x128xbf16>
      %c0_115 = arith.constant 0 : index
      %c0_116 = arith.constant 0 : index
      %284 = vector.load %arg17[%c0_115, %c0_116] : memref<128x128xbf16, #tpu.memory_space<vmem>>, vector<128x128xbf16>
      %cst_117 = arith.constant dense<0.000000e+00> : vector<2x128xf32>
      %285 = tpu.matmul %283, %284, %cst_117 {dimension_numbers = #tpu.dot_dimension_numbers<[1], [0], [0], [1], [0, 0, 1, 1], [], []>} : vector<2x128xbf16>, vector<128x128xbf16>, vector<2x128xf32> -> vector<2x128xf32>
      %c0_118 = arith.constant 0 : index
      %c0_119 = arith.constant 0 : index
      %286 = vector.load %arg18[%c0_118, %c0_119] : memref<1x128xf32, #tpu.memory_space<vmem>>, vector<1x128xf32>
      %287 = vector.broadcast %286 : vector<1x128xf32> to vector<2x128xf32>
      %288 = arith.addf %285, %287 : vector<2x128xf32>
      %289 = math.tanh %288 : vector<2x128xf32>
      %290 = arith.truncf %289 : vector<2x128xf32> to vector<2x128xbf16>
      %c0_120 = arith.constant 0 : index
      %c0_121 = arith.constant 0 : index
      %291 = vector.load %arg19[%c0_120, %c0_121] : memref<128x128xbf16, #tpu.memory_space<vmem>>, vector<128x128xbf16>
      %cst_122 = arith.constant dense<0.000000e+00> : vector<2x128xf32>
      %292 = tpu.matmul %290, %291, %cst_122 {dimension_numbers = #tpu.dot_dimension_numbers<[1], [0], [0], [1], [0, 0, 1, 1], [], []>} : vector<2x128xbf16>, vector<128x128xbf16>, vector<2x128xf32> -> vector<2x128xf32>
      %c0_123 = arith.constant 0 : index
      %c0_124 = arith.constant 0 : index
      %293 = vector.load %arg20[%c0_123, %c0_124] : memref<1x128xf32, #tpu.memory_space<vmem>>, vector<1x128xf32>
      %294 = vector.broadcast %293 : vector<1x128xf32> to vector<2x128xf32>
      %295 = arith.addf %292, %294 : vector<2x128xf32>
      %cst_125 = arith.constant 0.000000e+00 : f32
      %296 = vector.broadcast %cst_125 : f32 to vector<2x128xf32>
      %297 = arith.maximumf %295, %296 : vector<2x128xf32>
      %c0_126 = arith.constant 0 : index
      %c0_127 = arith.constant 0 : index
      %298 = vector.load %arg21[%c0_126, %c0_127] : memref<2x128xf32, #tpu.memory_space<vmem>>, vector<2x128xf32>
      tpu.vector_store %arg21[%c0_126, %c0_127], %297 {strides = array<i32>} : memref<2x128xf32, #tpu.memory_space<vmem>>, vector<2x128xf32>,
    } else {
    }
    return
  }
  func.func @transform_0(%arg0: i32) -> (i32, i32) {
    %c0_i32 = arith.constant 0 : i32
    %c0_i32_0 = arith.constant 0 : i32
    %c0_i32_1 = arith.constant 0 : i32
    return %c0_i32, %c0_i32_0 : i32, i32
  }
  func.func @transform_1(%arg0: i32) -> (i32, i32) {
    %c0_i32 = arith.constant 0 : i32
    %c0_i32_0 = arith.constant 0 : i32
    %c0_i32_1 = arith.constant 0 : i32
    return %c0_i32, %c0_i32_0 : i32, i32
  }
  func.func @transform_2(%arg0: i32) -> (i32, i32) {
    %c0_i32 = arith.constant 0 : i32
    %c0_i32_0 = arith.constant 0 : i32
    %c0_i32_1 = arith.constant 0 : i32
    return %c0_i32, %c0_i32_0 : i32, i32
  }
  func.func @transform_3(%arg0: i32) -> (i32, i32) {
    %c0_i32 = arith.constant 0 : i32
    %c0_i32_0 = arith.constant 0 : i32
    %c0_i32_1 = arith.constant 0 : i32
    return %c0_i32, %c0_i32_0 : i32, i32
  }
  func.func @transform_4(%arg0: i32) -> (i32, i32, i32) {
    %c0_i32 = arith.constant 0 : i32
    %c0_i32_0 = arith.constant 0 : i32
    %c0_i32_1 = arith.constant 0 : i32
    return %arg0, %c0_i32, %c0_i32_0 : i32, i32, i32
  }
  func.func @transform_5(%arg0: i32) -> (i32, i32, i32) {
    %c0_i32 = arith.constant 0 : i32
    %c0_i32_0 = arith.constant 0 : i32
    %c0_i32_1 = arith.constant 0 : i32
    return %arg0, %c0_i32, %c0_i32_0 : i32, i32, i32
  }
  func.func @transform_6(%arg0: i32) -> (i32, i32, i32) {
    %c0_i32 = arith.constant 0 : i32
    %c0_i32_0 = arith.constant 0 : i32
    %c0_i32_1 = arith.constant 0 : i32
    return %arg0, %c0_i32, %c0_i32_0 : i32, i32, i32
  }
  func.func @transform_7(%arg0: i32) -> (i32, i32, i32) {
    %c0_i32 = arith.constant 0 : i32
    %c0_i32_0 = arith.constant 0 : i32
    %c0_i32_1 = arith.constant 0 : i32
    return %arg0, %c0_i32, %c0_i32_0 : i32, i32, i32
  }
  func.func @transform_8(%arg0: i32) -> (i32, i32, i32) {
    %c0_i32 = arith.constant 0 : i32
    %c0_i32_0 = arith.constant 0 : i32
    %c0_i32_1 = arith.constant 0 : i32
    return %arg0, %c0_i32, %c0_i32_0 : i32, i32, i32
  }
  func.func @transform_9(%arg0: i32) -> (i32, i32, i32) {
    %c0_i32 = arith.constant 0 : i32
    %c0_i32_0 = arith.constant 0 : i32
    %c0_i32_1 = arith.constant 0 : i32
    return %arg0, %c0_i32, %c0_i32_0 : i32, i32, i32
  }
  func.func @transform_10(%arg0: i32) -> (i32, i32, i32) {
    %c0_i32 = arith.constant 0 : i32
    %c0_i32_0 = arith.constant 0 : i32
    %c0_i32_1 = arith.constant 0 : i32
    return %arg0, %c0_i32, %c0_i32_0 : i32, i32, i32
  }
  func.func @transform_11(%arg0: i32) -> (i32, i32, i32) {
    %c0_i32 = arith.constant 0 : i32
    %c0_i32_0 = arith.constant 0 : i32
    %c0_i32_1 = arith.constant 0 : i32
    return %arg0, %c0_i32, %c0_i32_0 : i32, i32, i32
  }
  func.func @transform_12(%arg0: i32) -> (i32, i32, i32) {
    %c0_i32 = arith.constant 0 : i32
    %c0_i32_0 = arith.constant 0 : i32
    %c0_i32_1 = arith.constant 0 : i32
    return %arg0, %c0_i32, %c0_i32_0 : i32, i32, i32
  }
  func.func @transform_13(%arg0: i32) -> (i32, i32, i32) {
    %c0_i32 = arith.constant 0 : i32
    %c0_i32_0 = arith.constant 0 : i32
    %c0_i32_1 = arith.constant 0 : i32
    return %arg0, %c0_i32, %c0_i32_0 : i32, i32, i32
  }
  func.func @transform_14(%arg0: i32) -> (i32, i32, i32) {
    %c0_i32 = arith.constant 0 : i32
    %c0_i32_0 = arith.constant 0 : i32
    %c0_i32_1 = arith.constant 0 : i32
    return %arg0, %c0_i32, %c0_i32_0 : i32, i32, i32
  }
  func.func @transform_15(%arg0: i32) -> (i32, i32, i32) {
    %c0_i32 = arith.constant 0 : i32
    %c0_i32_0 = arith.constant 0 : i32
    %c0_i32_1 = arith.constant 0 : i32
    return %arg0, %c0_i32, %c0_i32_0 : i32, i32, i32
  }
  func.func @transform_16(%arg0: i32) -> (i32, i32) {
    %c0_i32 = arith.constant 0 : i32
    %c0_i32_0 = arith.constant 0 : i32
    %c0_i32_1 = arith.constant 0 : i32
    return %c0_i32, %c0_i32_0 : i32, i32
  }
  func.func @transform_17(%arg0: i32) -> (i32, i32) {
    %c0_i32 = arith.constant 0 : i32
    %c0_i32_0 = arith.constant 0 : i32
    %c0_i32_1 = arith.constant 0 : i32
    return %c0_i32, %c0_i32_0 : i32, i32
  }
  func.func @transform_18(%arg0: i32) -> (i32, i32) {
    %c0_i32 = arith.constant 0 : i32
    %c0_i32_0 = arith.constant 0 : i32
    %c0_i32_1 = arith.constant 0 : i32
    return %c0_i32, %c0_i32_0 : i32, i32
  }
  func.func @transform_19(%arg0: i32) -> (i32, i32) {
    %c0_i32 = arith.constant 0 : i32
    %c0_i32_0 = arith.constant 0 : i32
    %c0_i32_1 = arith.constant 0 : i32
    return %c0_i32, %c0_i32_0 : i32, i32
  }
  func.func @transform_20(%arg0: i32) -> (i32, i32) {
    %c0_i32 = arith.constant 0 : i32
    %c0_i32_0 = arith.constant 0 : i32
    %c0_i32_1 = arith.constant 0 : i32
    return %c0_i32, %c0_i32_0 : i32, i32
  }
}

</mosaic_0001>

<bundles_post_ra>
// kernel: bert_classifier_forward.1
= control target key start
LH: loop header
LB: loop body
LE: loop exit
PB: predicated region body
PF: predicated region fallthrough
CT: control target
= control target key end

     0   :  { %s5366_s0 = inlined_call_operand.vmem [shape: f32[32,128], index: 0, kind: input, shape index: {}]   ;;  %s5367_s1 = inlined_call_operand.vmem [shape: f32[2,16], index: 1, kind: input, shape index: {}]   ;;  %s5368_s2 = inlined_call_operand.vmem [shape: f32[1,128], index: 2, kind: input, shape index: {}]   ;;  %s5369_s3 = inlined_call_operand.vmem [shape: f32[1,128], index: 3, kind: input, shape index: {}]   ;;  %s5370_s4 = inlined_call_operand.vmem [shape: bf16[2,128,384], index: 4, kind: input, shape index: {}]   ;;  %s5371_s5 = inlined_call_operand.vmem [shape: f32[2,1,384], index: 5, kind: input, shape index: {}]   ;;  %s5372_s6 = inlined_call_operand.hbm [shape: bf16[2,128,128], index: 6, kind: input, shape index: {}]   ;;  %s5373_s7 = inlined_call_operand.vmem [shape: f32[2,1,128], index: 7, kind: input, shape index: {}]   ;;  %s5374_s8 = inlined_call_operand.vmem [shape: f32[2,1,128], index: 8, kind: input, shape index: {}]   ;;  %s5375_s9 = inlined_call_operand.vmem [shape: f32[2,1,128], index: 9, kind: input, shape index: {}]   ;;  %s5376_s10 = inlined_call_operand.hbm [shape: bf16[2,128,256], index: 10, kind: input, shape index: {}]   ;;  %s5377_s11 = inlined_call_operand.vmem [shape: f32[2,1,256], index: 11, kind: input, shape index: {}]   ;;  %s5378_s12 = inlined_call_operand.hbm [shape: bf16[2,256,128], index: 12, kind: input, shape index: {}]   ;;  %s5379_s13 = inlined_call_operand.vmem [shape: f32[2,1,128], index: 13, kind: input, shape index: {}]   ;;  %s5380_s14 = inlined_call_operand.vmem [shape: f32[2,1,128], index: 14, kind: input, shape index: {}]   ;;  %s5381_s15 = inlined_call_operand.vmem [shape: f32[2,1,128], index: 15, kind: input, shape index: {}]   ;;  %s5382_s16 = inlined_call_operand.vmem [shape: bf16[128,128], index: 16, kind: input, shape index: {}]   ;;  %s5383_s17 = inlined_call_operand.hbm [shape: f32[1,128], index: 17, kind: input, shape index: {}]   ;;  %s5384_s18 = inlined_call_operand.hbm [shape: bf16[128,128], index: 18, kind: input, shape index: {}]   ;;  %s5385_s19 = inlined_call_operand.vmem [shape: f32[1,128], index: 19, kind: input, shape index: {}]   ;;  %s5386_s20 = inlined_call_operand.hbm [shape: f32[2,128], index: 20, kind: output, shape index: {}]  }
   0x1   :  { %5405 = sst [smem:[#allocation21_spill]] %s5366_s0 }
   0x2   :  { %5406 = sst [smem:[#allocation22_spill]] %s5367_s1 }
   0x3   :  { %5407 = sst [smem:[#allocation23_spill]] %s5368_s2 }
   0x4   :  { %5408 = sst [smem:[#allocation24_spill]] %s5369_s3 }
   0x5   :  { %5409 = sst [smem:[#allocation25_spill]] %s5370_s4 }
   0x6   :  { %5410 = sst [smem:[#allocation26_spill]] %s5371_s5 }
   0x7   :  { %5411 = sst [smem:[#allocation27_spill]] %s5373_s7 }
   0x8   :  { %5412 = sst [smem:[#allocation28_spill]] %s5374_s8 }
   0x9   :  { %5413 = sst [smem:[#allocation29_spill]] %s5375_s9 }
   0xa   :  { %5414 = sst [smem:[#allocation30_spill]] %s5376_s10 }
   0xb   :  { %5415 = sst [smem:[#allocation31_spill]] %s5377_s11 }
   0xc   :  { %5416 = sst [smem:[#allocation32_spill]] %s5379_s13 }
   0xd   :  { %5417 = sst [smem:[#allocation33_spill]] %s5380_s14 }
   0xe   :  { %5418 = sst [smem:[#allocation34_spill]] %s5381_s15 }
   0xf   :  { %5419 = sst [smem:[#allocation35_spill]] %s5382_s16 }
  0x10   :  { %5420 = sst [smem:[#allocation36_spill]] %s5383_s17 }
  0x11   :  { %5421 = sst [smem:[#allocation37_spill]] %s5385_s19 }
  0x12   :  { %5422 = sst [smem:[#allocation38_spill]] %s5386_s20 }
  0x13   :  { %25 = vsyncpa [#allocation5], 0 }
  0x14   :  { %27 = vsyncpa [#allocation5 + $0x1], 0 }
  0x15   :  { %28 = vsyncpa [#allocation8], 0 }
  0x16   :  { %30 = vsyncpa [#allocation8 + $0x1], 0 }
  0x17   :  { %31 = vsyncpa [#allocation11], 0 }
  0x18   :  { %32 = vsyncpa [#allocation6], 0  ;;  %s4512_s1 = smov 0   ;;  %s4514_s22 = smov 0  }
  0x19   :  { %s4516_s23 = smov 0   ;;  %s4518_s24 = smov 0  }
  0x1a LB: > { %5423 = sst [smem:[#allocation18_spill]] %s4383_s23  ;;  %s4531_s2 = sadd.s32 4294967295, %s4387_s24   ;;  %s4387_s24 = sphi %s4518_s24, %s5473_s24   ;;  %s4383_s23 = sphi %s4516_s23, %s5475_s23   ;;  %s4379_s22 = sphi %s4514_s22, %s5477_s22   ;;  %s4375_s1 = sphi %s4512_s1, %s5476_s1  }
  0x1b   : > { %s4534_s25 = sadd.s32 1, %s4387_s24   ;;  %s181_s26 = sadd.s32 1, %s4383_s23 }
  0x1c   : > { %5424 = sst [smem:[#allocation19_spill]] %s4534_s25  ;;  %s178_s3 = ssub.s32 %s4387_s24, %s4534_s25 }
  0x1d   : > { %p179_p0 = scmp.eq.s32.totalorder %s178_s3, 0  ;;  %p188_p1 = scmp.ne.s32.totalorder %s4383_s23, %s4379_s22 }
  0x1e   : > { %p189_p2 = scmp.eq.s32.totalorder %s4387_s24, 0  ;;  %p194_p3 = scmp.ne.s32.totalorder %s4379_s22, %s4375_s1 }
  0x1f   : > { %s4544_s27 = scalar_select %p179_p0, %s4383_s23, %s181_s26  }
  0x20   : > { %p4546_p4 = por %p189_p2, %p188_p1  ;;  %p5394_p5 = scmp.eq.s32.totalorder %s4531_s2, 0 }
  0x21   : > { %5425 = sst [smem:[#allocation20_spill]] %s4544_s27  ;;  %p3460_p6 = scmp.ge.s32.totalorder %s4387_s24, 1 }
  0x22   : > { %p544_p7 = scmp.lt.s32.totalorder %s4387_s24, 3  ;;  %p4555_p8 = por %p5394_p5, %p194_p3 }
  0x23   : > { %s4389_s30 = smov [#allocation10]   ;;  %p3911_p12 = scmp.lt.s32.totalorder %s4387_s24, 2 }
  0x24   : > { %s5427_s4 = scalar_select %p4555_p8, 1, 0 }
  0x25   : > { %p4560_p10 = pnand %p3460_p6, %p544_p7  ;;  %s572_s0 = sshll.u32 %s4389_s30, 4  ;;  %s573_s0 = int_to_ptr.vmem [resolvable:$true] %s572_s0 }
  0x26   : > { %s4568_s21 = sand.u32 1, %s4383_s23   ;;  %s653_s3 = sand.u32 1, %s4387_s24  }
  0x27   : > { %s5428_s29 = scalar_select %p4560_p10, 1, 0 }
  0x28   : > { %p3892_p11 = pneg %p4560_p10  ;;  %p4579_p0 = pnand %p3911_p12, %p4546_p4 }
  0x29   : > { %s5431_s17 = sld [smem:[#allocation36_spill]] }
  0x2a   : > { %p4572_p13 = pnand %p3892_p11, %p5394_p5 }
  0x2b   : > { %s5430_s26 = scalar_select %p4579_p0, 1, 0 }
  0x2c   : > { %s5429_s1 = scalar_select %p4572_p13, 1, 0 }
  0x2d   : > { %p5399_p2 = pneg %p4572_p13 }
  0x2f   : > { %s4169_s23 = scalar_lea.hbm %s5431_s17, 16 }
  0x30   : > { %p4170_p1 = scmp.ne.s32.totalorder %s5431_s17, %s4169_s23  ;;  %p4176_p4 = scmp.lt.u32.totalorder %s4169_s23, %s5431_s17 }
  0x32   : > { %p4172_p3 = pnand %p5399_p2, %p4170_p1 }
  0x34   : > { %p4173_p6 = pneg %p4172_p3 }
  0x36   : > { %p4178_p7 = pnand %p4176_p4, %p4173_p6 }
  0x38   : > { %4181 = shalt.err (!%p4178_p7)
}
  0x39   : > { %s4182_s30 = scalar_lea.vmem %s573_s0, 16  ;;  %s4189_s19 = scalar_lea.vmem %s573_s0, 32 }
  0x3a   : > { %p4183_p11 = scmp.ne.s32.totalorder %s573_s0, %s4182_s30  ;;  %p4190_p5 = scmp.lt.s32.totalorder %s573_s0, %s573_s0 }
  0x3b   : > { %p4191_p8 = scmp.lt.s32.totalorder %s4189_s19, %s4182_s30 }
  0x3c   : > { %p4185_p12 = pnand %p4183_p11, %p5399_p2 }
  0x3d   : > { %p4192_p10 = por %p4191_p8, %p4190_p5 }
  0x3e   : > { %p4186_p9 = pneg %p4185_p12 }
  0x40   : > { %p4193_p0 = pnand %p4192_p10, %p4186_p9 }
  0x42   : > { %4196 = shalt.err (!%p4193_p0)
}
  0x43   : > { %3895 = dma.hbm_to_vmem [thread:$0]  (!%p4572_p13), %s5431_s17, 16, %s573_s0, [#allocation11]  }
  0x44   : > { %s5398_s23 = sshll.u32 %s4387_s24, 11  ;;  %s5432_s25 = sshll.u32 %s4568_s21, 7 }
  0x45   : > { %s657_s27 = scalar_lea.vmem [#allocation7], %s5432_s25  ;;  %s5433_s10 = sld [smem:[#allocation30_spill]] }
  0x46   : > { %s664_s28 = sshll.u32 %s657_s27, 4  ;;  %s4618_s20 = scalar_lea.sflag [#allocation8], %s653_s3  ;;  %s4616_s28 = int_to_ptr.vmem [resolvable:$true] %s664_s28 }
  0x47   : > { %p5434_p8 = scmp.ne.s32.totalorder %s5430_s26, 0 }
  0x49   : > { %p4624_p9 = pneg %p5434_p8 }
  0x4b   : > { %s4614_s19 = scalar_lea.hbm %s5433_s10, %s5398_s23  ;;  %s4202_s27 = scalar_lea.hbm %s5433_s10, 4096 }
  0x4c   : > { %s4197_s16 = scalar_lea.hbm %s4614_s19, 2048  ;;  %p4203_p1 = scmp.lt.u32.totalorder %s4614_s19, %s5433_s10 }
  0x4d   : > { %p4198_p5 = scmp.ne.s32.totalorder %s4614_s19, %s4197_s16  ;;  %p4204_p3 = scmp.lt.u32.totalorder %s4202_s27, %s4197_s16 }
  0x4e   : > { %s5435_s0 = scalar_select %p4624_p9, 1, 0 }
  0x4f   : > { %p4200_p10 = pnand %p4624_p9, %p4198_p5  ;;  %p4205_p6 = por %p4204_p3, %p4203_p1 }
  0x50   : > { %p4206_p4 = scmp.lt.u32.totalorder %s4197_s16, %s4614_s19 }
  0x51   : > { %p4201_p0 = pneg %p4200_p10 }
  0x52   : > { %p4207_p7 = por %p4206_p4, %p4205_p6 }
  0x54   : > { %p4208_p11 = pnand %p4207_p7, %p4201_p0 }
  0x56   : > { %4211 = shalt.err (!%p4208_p11)
}
  0x57   : > { %s4212_s3 = scalar_lea.vmem %s4616_s28, 2048  ;;  %s4390_s15 = smov [#allocation7]  }
  0x58   : > { %p4213_p12 = scmp.ne.s32.totalorder %s4616_s28, %s4212_s3  ;;  %s4217_s25 = sshll.u32 %s4390_s15, 4  ;;  %s4218_s25 = int_to_ptr.vmem [resolvable:$false] %s4217_s25 }
  0x59   : > { %s4219_s23 = scalar_lea.vmem %s4218_s25, 4096  ;;  %p4220_p2 = scmp.lt.s32.totalorder %s4616_s28, %s4218_s25 }
  0x5a   : > { %p4215_p5 = pnand %p4213_p12, %p4624_p9  ;;  %p4221_p13 = scmp.lt.s32.totalorder %s4219_s23, %s4212_s3 }
  0x5c   : > { %p4216_p10 = pneg %p4215_p5  ;;  %p4222_p1 = por %p4221_p13, %p4220_p2 }
  0x5e   : > { %p4223_p3 = pnand %p4222_p1, %p4216_p10 }
  0x60   : > { %4226 = shalt.err (!%p4223_p3)
}
  0x61   : > { %s4391_s16 = smov 128   ;;  %s4392_s27 = smov 8  }
  0x62   : > { %3905 = dma.hbm_to_vmem [thread:$0]  (!%p5434_p8), %s4614_s19, 2048, %s4616_s28, %s4618_s20, %s4391_s16, %s4391_s16, %s4392_s27  }
  0x63   : > { %s5436_s30 = sshll.u32 %s4387_s24, 11  ;;  %s5437_s3 = sshll.u32 %s4568_s21, 7 }
  0x64   : > { %s4653_s25 = scalar_lea.hbm %s5378_s12, %s5436_s30  ;;  %s685_s23 = scalar_lea.vmem [#allocation9], %s5437_s3 }
  0x65   : > { %s692_s17 = sshll.u32 %s685_s23, 4  ;;  %s4393_s14 = smov [#allocation12]   ;;  %s4687_s17 = int_to_ptr.vmem [resolvable:$true] %s692_s17 }
  0x66   : > { %s582_s13 = sshll.u32 %s4393_s14, 4  ;;  %s4227_s9 = scalar_lea.hbm %s5384_s18, 1024  ;;  %s583_s13 = int_to_ptr.vmem [resolvable:$true] %s582_s13 }
  0x67   : > { %p4228_p13 = scmp.ne.s32.totalorder %s5384_s18, %s4227_s9  ;;  %p5438_p2 = scmp.ne.s32.totalorder %s5429_s1, 0 }
  0x68   : > { %p4234_p7 = scmp.lt.u32.totalorder %s4227_s9, %s5384_s18 }
  0x69   : > { %p5439_p0 = pneg %p5438_p2 }
  0x6b   : > { %p4230_p6 = pnand %p4228_p13, %p5439_p0 }
  0x6d   : > { %p4231_p4 = pneg %p4230_p6 }
  0x6f   : > { %p4236_p11 = pnand %p4234_p7, %p4231_p4 }
  0x71   : > { %4239 = shalt.err (!%p4236_p11)
}
  0x72   : > { %s4240_s14 = scalar_lea.vmem %s583_s13, 1024  ;;  %p5440_p5 = pmov %p5439_p0 }
  0x73   : > { %p4241_p12 = scmp.ne.s32.totalorder %s583_s13, %s4240_s14  ;;  %p4248_p3 = scmp.lt.s32.totalorder %s583_s13, %s583_s13 }
  0x74   : > { %p4249_p8 = scmp.lt.s32.totalorder %s4240_s14, %s4240_s14 }
  0x75   : > { %p4243_p10 = pnand %p4241_p12, %p5440_p5 }
  0x76   : > { %p4250_p9 = por %p4249_p8, %p4248_p3 }
  0x77   : > { %p4244_p1 = pneg %p4243_p10 }
  0x79   : > { %p4251_p0 = pnand %p4250_p9, %p4244_p1 }
  0x7b   : > { %4254 = shalt.err (!%p4251_p0)
}
  0x7c   : > { %s4394_s5 = smov 64   ;;  %s4395_s7 = smov 4  }
  0x7d   : > { %3898 = dma.hbm_to_vmem [thread:$0]  (!%p5438_p2), %s5384_s18, 1024, %s583_s13, [#allocation11], %s4394_s5, %s4394_s5, %s4395_s7  }
  0x7e   : > { %s3464_s11 = sshll.u32 %s4568_s21, 6  ;;  %s3595_s19 = sshll.u32 %s4387_s24, 10 }
  0x7f   : > { %s4685_s30 = scalar_lea.hbm %s5372_s6, %s3595_s19  ;;  %s618_s1 = scalar_lea.vmem [#allocation4], %s3464_s11 }
  0x80   : > { %s625_s15 = sshll.u32 %s618_s1, 4  ;;  %s615_s3 = scalar_lea.sflag [#allocation5], %s4568_s21  ;;  %s4689_s15 = int_to_ptr.vmem [resolvable:$true] %s625_s15 }
  0x81   : > { %s4255_s23 = scalar_lea.hbm %s4685_s30, 1024  ;;  %p5441_p9 = scmp.ne.s32.totalorder %s5435_s0, 0 }
  0x82   : > { %p4256_p8 = scmp.ne.s32.totalorder %s4685_s30, %s4255_s23  ;;  %s4260_s10 = scalar_lea.hbm %s5372_s6, 2048 }
  0x83   : > { %p4261_p6 = scmp.lt.u32.totalorder %s4685_s30, %s5372_s6  ;;  %p4262_p4 = scmp.lt.u32.totalorder %s4260_s10, %s4255_s23 }
  0x84   : > { %p4258_p13 = pnand %p4256_p8, %p5441_p9  ;;  %p4264_p11 = scmp.lt.u32.totalorder %s4255_s23, %s4685_s30 }
  0x85   : > { %p4263_p7 = por %p4262_p4, %p4261_p6 }
  0x86   : > { %p4259_p2 = pneg %p4258_p13 }
  0x87   : > { %p4265_p12 = por %p4264_p11, %p4263_p7 }
  0x89   : > { %p4266_p5 = pnand %p4265_p12, %p4259_p2 }
  0x8b   : > { %4269 = shalt.err (!%p4266_p5)
}
  0x8c   : > { %s4270_s8 = scalar_lea.vmem %s4689_s15, 1024  ;;  %s4396_s9 = smov [#allocation4]  }
  0x8d   : > { %p4271_p10 = scmp.ne.s32.totalorder %s4689_s15, %s4270_s8  ;;  %s4275_s11 = sshll.u32 %s4396_s9, 4  ;;  %s4276_s11 = int_to_ptr.vmem [resolvable:$false] %s4275_s11 }
  0x8e   : > { %s4277_s19 = scalar_lea.vmem %s4276_s11, 2048  ;;  %p4278_p0 = scmp.lt.s32.totalorder %s4689_s15, %s4276_s11 }
  0x8f   : > { %p4273_p1 = pnand %p4271_p10, %p5441_p9  ;;  %p4279_p8 = scmp.lt.s32.totalorder %s4277_s19, %s4270_s8 }
  0x91   : > { %p4274_p3 = pneg %p4273_p1  ;;  %p4280_p13 = por %p4279_p8, %p4278_p0 }
  0x93   : > { %p4281_p6 = pnand %p4280_p13, %p4274_p3 }
  0x95   : > { %4284 = shalt.err (!%p4281_p6)
}
  0x96   : > { %p5442_p2 = scmp.ne.s32.totalorder %s5430_s26, 0  ;;  %s4285_s16 = scalar_lea.hbm %s4653_s25, 2048 }
  0x97   : > { %p4286_p4 = scmp.ne.s32.totalorder %s4653_s25, %s4285_s16  ;;  %s4290_s23 = scalar_lea.hbm %s5378_s12, 4096 }
  0x98   : > { %3902 = dma.hbm_to_vmem [thread:$0]  (!%p5442_p2), %s4685_s30, 1024, %s4689_s15, %s615_s3, %s4394_s5, %s4394_s5, %s4395_s7  }
  0x99   : > { %p4288_p7 = pnand %p4286_p4, %p5441_p9  ;;  %p4291_p12 = scmp.lt.u32.totalorder %s4653_s25, %s5378_s12 }
  0x9a   : > { %p4292_p5 = scmp.lt.u32.totalorder %s4290_s23, %s4285_s16  ;;  %p4294_p1 = scmp.lt.u32.totalorder %s4285_s16, %s4653_s25 }
  0x9b   : > { %p4289_p11 = pneg %p4288_p7 }
  0x9c   : > { %p4293_p10 = por %p4292_p5, %p4291_p12 }
  0x9e   : > { %p4295_p3 = por %p4294_p1, %p4293_p10 }
  0xa0   : > { %p4296_p0 = pnand %p4295_p3, %p4289_p11 }
  0xa2   : > { %4299 = shalt.err (!%p4296_p0)
}
  0xa3   : > { %s4300_s21 = scalar_lea.vmem %s4687_s17, 2048  ;;  %s4397_s30 = smov [#allocation9]  }
  0xa4   : > { %p4301_p8 = scmp.ne.s32.totalorder %s4687_s17, %s4300_s21  ;;  %s4305_s15 = sshll.u32 %s4397_s30, 4  ;;  %s4306_s15 = int_to_ptr.vmem [resolvable:$false] %s4305_s15 }
  0xa5   : > { %s4307_s3 = scalar_lea.vmem %s4306_s15, 4096  ;;  %p4308_p4 = scmp.lt.s32.totalorder %s4687_s17, %s4306_s15 }
  0xa6   : > { %p4303_p13 = pnand %p4301_p8, %p5441_p9  ;;  %p4309_p7 = scmp.lt.s32.totalorder %s4307_s3, %s4300_s21 }
  0xa8   : > { %p4304_p6 = pneg %p4303_p13  ;;  %p4310_p12 = por %p4309_p7, %p4308_p4 }
  0xaa   : > { %p4311_p5 = pnand %p4310_p12, %p4304_p6 }
  0xac   : > { %4314 = shalt.err (!%p4311_p5)
}
  0xad   : > { %3908 = dma.hbm_to_vmem [thread:$0]  (!%p5442_p2), %s4653_s25, 2048, %s4687_s17, %s4618_s20, %s4394_s5, %s4394_s5, %s4395_s7  }
  0xae   : > { %p5443_p9 = scmp.ne.s32.totalorder %s5428_s29, 0 }
  0xaf   : > { %s724_s0 = sand.u32 (!%p5443_p9), 1, %s4379_s22   ;;  %p5444_p11 = scmp.ne.s32.totalorder (!%p5443_p9), %s5427_s4, 0 }
  0xb0   : > { %722 = sbr.rel (%p5443_p9) target bundleno = 3696 (0xe70), region = 100  ;;  %s3474_s10 = sshll.u32 (!%p5443_p9), %s724_s0, 6 }
  0xb1   : > { %s725_s28 = scalar_lea.sflag (!%p5443_p9), [#allocation5], %s724_s0  ;;  %s4746_s14 = scalar_lea.vmem (!%p5443_p9), [#allocation4], %s3474_s10 }
  0xb7   : > { %4358 = dma.done.wait (%p5444_p11), %s725_s28, 1024  }
  0xb8   : > { %4360 = vsyncadd (%p5444_p11), %s725_s28, 4294966272  ;;  %s733_s26 = sand.u32 1, %s4531_s2   ;;  %s3475_s8 = sshll.u32 %s724_s0, 7 }
  0xb9   : > { %s734_s17 = scalar_lea.sflag [#allocation8], %s733_s26  ;;  %s4753_s20 = scalar_lea.vmem [#allocation7], %s3475_s8 }
  0xba   : > { %4362 = dma.done.wait (%p5444_p11), %s734_s17, 4096  }
  0xbb   : > { %4364 = vsyncadd (%p5444_p11), %s734_s17, 4294963200  ;;  %s4759_s29 = scalar_lea.vmem [#allocation9], %s3475_s8  ;;  %p5445_p2 = scmp.eq.s32.totalorder %s4531_s2, 0 }
  0xbd   : > { %4366 = dma.done.wait (%p5445_p2), [#allocation11], 1040   ;;  %p5446_p10 = pmov %p5445_p2 }
  0xbe   : > { %p847_p1 = scmp.lt.s32.totalorder %s4531_s2, 1  ;;  %s5449_s21 = sld [smem:[#allocation25_spill]] }
  0xbf   : > { %4368 = vsyncadd (%p5446_p10), [#allocation11], 4294966256  ;;  %s5451_s8 = sld [smem:[#allocation26_spill]]  ;;  %s5452_s11 = sld [smem:[#allocation31_spill]] }
  0xc0   : > { %s4767_s25 = scalar_select %p847_p1, %s4531_s2, 1 }
  0xc1   : > { %s5453_s13 = sld [smem:[#allocation32_spill]]  ;;  %s5454_s23 = sld [smem:[#allocation33_spill]] }
  0xc2   : > { %s3872_s4 = smul.u32 192, %s4767_s25  ;;  %s3480_s5 = sshll.u32 %s4767_s25, 1 }
  0xc3   : > { %s3873_s19 = smul.u32 3, %s4767_s25  ;;  %s5455_s10 = sld [smem:[#allocation34_spill]] }
  0xc4   : > { %s4782_s30 = scalar_lea.vmem %s5449_s21, %s3872_s4  ;;  %p5456_p3 = scmp.ne.s32.totalorder %s4531_s2, 0 }
  0xc5   : > { %s4791_s17 = scalar_lea.vmem %s5451_s8, %s3873_s19  ;;  %s4797_s16 = scalar_lea.vmem %s5452_s11, %s3480_s5 }
  0xc6   : > { %882 = sbr.rel (%p5456_p3) target bundleno = 525 (0x20d), region = 124  ;;  %s5457_s8 = sld [smem:[#allocation21_spill]] (!%p5456_p3) }
  0xc7   : > { %s871_s4 = scalar_lea.vmem %s5453_s13, %s4767_s25  ;;  %s874_s15 = scalar_lea.vmem %s5454_s23, %s4767_s25 }
  0xc8   : > { %s5458_s13 = sld [smem:[#allocation23_spill]] (!%p5456_p3)  ;;  %s5459_s3 = sld [smem:[#allocation24_spill]] (!%p5456_p3) }
  0xc9   : > { %s877_s28 = scalar_lea.vmem %s5455_s10, %s4767_s25 }
  0xcc   : > { %v883_v0 = vld [vmem:[%s5457_s8] sm:$0xff] (!%p5456_p3)  ;;  %v885_v1 = vld [vmem:[%s5457_s8 + $0x10] sm:$0xff] (!%p5456_p3)  ;;  %v884_v2 = vld [vmem:[%s5457_s8 + $0x8] sm:$0xff] (!%p5456_p3) }
  0xcd   : > { %889 = vadd.xlane.f32.xlu0 %v883_v0  ;;  %893 = vadd.xlane.f32.xlu1 %v885_v1  ;;  %v886_v3 = vld [vmem:[%s5457_s8 + $0x18] sm:$0xff] }
  0xce   : > { %v3482_v33 = vld [vmem:[%s5458_s13] ss:$0 sm:$0xff] }
  0xcf   : > { %v3483_v35 = vld [vmem:[%s5459_s3] ss:$0 sm:$0xff] }
  0xd1   : > { %891 = vadd.xlane.f32.xlu0 %v884_v2  ;;  %895 = vadd.xlane.f32.xlu1 %v886_v3 }
 0x15a   : > { %v890_v4 = vpop.xlane.xlu0 %889  ;;  %v894_v5 = vpop.xlane.xlu1 %893 }
 0x15b   : > { %v898_v6 = vmul.f32 0.0078125, %v890_v4  ;;  %v900_v7 = vmul.f32 0.0078125, %v894_v5 }
 0x15d   : > { %v902_v8 = vsub.f32 %v883_v0, %v898_v6  ;;  %v904_v9 = vsub.f32 %v885_v1, %v900_v7 }
 0x15e   : > { %v892_v10 = vpop.xlane.xlu0 %891  ;;  %v896_v11 = vpop.xlane.xlu1 %895 }
 0x15f   : > { %v899_v12 = vmul.f32 0.0078125, %v892_v10  ;;  %v906_v13 = vmul.f32 %v902_v8, %v902_v8  ;;  %v901_v14 = vmul.f32 0.0078125, %v896_v11  ;;  %v908_v17 = vmul.f32 %v904_v9, %v904_v9 }
 0x161   : > { %v903_v15 = vsub.f32 %v884_v2, %v899_v12  ;;  %910 = vadd.xlane.f32.xlu0 %v906_v13  ;;  %v905_v16 = vsub.f32 %v886_v3, %v901_v14 }
 0x163   : > { %v907_v18 = vmul.f32 %v903_v15, %v903_v15  ;;  %v909_v19 = vmul.f32 %v905_v16, %v905_v16 }
 0x165   : > { %914 = vadd.xlane.f32.xlu0 %v908_v17  ;;  %912 = vadd.xlane.f32.xlu1 %v907_v18 }
 0x169   : > { %916 = vadd.xlane.f32.xlu1 %v909_v19 }
 0x1ee   : > { %v911_v20 = vpop.xlane.xlu0 %910 }
 0x1ef   : > { %v918_v21 = vmul.f32 0.0078125, %v911_v20 }
 0x1f1   : > { %v922_v22 = vadd.f32 1e-12, %v918_v21 }
 0x1f2   : > { %v913_v23 = vpop.xlane.xlu1 %912  ;;  %v915_v24 = vpop.xlane.xlu0 %914 }
 0x1f3   : > { %3963 = vrsqrt.f32 %v922_v22  ;;  %v919_v25 = vmul.f32 0.0078125, %v913_v23  ;;  %v920_v26 = vmul.f32 0.0078125, %v915_v24 }
 0x1f5   : > { %v923_v27 = vadd.f32 1e-12, %v919_v25  ;;  %v924_v28 = vadd.f32 1e-12, %v920_v26 }
 0x1f6   : > { %v917_v29 = vpop.xlane.xlu1 %916 }
 0x1f7   : > { %3965 = vrsqrt.f32 %v923_v27  ;;  %v921_v30 = vmul.f32 0.0078125, %v917_v29 }
 0x1f8   : > { %3967 = vrsqrt.f32 %v924_v28 }
 0x1f9   : > { %v925_v31 = vadd.f32 1e-12, %v921_v30 }
 0x1fb   : > { %3969 = vrsqrt.f32 %v925_v31 }
 0x1fd   : > { %v3964_v32 = vpop.eup %3963 }
 0x1fe   : > { %v930_v34 = vmul.f32 %v3964_v32, %v902_v8 }
 0x200   : > { %v940_v36 = vmul.f32 %v3482_v33, %v930_v34 }
 0x201   : > { %v3966_v37 = vpop.eup %3965 }
 0x202   : > { %v3968_v38 = vpop.eup %3967  ;;  %v950_v39 = vadd.f32 %v3483_v35, %v940_v36  ;;  %v931_v40 = vmul.f32 %v3966_v37, %v903_v15 }
 0x203   : > { %v932_v41 = vmul.f32 %v3968_v38, %v904_v9 }
 0x204   : > { %954 = vst [vmem:[#allocation2] sm:$0xff] %v950_v39  ;;  %v941_v42 = vmul.f32 %v3482_v33, %v931_v40 }
 0x205   : > { %v3970_v43 = vpop.eup %3969  ;;  %v942_v44 = vmul.f32 %v3482_v33, %v932_v41 }
 0x206   : > { %v951_v45 = vadd.f32 %v3483_v35, %v941_v42  ;;  %v933_v46 = vmul.f32 %v3970_v43, %v905_v16 }
 0x207   : > { %v952_v47 = vadd.f32 %v3483_v35, %v942_v44 }
 0x208   : > { %955 = vst [vmem:[#allocation2 + $0x8] sm:$0xff] %v951_v45  ;;  %v943_v48 = vmul.f32 %v3482_v33, %v933_v46 }
 0x209   : > { %956 = vst [vmem:[#allocation2 + $0x10] sm:$0xff] %v952_v47 }
 0x20a   : > { %v953_v49 = vadd.f32 %v3483_v35, %v943_v48 }
 0x20c   : > { %957 = vst [vmem:[#allocation2 + $0x18] sm:$0xff] %v953_v49 }
 0x20d PF: > { %v3971_v50 = vld [vmem:[%s4782_s30 + $0x4] ss:$12 sps:$4 sm:$0xff]   ;;  %v3973_v51 = vld [vmem:[%s4782_s30] ss:$12 sps:$4 sm:$0xff]   ;;  %v4398_v52 = vmov 0   ;;  %v4399_v9 = vmov 0.0   ;;  %v998_v18 = vlaneseq }
 0x20e   : > { %1173 = vmatprep.mubr.bf16.mxu0 %v4398_v52  ;;  %1141 = vmatprep.subr.bf16.mxu0 %v3971_v50  ;;  %v3974_v53 = vld [vmem:[%s4782_s30 + $0x1c] ss:$12 sps:$4 sm:$0xff]   ;;  %v3976_v54 = vld [vmem:[%s4782_s30 + $0x18] ss:$12 sps:$4 sm:$0xff]   ;;  %v3977_v55 = vld [vmem:[%s4782_s30 + $0x34] ss:$12 sps:$4 sm:$0xff]  }
 0x20f   : > { %1142 = vmatpush1.bf16.msra.mxu0 %v3973_v51  ;;  %v3979_v56 = vld [vmem:[%s4782_s30 + $0x30] ss:$12 sps:$4 sm:$0xff]   ;;  %v3980_v57 = vld [vmem:[%s4782_s30 + $0x4c] ss:$12 sps:$4 sm:$0xff]   ;;  %v958_v58 = vld [vmem:[#allocation2] sm:$0xff]  ;;  %vm4400_vm0 = vmmov 0  }
 0x210   : > { %1143 = vmatprep.subr.bf16.mxu0 %v3974_v53  ;;  %v3982_v59 = vld [vmem:[%s4782_s30 + $0x48] ss:$12 sps:$4 sm:$0xff]   ;;  %v3983_v61 = vld [vmem:[%s4782_s30 + $0x64] ss:$12 sps:$4 sm:$0xff]   ;;  %v3985_v63 = vld [vmem:[%s4782_s30 + $0x60] ss:$12 sps:$4 sm:$0xff]  }
 0x211   : > { %v959_v60 = vld [vmem:[#allocation2 + $0x8] sm:$0xff]  ;;  %v3988_v1 = vld [vmem:[%s4782_s30 + $0x78] ss:$12 sps:$4 sm:$0xff]   ;;  %v3989_v2 = vld [vmem:[%s4782_s30 + $0x94] ss:$12 sps:$4 sm:$0xff]   ;;  %v4863_v19 = vshrl.u32 %v998_v18, 7 }
 0x212   : > { %v962_v62 = vpack.c.bf16 %v959_v60, %v958_v58  ;;  %v3986_v0 = vld [vmem:[%s4782_s30 + $0x7c] ss:$12 sps:$4 sm:$0xff]   ;;  %v3992_v4 = vld [vmem:[%s4782_s30 + $0xac] ss:$12 sps:$4 sm:$0xff]   ;;  %v960_v6 = vld [vmem:[#allocation2 + $0x10] sm:$0xff]  ;;  %vm1250_vm1 = vcmask 261120  }
 0x213   : > { %1144 = vmatpush1.bf16.msra.mxu0 %v3976_v54  ;;  %v3991_v3 = vld [vmem:[%s4782_s30 + $0x90] ss:$12 sps:$4 sm:$0xff]   ;;  %v3994_v5 = vld [vmem:[%s4782_s30 + $0xa8] ss:$12 sps:$4 sm:$0xff]   ;;  %v3996_v11 = vld [vmem:[%s4782_s30 + $0x20] ss:$12 sps:$4 sm:$0xff]  }
 0x214   : > { %1145 = vmatprep.subr.bf16.mxu0 %v3977_v55  ;;  %3712 = vmatprep.mubr.bf16.mxu1 %v962_v62  ;;  %v961_v7 = vld [vmem:[#allocation2 + $0x18] sm:$0xff]  ;;  %v3995_v10 = vld [vmem:[%s4782_s30 + $0x8] ss:$12 sps:$4 sm:$0xff]   ;;  %v4000_v15 = vld [vmem:[%s4782_s30 + $0x80] ss:$12 sps:$4 sm:$0xff]   ;;  %v1000_v20 = vsub.s32 0, %v4863_v19 }
 0x215   : > { %v963_v8 = vpack.c.bf16 %v961_v7, %v960_v6  ;;  %3696 = vmatprep.subr.bf16.mxu1 %v3995_v10  ;;  %v3997_v12 = vld [vmem:[%s4782_s30 + $0x38] ss:$12 sps:$4 sm:$0xff]   ;;  %v3998_v13 = vld [vmem:[%s4782_s30 + $0x50] ss:$12 sps:$4 sm:$0xff]   ;;  %v3999_v14 = vld [vmem:[%s4782_s30 + $0x68] ss:$12 sps:$4 sm:$0xff]  }
 0x216   : > { %3697 = vmatpush3.bf16.msra.mxu1 %v3995_v10  ;;  %v4001_v16 = vld [vmem:[%s4782_s30 + $0x98] ss:$12 sps:$4 sm:$0xff]   ;;  %v4002_v17 = vld [vmem:[%s4782_s30 + $0xb0] ss:$12 sps:$4 sm:$0xff]   ;;  %v4867_v21 = vld [vmem:[%s4791_s17] sm:$0x7] }
 0x217   : > { %1146 = vmatpush1.bf16.msra.mxu0 %v3979_v56  ;;  %3698 = vmatprep.subr.bf16.mxu1 %v3996_v11  ;;  %v1004_v22 = vsub.s32 1, %v4863_v19  ;;  %v1001_v23 = vrot.slane %v4867_v21, %v1000_v20  ;;  %s4401_s30 = smov 64   ;;  %s4402_s17 = smov 96   ;;  %v1008_v54 = vsub.s32 2, %v4863_v19  ;;  %vm1306_vm2 = vcmask 130048  }
 0x218   : > { %1147 = vmatprep.subr.bf16.mxu0 %v3980_v57  ;;  %s4403_s0 = smov 32   ;;  %s5460_s11 = sld [smem:[#allocation22_spill]]  ;;  %vm1512_vm3 = vcmask 523520   ;;  %vm1648_vm4 = vcmask 785920   ;;  %vm1784_vm5 = vcmask 1048320  }
 0x219   : > { %v1005_v25 = vrot.slane %v4867_v21, %v1004_v22  ;;  %v1009_v56 = vrot.slane %v4867_v21, %v1008_v54  ;;  %s5461_s23 = sld [smem:[#allocation27_spill]]  ;;  %s5463_s1 = sld [smem:[#allocation28_spill]] }
 0x21a   : > { %3699 = vmatpush3.bf16.msra.mxu1 %v3996_v11  ;;  %s5465_s3 = sld [smem:[#allocation29_spill]]  ;;  %p3572_p0 = scmp.ne.s32.totalorder %s4531_s2, 1 }
 0x21b   : > { %1148 = vmatpush1.bf16.msra.mxu0 %v3982_v59  ;;  %3700 = vmatprep.subr.bf16.mxu1 %v3997_v12  ;;  %vm4405_vm6 = vmmov (!%p3572_p0), 0   ;;  %vm3021_vm7 = vcmask (!%p3572_p0), 1040384  }
 0x21c   : > { %1149 = vmatprep.subr.bf16.mxu0 %v3983_v61 }
 0x21e   : > { %3701 = vmatpush3.bf16.msra.mxu1 %v3997_v12 }
 0x21f   : > { %1150 = vmatpush1.bf16.msra.mxu0 %v3985_v63  ;;  %3702 = vmatprep.subr.bf16.mxu1 %v3998_v13  ;;  %s5462_s27 = scalar_lea.vmem %s5461_s23, %s4767_s25  ;;  %s5464_s13 = scalar_lea.vmem %s5463_s1, %s4767_s25 }
 0x220   : > { %1151 = vmatprep.subr.bf16.mxu0 %v3986_v0 }
 0x222   : > { %3703 = vmatpush3.bf16.msra.mxu1 %v3998_v13 }
 0x223   : > { %1152 = vmatpush1.bf16.msra.mxu0 %v3988_v1  ;;  %3704 = vmatprep.subr.bf16.mxu1 %v3999_v14 }
 0x224   : > { %1153 = vmatprep.subr.bf16.mxu0 %v3989_v2 }
 0x226   : > { %3705 = vmatpush3.bf16.msra.mxu1 %v3999_v14 }
 0x227   : > { %1154 = vmatpush1.bf16.msra.mxu0 %v3991_v3  ;;  %3706 = vmatprep.subr.bf16.mxu1 %v4000_v15 }
 0x228   : > { %1155 = vmatprep.subr.bf16.mxu0 %v3992_v4 }
 0x22a   : > { %3707 = vmatpush3.bf16.msra.mxu1 %v4000_v15 }
 0x22b   : > { %1156 = vmatpush1.bf16.msra.mxu0 %v3994_v5  ;;  %3708 = vmatprep.subr.bf16.mxu1 %v4001_v16 }
 0x22c   : > { %3716 = vmatprep.subr.bf16.mxu0 %v4399_v9 }
 0x22e   : > { %1174 = vmatmul.mubr.bf16.vlgmr.msra.gmra.mrb[0].mxu0 %v962_v62  ;;  %3709 = vmatpush3.bf16.msra.mxu1 %v4001_v16  ;;  %v3509_v16 = vld [vmem:[%s5460_s11] ss:$0 sm:$0xff] }
 0x22f   : > { %1183 = vmatprep.mubr.bf16.mxu0 %v4398_v52  ;;  %3710 = vmatprep.subr.bf16.mxu1 %v4002_v17 }
 0x232   : > { %3711 = vmatpush3.bf16.msra.mxu1 %v4002_v17 }
 0x233   : > { %3728 = vmatprep.subr.bf16.mxu1 %v4399_v9 }
 0x235   : > { %3713 = vmatmul.mubr.bf16.vlgmr.msra.gmra.mrb[0].mxu1 %v963_v8 }
 0x236   : > { %1184 = vmatmul.mubr.bf16.gmra.mrb[4].mxu0 %v963_v8  ;;  %3730 = vmatprep.mubr.msk.bf16.mxu1 %vm4400_vm0, %v4399_v9 }
 0x237   : > { %3718 = vmatprep.mubr.msk.bf16.mxu0 %vm4400_vm0, %v4399_v9 }
 0x301   : > { %v1175_v24 = vpop.f32.mrb[0].mxu0 }
 0x302   : > { %v1177_v26 = vpop.f32.mrb[1].mxu0  ;;  %v1176_v28 = vadd.f32 %v1175_v24, %v1001_v23 }
 0x303   : > { %v1179_v27 = vpop.f32.mrb[2].mxu0  ;;  %v1178_v31 = vadd.f32 %v1177_v26, %v1005_v25 }
 0x304   : > { %v1180_v29 = vadd.f32 %v1179_v27, %v1001_v23  ;;  %v1181_v30 = vpop.f32.mrb[3].mxu0 }
 0x305   : > { %v1182_v32 = vadd.f32 %v1181_v30, %v1005_v25 }
 0x306   : > { %v1243_v33 = vpack.c.bf16 %v1180_v29, %v1176_v28 }
 0x307   : > { %v1245_v34 = vpack.c.bf16 %v1182_v32, %v1178_v31 }
 0x308   : > { %v3714_v57 = vpop.f32.mrb[0].mxu1 }
 0x309   : > { %1517 = vrot.lane.b32.xlu1 %v1245_v34, %s4401_s30  ;;  %1380 = vrot.lane.b32.xlu0 %v1245_v34, %s4402_s17  ;;  %v1255_v35 = vsel %vm1250_vm1, %v1245_v34, 0  ;;  %v1185_v36 = vpop.f32.mrb[4].mxu0  ;;  %v1237_v59 = vadd.f32 %v3714_v57, %v1009_v56  ;;  %v1228_v60 = vpop.f32.mrb[1].mxu1 }
 0x30a   : > { %3717 = vmatpush3.bf16.xpose.msra.mxu0 %v1255_v35  ;;  %v1186_v37 = vadd.f32 %v1185_v36, %v1001_v23  ;;  %v1187_v38 = vpop.f32.mrb[5].mxu0  ;;  %v1229_v62 = vadd.f32 %v1228_v60, %v1009_v56  ;;  %v3715_v63 = vpop.f32.mrb[2].mxu1 }
 0x30b   : > { %v1188_v39 = vadd.f32 %v1187_v38, %v1005_v25  ;;  %v1189_v40 = vpop.f32.mrb[6].mxu0  ;;  %3722 = vmatprep.subr.bf16.mxu0 %v4399_v9  ;;  %v1240_v0 = vadd.f32 %v3715_v63, %v1009_v56  ;;  %v1231_v1 = vpop.f32.mrb[3].mxu1 }
 0x30c   : > { %v1190_v41 = vadd.f32 %v1189_v40, %v1001_v23  ;;  %v1191_v42 = vpop.f32.mrb[7].mxu0  ;;  %v1232_v2 = vadd.f32 %v1231_v1, %v1009_v56  ;;  %v3518_v1 = vld [vmem:[%s5460_s11 + $0x1] ss:$0 sm:$0xff] }
 0x30d   : > { %1515 = vrot.lane.b32.xlu1 %v1243_v33, %s4401_s30  ;;  %1377 = vrot.lane.b32.xlu0 %v1243_v33, %s4402_s17  ;;  %v1192_v43 = vadd.f32 %v1191_v42, %v1005_v25  ;;  %v4912_v4 = vpack.c.bf16 %v1240_v0, %v1237_v59 }
 0x30e   : > { %v1244_v44 = vpack.c.bf16 %v1190_v41, %v1186_v37  ;;  %v4914_v5 = vpack.c.bf16 %v1232_v2, %v1229_v62 }
 0x30f   : > { %v1246_v45 = vpack.c.bf16 %v1192_v43, %v1188_v39 }
 0x311   : > { %1651 = vrot.lane.b32.xlu1 %v1243_v33, %s4403_s0  ;;  %1653 = vrot.lane.b32.xlu0 %v1245_v34, %s4403_s0  ;;  %v1792_v61 = vsel %vm1250_vm1, %v1246_v45, 0 }
 0x312   : > { %3719 = vmatmul.mubr.msk.bf16.vlgmr.msra.gmra.mrb[8].mxu0 %vm1250_vm1, %v1243_v33 }
 0x313   : > { %3724 = vmatprep.mubr.msk.bf16.mxu0 %vm4400_vm0, %v4399_v9  ;;  %3723 = vmatpush3.bf16.msra.mxu0 %v4914_v5 }
 0x314   : > { %3734 = vmatprep.subr.bf16.mxu0 %v4399_v9 }
 0x315   : > { %1916 = vrot.lane.b32.xlu0 %v1246_v45, %s4402_s17  ;;  %1913 = vrot.lane.b32.xlu1 %v1244_v44, %s4402_s17 }
 0x319   : > { %2052 = vrot.lane.b32.xlu0 %v1246_v45, %s4401_s30  ;;  %2050 = vrot.lane.b32.xlu1 %v1244_v44, %s4401_s30 }
 0x31d   : > { %2187 = vrot.lane.b32.xlu0 %v1246_v45, %s4403_s0  ;;  %2185 = vrot.lane.b32.xlu1 %v1244_v44, %s4403_s0 }
 0x37b   : > { %v1381_v46 = vpop.permute.xlu0 %1380  ;;  %v1518_v48 = vpop.permute.xlu1 %1517 }
 0x37c   : > { %v1386_v47 = vsel %vm1250_vm1, %v1381_v46, 0  ;;  %v1523_v50 = vsel %vm1250_vm1, %v1518_v48, 0 }
 0x37d   : > { %3729 = vmatpush3.bf16.xpose.msra.mxu1 %v1386_v47 }
 0x37e   : > { %3740 = vmatprep.subr.bf16.mxu1 %v4399_v9 }
 0x37f   : > { %v1378_v49 = vpop.permute.xlu0 %1377  ;;  %v1516_v53 = vpop.permute.xlu1 %1515 }
 0x383   : > { %v1654_v51 = vpop.permute.xlu0 %1653  ;;  %v1652_v58 = vpop.permute.xlu1 %1651 }
 0x384   : > { %3731 = vmatmul.mubr.msk.bf16.vlgmr.msra.gmra.mrb[4].mxu1 %vm1250_vm1, %v1378_v49  ;;  %v1659_v55 = vsel %vm1250_vm1, %v1654_v51, 0 }
 0x385   : > { %3741 = vmatpush3.bf16.xpose.msra.mxu1 %v1523_v50  ;;  %3742 = vmatprep.mubr.msk.bf16.mxu1 %vm4400_vm0, %v4399_v9 }
 0x386   : > { %3752 = vmatprep.subr.bf16.mxu1 %v4399_v9 }
 0x387   : > { %v1917_v3 = vpop.permute.xlu0 %1916  ;;  %v1914_v8 = vpop.permute.xlu1 %1913 }
 0x388   : > { %v1922_v6 = vsel %vm1250_vm1, %v1917_v3, 0 }
 0x38b   : > { %v2053_v7 = vpop.permute.xlu0 %2052  ;;  %v2051_v12 = vpop.permute.xlu1 %2050 }
 0x38c   : > { %3743 = vmatmul.mubr.msk.bf16.vlgmr.msra.gmra.mrb[8].mxu1 %vm1250_vm1, %v1516_v53  ;;  %v2058_v10 = vsel %vm1250_vm1, %v2053_v7, 0 }
 0x38d   : > { %3753 = vmatpush3.bf16.xpose.msra.mxu1 %v1659_v55  ;;  %3754 = vmatprep.mubr.msk.bf16.mxu1 %vm4400_vm0, %v4399_v9 }
 0x38e   : > { %3764 = vmatprep.subr.bf16.mxu1 %v4399_v9 }
 0x38f   : > { %v2188_v11 = vpop.permute.xlu0 %2187  ;;  %v2186_v14 = vpop.permute.xlu1 %2185 }
 0x390   : > { %v2193_v13 = vsel %vm1250_vm1, %v2188_v11, 0 }
 0x394   : > { %3755 = vmatmul.mubr.msk.bf16.vlgmr.msra.gmra.mrb[12].mxu1 %vm1250_vm1, %v1652_v58 }
 0x395   : > { %3765 = vmatpush3.bf16.xpose.msra.mxu1 %v1792_v61  ;;  %3766 = vmatprep.mubr.msk.bf16.mxu1 %vm4400_vm0, %v4399_v9 }
 0x396   : > { %3776 = vmatprep.subr.bf16.mxu1 %v4399_v9 }
 0x39c   : > { %3767 = vmatmul.mubr.msk.bf16.vlgmr.msra.gmra.mrb[16].mxu1 %vm1250_vm1, %v1244_v44 }
 0x39d   : > { %3777 = vmatpush3.bf16.xpose.msra.mxu1 %v1922_v6  ;;  %3778 = vmatprep.mubr.msk.bf16.mxu1 %vm4400_vm0, %v4399_v9 }
 0x39e   : > { %3788 = vmatprep.subr.bf16.mxu1 %v4399_v9 }
 0x3a4   : > { %3779 = vmatmul.mubr.msk.bf16.vlgmr.msra.gmra.mrb[20].mxu1 %vm1250_vm1, %v1914_v8 }
 0x3a5   : > { %3789 = vmatpush3.bf16.xpose.msra.mxu1 %v2058_v10  ;;  %3790 = vmatprep.mubr.msk.bf16.mxu1 %vm4400_vm0, %v4399_v9 }
 0x3a6   : > { %3800 = vmatprep.subr.bf16.mxu1 %v4399_v9 }
 0x3ac   : > { %3791 = vmatmul.mubr.msk.bf16.vlgmr.msra.gmra.mrb[24].mxu1 %vm1250_vm1, %v2051_v12 }
 0x3ad   : > { %3801 = vmatpush3.bf16.xpose.msra.mxu1 %v2193_v13  ;;  %3802 = vmatprep.mubr.msk.bf16.mxu1 %vm4400_vm0, %v4399_v9 }
 0x3b4   : > { %3803 = vmatmul.mubr.msk.bf16.vlgmr.msra.gmra.mrb[28].mxu1 %vm1250_vm1, %v2186_v14 }
 0x3e5   : > { %v1291_v15 = vpop.f32.mrb[8].mxu0 }
 0x3e6   : > { %v1298_v17 = vmul.f32 0.17677669, %v1291_v15  ;;  %v3720_v18 = vpop.f32.mrb[9].mxu0 }
 0x3e7   : > { %v1294_v21 = vpop.f32.mrb[10].mxu0 }
 0x3e8   : > { %v1299_v23 = vmul.f32 0.17677669, %v1294_v21  ;;  %v3721_v24 = vpop.f32.mrb[11].mxu0  ;;  %v4936_v25 = vadd.f32 %v3509_v16, %v1298_v17 }
 0x3ea   : > { %v1307_v26 = vsel %vm1306_vm2, %v4936_v25, -inf  ;;  %v1305_v27 = vadd.f32 %v3509_v16, %v1299_v23 }
 0x3eb   : > { %1308 = vmax.xlane.f32.xlu0 %v1307_v26 }
 0x3ec   : > { %v1310_v28 = vsel %vm1306_vm2, %v1305_v27, -inf }
 0x3ed   : > { %1311 = vmax.xlane.f32.xlu1 %v1310_v28 }
 0x457   : > { %v1422_v29 = vpop.f32.mrb[4].mxu1 }
 0x458   : > { %v1429_v30 = vmul.f32 0.17677669, %v1422_v29  ;;  %v3732_v31 = vpop.f32.mrb[5].mxu1 }
 0x459   : > { %v1425_v32 = vpop.f32.mrb[6].mxu1 }
 0x45a   : > { %v1430_v33 = vmul.f32 0.17677669, %v1425_v32  ;;  %v3733_v34 = vpop.f32.mrb[7].mxu1  ;;  %v4941_v35 = vadd.f32 %v3509_v16, %v1429_v30 }
 0x45c   : > { %v1433_v36 = vsel %vm1306_vm2, %v4941_v35, -inf  ;;  %v4945_v37 = vadd.f32 %v3509_v16, %v1430_v33 }
 0x45d   : > { %1434 = vmax.xlane.f32.xlu0 %v1433_v36 }
 0x45e   : > { %v1436_v41 = vsel %vm1306_vm2, %v4945_v37, -inf }
 0x45f   : > { %v1559_v38 = vpop.f32.mrb[8].mxu1 }
 0x460   : > { %v1566_v39 = vmul.f32 0.17677669, %v1559_v38  ;;  %v3744_v40 = vpop.f32.mrb[9].mxu1 }
 0x461   : > { %v1562_v42 = vpop.f32.mrb[10].mxu1  ;;  %1437 = vmax.xlane.f32.xlu0 %v1436_v41 }
 0x462   : > { %v1567_v43 = vmul.f32 0.17677669, %v1562_v42  ;;  %v3745_v44 = vpop.f32.mrb[11].mxu1  ;;  %v4949_v45 = vadd.f32 %v3509_v16, %v1566_v39 }
 0x464   : > { %v1570_v46 = vsel %vm1306_vm2, %v4949_v45, -inf  ;;  %v4953_v47 = vadd.f32 %v3509_v16, %v1567_v43 }
 0x465   : > { %1571 = vmax.xlane.f32.xlu1 %v1570_v46 }
 0x466   : > { %v1573_v48 = vsel %vm1306_vm2, %v4953_v47, -inf }
 0x467   : > { %v1695_v49 = vpop.f32.mrb[12].mxu1  ;;  %1574 = vmax.xlane.f32.xlu0 %v1573_v48 }
 0x468   : > { %v1702_v50 = vmul.f32 0.17677669, %v1695_v49  ;;  %v3756_v51 = vpop.f32.mrb[13].mxu1 }
 0x469   : > { %v1698_v53 = vpop.f32.mrb[14].mxu1 }
 0x46a   : > { %v1703_v54 = vmul.f32 0.17677669, %v1698_v53  ;;  %v3757_v55 = vpop.f32.mrb[15].mxu1  ;;  %v4957_v56 = vadd.f32 %v3509_v16, %v1702_v50 }
 0x46c   : > { %v1706_v57 = vsel %vm1306_vm2, %v4957_v56, -inf  ;;  %v4961_v58 = vadd.f32 %v3509_v16, %v1703_v54 }
 0x46d   : > { %1707 = vmax.xlane.f32.xlu1 %v1706_v57 }
 0x46e   : > { %v1709_v59 = vsel %vm1306_vm2, %v4961_v58, -inf }
 0x46f   : > { %v1828_v60 = vpop.f32.mrb[16].mxu1  ;;  %1710 = vmax.xlane.f32.xlu0 %v1709_v59 }
 0x470   : > { %v3768_v61 = vpop.f32.mrb[17].mxu1  ;;  %v1835_v41 = vmul.f32 0.17677669, %v1828_v60 }
 0x471   : > { %v1831_v62 = vpop.f32.mrb[18].mxu1 }
 0x472   : > { %v1836_v63 = vmul.f32 0.17677669, %v1831_v62  ;;  %v3769_v0 = vpop.f32.mrb[19].mxu1  ;;  %v4991_v44 = vadd.f32 %v3518_v1, %v1835_v41 }
 0x474   : > { %v4968_v2 = vadd.f32 %v3518_v1, %v1836_v63  ;;  %v1843_v49 = vsel %vm1306_vm2, %v4991_v44, -inf }
 0x476   : > { %v1846_v3 = vsel %vm1306_vm2, %v4968_v2, -inf }
 0x477   : > { %v1958_v6 = vpop.f32.mrb[20].mxu1  ;;  %1847 = vmax.xlane.f32.xlu0 %v1846_v3 }
 0x478   : > { %v3780_v7 = vpop.f32.mrb[21].mxu1  ;;  %v1309_v39 = vpop.xlane.xlu0 %1308  ;;  %v1965_v42 = vmul.f32 0.17677669, %v1958_v6 }
 0x479   : > { %v1961_v8 = vpop.f32.mrb[22].mxu1  ;;  %v1313_v40 = vsub.f32 %v4936_v25, %v1309_v39 }
 0x47a   : > { %v1966_v10 = vmul.f32 0.17677669, %v1961_v8  ;;  %v1312_v11 = vpop.xlane.xlu1 %1311  ;;  %v3781_v12 = vpop.f32.mrb[23].mxu1  ;;  %v4993_v48 = vadd.f32 %v3518_v1, %v1965_v42 }
 0x47b   : > { %v1314_v13 = vsub.f32 %v1305_v27, %v1312_v11  ;;  %v1315_v43 = vmul.f32 1.442695, %v1313_v40 }
 0x47c   : > { %v4972_v14 = vadd.f32 %v3518_v1, %v1966_v10  ;;  %v1969_v50 = vsel %vm1306_vm2, %v4993_v48, -inf }
 0x47d   : > { %v1317_v15 = vmul.f32 1.442695, %v1314_v13 }
 0x47e   : > { %1457 = vrot.lane.b32.xlu1 %v4914_v5, %s4402_s17  ;;  %v1972_v16 = vsel %vm1306_vm2, %v4972_v14, -inf }
 0x47f   : > { %4051 = vpow2.f32 %v1317_v15  ;;  %v2094_v17 = vpop.f32.mrb[24].mxu1  ;;  %1973 = vmax.xlane.f32.xlu0 %v1972_v16 }
 0x480   : > { %v3792_v18 = vpop.f32.mrb[25].mxu1  ;;  %v2101_v46 = vmul.f32 0.17677669, %v2094_v17  ;;  %4053 = vpow2.f32 %v1315_v43 }
 0x481   : > { %v2097_v21 = vpop.f32.mrb[26].mxu1 }
 0x482   : > { %v2102_v23 = vmul.f32 0.17677669, %v2097_v21  ;;  %v3793_v24 = vpop.f32.mrb[27].mxu1  ;;  %v4999_v51 = vadd.f32 %v3518_v1, %v2101_v46 }
 0x484   : > { %v4978_v26 = vadd.f32 %v3518_v1, %v2102_v23  ;;  %v2105_v53 = vsel %vm1306_vm2, %v4999_v51, -inf }
 0x486   : > { %v2108_v27 = vsel %vm1306_vm2, %v4978_v26, -inf }
 0x487   : > { %v2229_v28 = vpop.f32.mrb[28].mxu1  ;;  %2109 = vmax.xlane.f32.xlu0 %v2108_v27 }
 0x488   : > { %v3804_v29 = vpop.f32.mrb[29].mxu1  ;;  %v2236_v25 = vmul.f32 0.17677669, %v2229_v28 }
 0x489   : > { %v4982_v30 = vpop.eup %4051  ;;  %v2232_v31 = vpop.f32.mrb[30].mxu1 }
 0x48a   : > { %v2237_v32 = vmul.f32 0.17677669, %v2232_v31  ;;  %v1322_v33 = vsel %vm1306_vm2, %v4982_v30, 0.0  ;;  %v3805_v34 = vpop.f32.mrb[31].mxu1  ;;  %v5003_v54 = vpop.eup %4053  ;;  %v5005_v55 = vadd.f32 %v3518_v1, %v2236_v25 }
 0x48b   : > { %1323 = vadd.xlane.f32.xlu0 %v1322_v33  ;;  %v1319_v57 = vsel %vm1306_vm2, %v5003_v54, 0.0 }
 0x48c   : > { %v4986_v36 = vadd.f32 %v3518_v1, %v2237_v32  ;;  %v2240_v59 = vsel %vm1306_vm2, %v5005_v55, -inf }
 0x48e   : > { %v2243_v38 = vsel %vm1306_vm2, %v4986_v36, -inf }
 0x48f   : > { %2244 = vmax.xlane.f32.xlu0 %v2243_v38 }
 0x4a2   : > { %1844 = vmax.xlane.f32.xlu1 %v1843_v49 }
 0x4a6   : > { %1970 = vmax.xlane.f32.xlu1 %v1969_v50 }
 0x4aa   : > { %2106 = vmax.xlane.f32.xlu1 %v2105_v53 }
 0x4ae   : > { %1320 = vadd.xlane.f32.xlu1 %v1319_v57 }
 0x4b2   : > { %2241 = vmax.xlane.f32.xlu1 %v2240_v59 }
 0x4ea   : > { %v1435_v60 = vpop.xlane.xlu0 %1434 }
 0x4eb   : > { %v1439_v61 = vsub.f32 %v4941_v35, %v1435_v60 }
 0x4ed   : > { %v1441_v62 = vmul.f32 1.442695, %v1439_v61 }
 0x4ee   : > { %v1438_v63 = vpop.xlane.xlu0 %1437 }
 0x4ef   : > { %4055 = vpow2.f32 %v1441_v62  ;;  %v1440_v0 = vsub.f32 %v4945_v37, %v1438_v63 }
 0x4f1   : > { %v1443_v3 = vmul.f32 1.442695, %v1440_v0 }
 0x4f2   : > { %v1572_v35 = vpop.xlane.xlu1 %1571 }
 0x4f3   : > { %4057 = vpow2.f32 %v1443_v3  ;;  %v1576_v37 = vsub.f32 %v4949_v45, %v1572_v35 }
 0x4f4   : > { %v1575_v10 = vpop.xlane.xlu0 %1574 }
 0x4f5   : > { %v1577_v12 = vsub.f32 %v4953_v47, %v1575_v10  ;;  %v1578_v13 = vmul.f32 1.442695, %v1576_v37 }
 0x4f7   : > { %v1580_v17 = vmul.f32 1.442695, %v1577_v12  ;;  %4059 = vpow2.f32 %v1578_v13 }
 0x4f9   : > { %v5013_v1 = vpop.eup %4055  ;;  %4061 = vpow2.f32 %v1580_v17 }
 0x4fa   : > { %v1445_v6 = vsel %vm1306_vm2, %v5013_v1, 0.0  ;;  %v1708_v11 = vpop.xlane.xlu1 %1707 }
 0x4fb   : > { %1446 = vadd.xlane.f32.xlu1 %v1445_v6  ;;  %v1712_v15 = vsub.f32 %v4957_v56, %v1708_v11 }
 0x4fc   : > { %v1711_v16 = vpop.xlane.xlu0 %1710 }
 0x4fd   : > { %v5017_v7 = vpop.eup %4057  ;;  %v1714_v18 = vmul.f32 1.442695, %v1712_v15  ;;  %v1713_v21 = vsub.f32 %v4961_v58, %v1711_v16 }
 0x4fe   : > { %v1448_v8 = vsel %vm1306_vm2, %v5017_v7, 0.0  ;;  %v5030_v27 = vpop.permute.xlu1 %1457 }
 0x4ff   : > { %1449 = vadd.xlane.f32.xlu0 %v1448_v8  ;;  %4063 = vpow2.f32 %v1714_v18 }
 0x501   : > { %v5032_v28 = vpop.eup %4059 }
 0x502   : > { %v1582_v58 = vsel %vm1306_vm2, %v5032_v28, 0.0 }
 0x503   : > { %v5034_v56 = vpop.eup %4061 }
 0x504   : > { %v1848_v23 = vpop.xlane.xlu0 %1847  ;;  %v1585_v39 = vsel %vm1306_vm2, %v5034_v56, 0.0 }
 0x505   : > { %v1850_v24 = vsub.f32 %v4968_v2, %v1848_v23 }
 0x507   : > { %v1853_v45 = vmul.f32 1.442695, %v1850_v24 }
 0x509   : > { %v5038_v32 = vpop.eup %4063 }
 0x50a   : > { %v1718_v40 = vsel %vm1306_vm2, %v5038_v32, 0.0 }
 0x50c   : > { %1729 = vrot.lane.b32.xlu1 %v4914_v5, %s4403_s0  ;;  %v1974_v47 = vpop.xlane.xlu0 %1973 }
 0x50d   : > { %v1976_v2 = vsub.f32 %v4972_v14, %v1974_v47 }
 0x514   : > { %v2110_v29 = vpop.xlane.xlu0 %2109 }
 0x515   : > { %1593 = vrot.lane.b32.xlu0 %v4914_v5, %s4401_s30  ;;  %v1716_v5 = vmul.f32 1.442695, %v1713_v21  ;;  %v2112_v46 = vsub.f32 %v4978_v26, %v2110_v29 }
 0x517   : > { %4065 = vpow2.f32 %v1716_v5  ;;  %v2115_v53 = vmul.f32 1.442695, %v2112_v46 }
 0x518   : > { %4067 = vpow2.f32 %v1853_v45  ;;  %v1324_v43 = vpop.xlane.xlu0 %1323 }
 0x51c   : > { %v2245_v57 = vpop.xlane.xlu0 %2244 }
 0x51d   : > { %v2247_v60 = vsub.f32 %v4986_v36, %v2245_v57 }
 0x51f   : > { %v2250_v3 = vmul.f32 1.442695, %v2247_v60 }
 0x521   : > { %v5046_v41 = vpop.eup %4065 }
 0x522   : > { %v1721_v50 = vsel %vm1306_vm2, %v5046_v41, 0.0  ;;  %v5052_v25 = vpop.eup %4067 }
 0x523   : > { %v1858_v59 = vsel %vm1306_vm2, %v5052_v25, 0.0 }
 0x52f   : > { %v1845_v31 = vpop.xlane.xlu1 %1844 }
 0x530   : > { %v1849_v33 = vsub.f32 %v4991_v44, %v1845_v31  ;;  %1583 = vadd.xlane.f32.xlu1 %v1582_v58  ;;  %v1979_v44 = vmul.f32 1.442695, %v1976_v2 }
 0x532   : > { %v1851_v34 = vmul.f32 1.442695, %v1849_v33 }
 0x533   : > { %v1971_v38 = vpop.xlane.xlu1 %1970 }
 0x534   : > { %4069 = vpow2.f32 %v1851_v34  ;;  %v1975_v42 = vsub.f32 %v4993_v48, %v1971_v38  ;;  %1586 = vadd.xlane.f32.xlu0 %v1585_v39  ;;  %1719 = vadd.xlane.f32.xlu1 %v1718_v40 }
 0x536   : > { %v1977_v14 = vmul.f32 1.442695, %v1975_v42 }
 0x537   : > { %v2107_v49 = vpop.xlane.xlu1 %2106 }
 0x538   : > { %4071 = vpow2.f32 %v1977_v14  ;;  %1722 = vadd.xlane.f32.xlu0 %v1721_v50  ;;  %v2111_v18 = vsub.f32 %v4999_v51, %v2107_v49 }
 0x539   : > { %4073 = vpow2.f32 %v1979_v44 }
 0x53a   : > { %4075 = vrcp.f32 %v1324_v43  ;;  %v2113_v21 = vmul.f32 1.442695, %v2111_v18 }
 0x53b   : > { %v1321_v48 = vpop.xlane.xlu1 %1320 }
 0x53c   : > { %1859 = vadd.xlane.f32.xlu0 %v1858_v59  ;;  %4077 = vrcp.f32 %v1321_v48 }
 0x53d   : > { %4079 = vpow2.f32 %v2115_v53 }
 0x53e   : > { %v5056_v26 = vpop.eup %4069 }
 0x53f   : > { %v2242_v61 = vpop.xlane.xlu1 %2241  ;;  %v1855_v62 = vsel %vm1306_vm2, %v5056_v26, 0.0 }
 0x540   : > { %v2246_v63 = vsub.f32 %v5005_v55, %v2242_v61  ;;  %1856 = vadd.xlane.f32.xlu1 %v1855_v62 }
 0x542   : > { %v5062_v0 = vpop.eup %4071  ;;  %v2248_v6 = vmul.f32 1.442695, %v2246_v63 }
 0x543   : > { %v1981_v8 = vsel %vm1306_vm2, %v5062_v0, 0.0  ;;  %v5066_v35 = vpop.eup %4073 }
 0x544   : > { %4081 = vpow2.f32 %v2248_v6  ;;  %1982 = vadd.xlane.f32.xlu0 %v1981_v8  ;;  %v4076_v37 = vpop.eup %4075  ;;  %v1984_v10 = vsel %vm1306_vm2, %v5066_v35, 0.0 }
 0x545   : > { %4083 = vpow2.f32 %v2250_v3  ;;  %v1328_v55 = vmul.f32 %v4076_v37, %v4982_v30 }
 0x546   : > { %v4078_v36 = vpop.eup %4077  ;;  %4085 = vpow2.f32 %v2113_v21 }
 0x547   : > { %v5070_v11 = vpop.eup %4079  ;;  %v1327_v12 = vmul.f32 %v4078_v36, %v5003_v54 }
 0x548   : > { %1985 = vadd.xlane.f32.xlu0 %v1984_v10  ;;  %v2120_v15 = vsel %vm1306_vm2, %v5070_v11, 0.0 }
 0x549   : > { %v1329_v13 = vpack.c.bf16 %v1328_v55, %v1327_v12 }
 0x54b   : > { %3725 = vmatmul.mubr.msk.bf16.vlgmr.msra.gmra.mrb[12].mxu0 %vm1306_vm2, %v1329_v13 }
 0x54c   : > { %2121 = vadd.xlane.f32.xlu0 %v2120_v15  ;;  %3735 = vmatpush3.bf16.msra.mxu0 %v5030_v27 }
 0x54d   : > { %3736 = vmatprep.mubr.msk.bf16.mxu0 %vm4400_vm0, %v4399_v9  ;;  %3746 = vmatprep.subr.bf16.mxu0 %v4399_v9 }
 0x54e   : > { %v5080_v16 = vpop.eup %4081 }
 0x54f   : > { %v2252_v30 = vsel %vm1306_vm2, %v5080_v16, 0.0  ;;  %v5085_v54 = vpop.eup %4083 }
 0x550   : > { %2253 = vadd.xlane.f32.xlu0 %v2252_v30  ;;  %v2255_v17 = vsel %vm1306_vm2, %v5085_v54, 0.0  ;;  %v5094_v23 = vpop.eup %4085 }
 0x551   : > { %1993 = vrot.lane.b32.xlu1 %v4912_v4, %s4402_s17  ;;  %v2117_v5 = vsel %vm1306_vm2, %v5094_v23, 0.0 }
 0x554   : > { %2256 = vadd.xlane.f32.xlu0 %v2255_v17 }
 0x56a   : > { %2128 = vrot.lane.b32.xlu0 %v4912_v4, %s4401_s30 }
 0x575   : > { %2118 = vadd.xlane.f32.xlu1 %v2117_v5 }
 0x586   : > { %2263 = vrot.lane.b32.xlu1 %v4912_v4, %s4403_s0 }
 0x588   : > { %v1447_v24 = vpop.xlane.xlu1 %1446 }
 0x589   : > { %4087 = vrcp.f32 %v1447_v24 }
 0x58c   : > { %v1450_v45 = vpop.xlane.xlu0 %1449  ;;  %v1730_v33 = vpop.permute.xlu1 %1729 }
 0x58d   : > { %4089 = vrcp.f32 %v1450_v45 }
 0x590   : > { %v1594_v58 = vpop.permute.xlu0 %1593 }
 0x593   : > { %v4088_v27 = vpop.eup %4087 }
 0x594   : > { %v1453_v47 = vmul.f32 %v4088_v27, %v5013_v1 }
 0x597   : > { %v4090_v51 = vpop.eup %4089 }
 0x598   : > { %v1454_v29 = vmul.f32 %v4090_v51, %v5017_v7 }
 0x59a   : > { %v1455_v31 = vpack.c.bf16 %v1454_v29, %v1453_v47 }
 0x59c   : > { %3737 = vmatmul.mubr.msk.bf16.vlgmr.msra.gmra.mrb[16].mxu0 %vm1306_vm2, %v1455_v31 }
 0x59d   : > { %3747 = vmatpush3.bf16.msra.mxu0 %v1594_v58  ;;  %3748 = vmatprep.mubr.msk.bf16.mxu0 %vm4400_vm0, %v4399_v9 }
 0x59e   : > { %3758 = vmatprep.subr.bf16.mxu0 %v4399_v9 }
 0x5bd   : > { %v1584_v2 = vpop.xlane.xlu1 %1583 }
 0x5be   : > { %4091 = vrcp.f32 %v1584_v2 }
 0x5c1   : > { %v1587_v34 = vpop.xlane.xlu0 %1586  ;;  %v1720_v38 = vpop.xlane.xlu1 %1719 }
 0x5c2   : > { %4093 = vrcp.f32 %v1587_v34  ;;  %v4003_v34 = vld [vmem:[%s4746_s14] sm:$0xff]  }
 0x5c3   : > { %3812 = vmatprep.subr.bf16.mxu1 %v4003_v34 }
 0x5c4   : > { %3813 = vmatpush3.bf16.msra.mxu1 %v4003_v34  ;;  %v4013_v34 = vld [vmem:[%s4753_s20 + $0x4] ss:$8 sps:$4 sm:$0xff]  }
 0x5c5   : > { %v1723_v39 = vpop.xlane.xlu0 %1722 }
 0x5c6   : > { %4095 = vrcp.f32 %v1723_v39 }
 0x5c7   : > { %4097 = vrcp.f32 %v1720_v38  ;;  %v4004_v38 = vld [vmem:[%s4746_s14 + $0x8] sm:$0xff]  }
 0x5c8   : > { %v4092_v1 = vpop.eup %4091  ;;  %3814 = vmatprep.subr.bf16.mxu1 %v4004_v38 }
 0x5c9   : > { %v1590_v40 = vmul.f32 %v4092_v1, %v5032_v28  ;;  %v1860_v43 = vpop.xlane.xlu0 %1859  ;;  %3815 = vmatpush3.bf16.msra.mxu1 %v4004_v38  ;;  %v4016_v38 = vld [vmem:[%s4753_s20 + $0x14] ss:$8 sps:$4 sm:$0xff]  }
 0x5cc   : > { %v4094_v7 = vpop.eup %4093 }
 0x5cd   : > { %v1591_v42 = vmul.f32 %v4094_v7, %v5034_v56  ;;  %v1857_v44 = vpop.xlane.xlu1 %1856 }
 0x5ce   : > { %4099 = vrcp.f32 %v1857_v44 }
 0x5cf   : > { %v1592_v46 = vpack.c.bf16 %v1591_v42, %v1590_v40  ;;  %4101 = vrcp.f32 %v1860_v43  ;;  %v4005_v40 = vld [vmem:[%s4746_s14 + $0x10] sm:$0xff]  }
 0x5d0   : > { %v4096_v14 = vpop.eup %4095  ;;  %3816 = vmatprep.subr.bf16.mxu1 %v4005_v40 }
 0x5d1   : > { %v1983_v49 = vpop.xlane.xlu0 %1982  ;;  %3749 = vmatmul.mubr.msk.bf16.vlgmr.msra.gmra.mrb[20].mxu0 %vm1306_vm2, %v1592_v46  ;;  %v4098_v50 = vpop.eup %4097  ;;  %v1727_v53 = vmul.f32 %v4096_v14, %v5046_v41  ;;  %3817 = vmatpush3.bf16.msra.mxu1 %v4005_v40 }
 0x5d2   : > { %3759 = vmatpush3.bf16.msra.mxu0 %v1730_v33  ;;  %3760 = vmatprep.mubr.msk.bf16.mxu0 %vm4400_vm0, %v4399_v9  ;;  %v1726_v28 = vmul.f32 %v4098_v50, %v5038_v32  ;;  %v1994_v3 = vpop.permute.xlu1 %1993  ;;  %v4007_v50 = vld [vmem:[%s4746_s14 + $0x20] sm:$0xff]  }
 0x5d3   : > { %3770 = vmatprep.subr.bf16.mxu0 %v4399_v9 }
 0x5d4   : > { %v1728_v57 = vpack.c.bf16 %v1727_v53, %v1726_v28  ;;  %v4008_v53 = vld [vmem:[%s4746_s14 + $0x28] sm:$0xff]  }
 0x5d5   : > { %v1986_v56 = vpop.xlane.xlu0 %1985 }
 0x5d6   : > { %4103 = vrcp.f32 %v1986_v56  ;;  %v4009_v56 = vld [vmem:[%s4746_s14 + $0x30] sm:$0xff]  }
 0x5d7   : > { %4105 = vrcp.f32 %v1983_v49  ;;  %v4006_v49 = vld [vmem:[%s4746_s14 + $0x18] sm:$0xff]  }
 0x5d8   : > { %v4100_v48 = vpop.eup %4099  ;;  %3818 = vmatprep.subr.bf16.mxu1 %v4006_v49 }
 0x5d9   : > { %v2122_v59 = vpop.xlane.xlu0 %2121  ;;  %3761 = vmatmul.mubr.msk.bf16.vlgmr.msra.gmra.mrb[24].mxu0 %vm1306_vm2, %v1728_v57  ;;  %v4102_v60 = vpop.eup %4101  ;;  %v1863_v41 = vmul.f32 %v4100_v48, %v5056_v26  ;;  %3819 = vmatpush3.bf16.msra.mxu1 %v4006_v49  ;;  %v4010_v48 = vld [vmem:[%s4746_s14 + $0x38] sm:$0xff]  }
 0x5da   : > { %3771 = vmatpush3.bf16.msra.mxu0 %v4912_v4  ;;  %3772 = vmatprep.mubr.msk.bf16.mxu0 %vm4400_vm0, %v4399_v9  ;;  %v1864_v32 = vmul.f32 %v4102_v60, %v5052_v25  ;;  %4107 = vrcp.f32 %v2122_v59 }
 0x5db   : > { %3782 = vmatprep.subr.bf16.mxu0 %v4399_v9  ;;  %3820 = vmatprep.subr.bf16.mxu1 %v4007_v50 }
 0x5dc   : > { %v1865_v62 = vpack.c.bf16 %v1864_v32, %v1863_v41 }
 0x5dd   : > { %v2254_v61 = vpop.xlane.xlu0 %2253  ;;  %3821 = vmatpush3.bf16.msra.mxu1 %v4007_v50 }
 0x5de   : > { %3822 = vmatprep.subr.bf16.mxu1 %v4008_v53 }
 0x5e0   : > { %v4104_v63 = vpop.eup %4103 }
 0x5e1   : > { %3773 = vmatmul.mubr.msk.bf16.vlgmr.msra.gmra.mrb[28].mxu0 %vm1306_vm2, %v1865_v62  ;;  %v4106_v6 = vpop.eup %4105  ;;  %v1990_v4 = vmul.f32 %v4104_v63, %v5066_v35  ;;  %v2257_v8 = vpop.xlane.xlu0 %2256  ;;  %3823 = vmatpush3.bf16.msra.mxu1 %v4008_v53 }
 0x5e2   : > { %3783 = vmatpush3.bf16.msra.mxu0 %v1994_v3  ;;  %3784 = vmatprep.mubr.msk.bf16.mxu0 %vm4400_vm0, %v4399_v9  ;;  %v1989_v26 = vmul.f32 %v4106_v6, %v5062_v0 }
 0x5e3   : > { %3794 = vmatprep.subr.bf16.mxu0 %v4399_v9  ;;  %3824 = vmatprep.subr.bf16.mxu1 %v4009_v56 }
 0x5e4   : > { %v1991_v37 = vpack.c.bf16 %v1990_v4, %v1989_v26  ;;  %v4108_v35 = vpop.eup %4107 }
 0x5e5   : > { %v2129_v25 = vpop.permute.xlu0 %2128  ;;  %v2126_v55 = vmul.f32 %v4108_v35, %v5070_v11  ;;  %3825 = vmatpush3.bf16.msra.mxu1 %v4009_v56 }
 0x5e6   : > { %3826 = vmatprep.subr.bf16.mxu1 %v4010_v48 }
 0x5e9   : > { %3785 = vmatmul.mubr.msk.bf16.vlgmr.msra.gmra.mrb[32].mxu0 %vm1306_vm2, %v1991_v37  ;;  %3827 = vmatpush3.bf16.msra.mxu1 %v4010_v48 }
 0x5ea   : > { %3795 = vmatpush3.bf16.msra.mxu0 %v2129_v25  ;;  %3796 = vmatprep.mubr.msk.bf16.mxu0 %vm4400_vm0, %v4399_v9 }
 0x5eb   : > { %3806 = vmatprep.subr.bf16.mxu0 %v4399_v9 }
 0x602   : > { %v2119_v36 = vpop.xlane.xlu1 %2118 }
 0x603   : > { %4109 = vrcp.f32 %v2119_v36 }
 0x604   : > { %4111 = vrcp.f32 %v2257_v8 }
 0x605   : > { %4113 = vrcp.f32 %v2254_v61 }
 0x606   : > { %v2264_v15 = vpop.permute.xlu1 %2263 }
 0x60d   : > { %v4110_v10 = vpop.eup %4109 }
 0x60e   : > { %v2125_v0 = vmul.f32 %v4110_v10, %v5094_v23  ;;  %v4112_v13 = vpop.eup %4111 }
 0x60f   : > { %v4114_v30 = vpop.eup %4113  ;;  %v2261_v17 = vmul.f32 %v4112_v13, %v5085_v54 }
 0x610   : > { %v2127_v12 = vpack.c.bf16 %v2126_v55, %v2125_v0  ;;  %v2260_v18 = vmul.f32 %v4114_v30, %v5080_v16 }
 0x612   : > { %3797 = vmatmul.mubr.msk.bf16.vlgmr.msra.gmra.mrb[36].mxu0 %vm1306_vm2, %v2127_v12  ;;  %v2262_v21 = vpack.c.bf16 %v2261_v17, %v2260_v18  ;;  %v3526_v18 = vld [vmem:[%s5462_s27] ss:$0 sm:$0xff] }
 0x613   : > { %3807 = vmatpush3.bf16.msra.mxu0 %v2264_v15  ;;  %3808 = vmatprep.mubr.msk.bf16.mxu0 %vm4400_vm0, %v4399_v9 }
 0x614   : > { %2627 = vmatprep.subr.bf16.mxu0 %v4013_v34 }
 0x61a   : > { %3809 = vmatmul.mubr.msk.bf16.vlgmr.msra.gmra.mrb[40].mxu0 %vm1306_vm2, %v2262_v21 }
 0x61b   : > { %2659 = vmatprep.mubr.bf16.mxu0 %v4398_v52 }
 0x61e   : > { %v1367_v11 = vpop.f32.mrb[12].mxu0 }
 0x61f   : > { %1374 = vst.msk [vmem:[#allocation3] sm:$0xff] %vm1250_vm1, %v1367_v11  ;;  %v3726_v23 = vpop.f32.mrb[13].mxu0 }
 0x620   : > { %v1370_v5 = vpop.f32.mrb[14].mxu0 }
 0x621   : > { %1375 = vst.msk [vmem:[#allocation3 + $0x8] sm:$0xff] %vm1250_vm1, %v1370_v5  ;;  %v3727_v24 = vpop.f32.mrb[15].mxu0 }
 0x66f   : > { %v1497_v45 = vpop.f32.mrb[16].mxu0 }
 0x670   : > { %1506 = vrot.lane.b32.xlu1 %v1497_v45, %s4403_s0  ;;  %v3738_v9 = vpop.f32.mrb[17].mxu0 }
 0x671   : > { %v1500_v54 = vpop.f32.mrb[18].mxu0 }
 0x672   : > { %v3739_v16 = vpop.f32.mrb[19].mxu0 }
 0x674   : > { %1508 = vrot.lane.b32.xlu1 %v1500_v54, %s4403_s0  ;;  %v4147_v54 = vld [vmem:[#allocation2] sm:$0xff] }
 0x6a4   : > { %v1633_v27 = vpop.f32.mrb[20].mxu0 }
 0x6a5   : > { %1642 = vrot.lane.b32.xlu1 %v1633_v27, %s4401_s30  ;;  %v3750_v51 = vpop.f32.mrb[21].mxu0  ;;  %v4148_v27 = vld [vmem:[#allocation2 + $0x8] sm:$0xff] }
 0x6a6   : > { %v1636_v47 = vpop.f32.mrb[22].mxu0 }
 0x6a7   : > { %v3751_v29 = vpop.f32.mrb[23].mxu0 }
 0x6a8   : > { %v4149_v29 = vld [vmem:[#allocation2 + $0x10] sm:$0xff] }
 0x6a9   : > { %1644 = vrot.lane.b32.xlu1 %v1636_v47, %s4401_s30 }
 0x6ac   : > { %v1769_v31 = vpop.f32.mrb[24].mxu0 }
 0x6ad   : > { %1778 = vrot.lane.b32.xlu0 %v1769_v31, %s4402_s17  ;;  %v3762_v58 = vpop.f32.mrb[25].mxu0 }
 0x6ae   : > { %v1772_v33 = vpop.f32.mrb[26].mxu0  ;;  %v4150_v58 = vld [vmem:[#allocation2 + $0x18] sm:$0xff] }
 0x6af   : > { %1780 = vrot.lane.b32.xlu1 %v1772_v33, %s4402_s17  ;;  %v3763_v2 = vpop.f32.mrb[27].mxu0 }
 0x6b0   : > { %v4011_v2 = vld [vmem:[%s4753_s20] ss:$8 sps:$4 sm:$0xff]  }
 0x6b1   : > { %2628 = vmatpush1.bf16.msra.mxu0 %v4011_v2 }
 0x6b2   : > { %2629 = vmatprep.subr.bf16.mxu0 %v4016_v38 }
 0x6b4   : > { %v1903_v39 = vpop.f32.mrb[28].mxu0 }
 0x6b5   : > { %1910 = vst.msk [vmem:[#allocation3 + $0x10] sm:$0xff] %vm1250_vm1, %v1903_v39  ;;  %v3774_v1 = vpop.f32.mrb[29].mxu0  ;;  %v4014_v39 = vld [vmem:[%s4753_s20 + $0x10] ss:$8 sps:$4 sm:$0xff]  }
 0x6b6   : > { %v1906_v7 = vpop.f32.mrb[30].mxu0  ;;  %2630 = vmatpush1.bf16.msra.mxu0 %v4014_v39 }
 0x6b7   : > { %1911 = vst.msk [vmem:[#allocation3 + $0x18] sm:$0xff] %vm1250_vm1, %v1906_v7  ;;  %v3775_v42 = vpop.f32.mrb[31].mxu0 }
 0x6bc   : > { %v2033_v43 = vpop.f32.mrb[32].mxu0 }
 0x6bd   : > { %2042 = vrot.lane.b32.xlu0 %v2033_v43, %s4403_s0  ;;  %v3786_v44 = vpop.f32.mrb[33].mxu0 }
 0x6be   : > { %v2036_v46 = vpop.f32.mrb[34].mxu0 }
 0x6bf   : > { %2044 = vrot.lane.b32.xlu1 %v2036_v46, %s4403_s0  ;;  %v3787_v14 = vpop.f32.mrb[35].mxu0  ;;  %s5471_s0 = sld [smem:[#allocation37_spill]] (!%p3572_p0) }
 0x6e2   : > { %v1507_v28 = vpop.permute.xlu1 %1506 }
 0x6e3   : > { %1513 = vst.msk [vmem:[#allocation3] sm:$0xff] %vm1512_vm3, %v1507_v28 }
 0x6e5   : > { %v2168_v57 = vpop.f32.mrb[36].mxu0 }
 0x6e6   : > { %v1509_v59 = vpop.permute.xlu1 %1508  ;;  %2177 = vrot.lane.b32.xlu0 %v2168_v57, %s4401_s30  ;;  %v3798_v60 = vpop.f32.mrb[37].mxu0 }
 0x6e7   : > { %1514 = vst.msk [vmem:[#allocation3 + $0x8] sm:$0xff] %vm1512_vm3, %v1509_v59  ;;  %v2171_v41 = vpop.f32.mrb[38].mxu0  ;;  %v4019_v60 = vld [vmem:[%s4753_s20 + $0x24] ss:$8 sps:$4 sm:$0xff]  }
 0x6e8   : > { %2179 = vrot.lane.b32.xlu1 %v2171_v41, %s4401_s30  ;;  %v3799_v32 = vpop.f32.mrb[39].mxu0  ;;  %v4017_v41 = vld [vmem:[%s4753_s20 + $0x20] ss:$8 sps:$4 sm:$0xff]   ;;  %2631 = vmatprep.subr.bf16.mxu0 %v4019_v60  ;;  %s5466_s30 = scalar_lea.vmem %s5465_s3, %s4767_s25 }
 0x6e9   : > { %2632 = vmatpush1.bf16.msra.mxu0 %v4017_v41  ;;  %v4022_v32 = vld [vmem:[%s4753_s20 + $0x34] ss:$8 sps:$4 sm:$0xff]  }
 0x6ea   : > { %2633 = vmatprep.subr.bf16.mxu0 %v4022_v32 }
 0x6ed   : > { %v2303_v61 = vpop.f32.mrb[40].mxu0 }
 0x6ee   : > { %2312 = vrot.lane.b32.xlu0 %v2303_v61, %s4402_s17  ;;  %v3810_v62 = vpop.f32.mrb[41].mxu0  ;;  %v4020_v61 = vld [vmem:[%s4753_s20 + $0x30] ss:$8 sps:$4 sm:$0xff]  }
 0x6ef   : > { %v2306_v63 = vpop.f32.mrb[42].mxu0  ;;  %2634 = vmatpush1.bf16.msra.mxu0 %v4020_v61  ;;  %v4025_v62 = vld [vmem:[%s4753_s20 + $0x44] ss:$8 sps:$4 sm:$0xff]  }
 0x6f0   : > { %2314 = vrot.lane.b32.xlu1 %v2306_v63, %s4402_s17  ;;  %v3811_v3 = vpop.f32.mrb[43].mxu0  ;;  %v4023_v63 = vld [vmem:[%s4753_s20 + $0x40] ss:$8 sps:$4 sm:$0xff]   ;;  %2635 = vmatprep.subr.bf16.mxu0 %v4025_v62 }
 0x6f1   : > { %v4028_v3 = vld [vmem:[%s4753_s20 + $0x54] ss:$8 sps:$4 sm:$0xff]  }
 0x6f3   : > { %2636 = vmatpush1.bf16.msra.mxu0 %v4023_v63 }
 0x6f4   : > { %2637 = vmatprep.subr.bf16.mxu0 %v4028_v3 }
 0x717   : > { %v1643_v6 = vpop.permute.xlu1 %1642 }
 0x718   : > { %1649 = vst.msk [vmem:[#allocation3] sm:$0xff] %vm1648_vm4, %v1643_v6  ;;  %v4026_v6 = vld [vmem:[%s4753_s20 + $0x50] ss:$8 sps:$4 sm:$0xff]  }
 0x719   : > { %2638 = vmatpush1.bf16.msra.mxu0 %v4026_v6 }
 0x71b   : > { %v1645_v4 = vpop.permute.xlu1 %1644 }
 0x71c   : > { %1650 = vst.msk [vmem:[#allocation3 + $0x8] sm:$0xff] %vm1648_vm4, %v1645_v4  ;;  %v4029_v4 = vld [vmem:[%s4753_s20 + $0x60] ss:$8 sps:$4 sm:$0xff]  }
 0x71f   : > { %v1779_v8 = vpop.permute.xlu0 %1778 }
 0x720   : > { %1785 = vst.msk [vmem:[#allocation3] sm:$0xff] %vm1784_vm5, %v1779_v8  ;;  %v4031_v8 = vld [vmem:[%s4753_s20 + $0x64] ss:$8 sps:$4 sm:$0xff]  }
 0x721   : > { %v1781_v26 = vpop.permute.xlu1 %1780  ;;  %2639 = vmatprep.subr.bf16.mxu0 %v4031_v8 }
 0x722   : > { %1786 = vst.msk [vmem:[#allocation3 + $0x8] sm:$0xff] %vm1784_vm5, %v1781_v26  ;;  %v4034_v26 = vld [vmem:[%s4753_s20 + $0x74] ss:$8 sps:$4 sm:$0xff]   ;;  %2640 = vmatpush1.bf16.msra.mxu0 %v4029_v4 }
 0x723   : > { %2641 = vmatprep.subr.bf16.mxu0 %v4034_v26 }
 0x727   : > { %v2320_v37 = vld [vmem:[#allocation3] sm:$0xff] }
 0x729   : > { %v2321_v25 = vld [vmem:[#allocation3 + $0x8] sm:$0xff] }
 0x72a   : > { %v2324_v36 = vpack.c.bf16 %v2321_v25, %v2320_v37  ;;  %v4032_v37 = vld [vmem:[%s4753_s20 + $0x70] ss:$8 sps:$4 sm:$0xff]  }
 0x72b   : > { %2642 = vmatpush1.bf16.msra.mxu0 %v4032_v37 }
 0x72c   : > { %3828 = vmatprep.mubr.bf16.mxu1 %v2324_v36 }
 0x72f   : > { %v2043_v35 = vpop.permute.xlu0 %2042 }
 0x730   : > { %2048 = vst.msk [vmem:[#allocation3 + $0x10] sm:$0xff] %vm1512_vm3, %v2043_v35 }
 0x731   : > { %v2045_v10 = vpop.permute.xlu1 %2044 }
 0x732   : > { %2049 = vst.msk [vmem:[#allocation3 + $0x18] sm:$0xff] %vm1512_vm3, %v2045_v10 }
 0x758   : > { %v2178_v55 = vpop.permute.xlu0 %2177 }
 0x759   : > { %2183 = vst.msk [vmem:[#allocation3 + $0x10] sm:$0xff] %vm1648_vm4, %v2178_v55 }
 0x75a   : > { %v2180_v0 = vpop.permute.xlu1 %2179 }
 0x75b   : > { %2184 = vst.msk [vmem:[#allocation3 + $0x18] sm:$0xff] %vm1648_vm4, %v2180_v0 }
 0x760   : > { %v2313_v12 = vpop.permute.xlu0 %2312 }
 0x761   : > { %2318 = vst.msk [vmem:[#allocation3 + $0x10] sm:$0xff] %vm1784_vm5, %v2313_v12 }
 0x762   : > { %v2315_v13 = vpop.permute.xlu1 %2314 }
 0x763   : > { %2319 = vst.msk [vmem:[#allocation3 + $0x18] sm:$0xff] %vm1784_vm5, %v2315_v13 }
 0x768   : > { %v2322_v15 = vld [vmem:[#allocation3 + $0x10] sm:$0xff] }
 0x76a   : > { %v2323_v30 = vld [vmem:[#allocation3 + $0x18] sm:$0xff] }
 0x76b   : > { %v2325_v17 = vpack.c.bf16 %v2323_v30, %v2322_v15 }
 0x76d   : > { %3829 = vmatmul.mubr.bf16.vlgmr.msra.gmra.mrb[32].mxu1 %v2325_v17 }
 0x840   : > { %v3830_v21 = vpop.f32.mrb[32].mxu1 }
 0x841   : > { %v2431_v11 = vpop.f32.mrb[33].mxu1  ;;  %v2440_v45 = vadd.f32 %v3830_v21, %v3526_v18 }
 0x842   : > { %v2432_v23 = vadd.f32 %v3526_v18, %v2431_v11  ;;  %v3831_v5 = vpop.f32.mrb[34].mxu1  ;;  %v3535_v11 = vld [vmem:[%s5464_s13] ss:$0 sm:$0xff] }
 0x843   : > { %v2434_v24 = vpop.f32.mrb[35].mxu1  ;;  %v2443_v47 = vadd.f32 %v3831_v5, %v3526_v18  ;;  %v2448_v31 = vadd.f32 %v4149_v29, %v2440_v45 }
 0x844   : > { %v2435_v9 = vadd.f32 %v3526_v18, %v2434_v24  ;;  %v2446_v16 = vadd.f32 %v4147_v54, %v2432_v23  ;;  %v3536_v54 = vld [vmem:[%s5466_s30] ss:$0 sm:$0xff] }
 0x845   : > { %v2449_v33 = vadd.f32 %v4150_v58, %v2443_v47 }
 0x846   : > { %2452 = vadd.xlane.f32.xlu0 %v2446_v16  ;;  %v2447_v51 = vadd.f32 %v4148_v27, %v2435_v9 }
 0x848   : > { %2454 = vadd.xlane.f32.xlu1 %v2447_v51 }
 0x84a   : > { %2456 = vadd.xlane.f32.xlu0 %v2448_v31 }
 0x84e   : > { %2458 = vadd.xlane.f32.xlu0 %v2449_v33 }
 0x8d3   : > { %v2453_v1 = vpop.xlane.xlu0 %2452 }
 0x8d4   : > { %v2461_v7 = vmul.f32 0.0078125, %v2453_v1  ;;  %v4035_v1 = vld [vmem:[%s4759_s29 + $0x40] sm:$0xff]  }
 0x8d5   : > { %v2455_v40 = vpop.xlane.xlu1 %2454  ;;  %3650 = vmatprep.subr.bf16.mxu1 %v4035_v1 }
 0x8d6   : > { %v2465_v42 = vsub.f32 %v2446_v16, %v2461_v7  ;;  %v2462_v43 = vmul.f32 0.0078125, %v2455_v40  ;;  %v4036_v7 = vld [vmem:[%s4759_s29] sm:$0xff]   ;;  %v4037_v40 = vld [vmem:[%s4759_s29 + $0x48] sm:$0xff]  }
 0x8d7   : > { %v2457_v44 = vpop.xlane.xlu0 %2456  ;;  %3651 = vmatpush3.bf16.msra.mxu1 %v4036_v7 }
 0x8d8   : > { %v2466_v46 = vsub.f32 %v2447_v51, %v2462_v43  ;;  %v2463_v14 = vmul.f32 0.0078125, %v2457_v44  ;;  %v2469_v49 = vmul.f32 %v2465_v42, %v2465_v42  ;;  %3652 = vmatprep.subr.bf16.mxu1 %v4037_v40  ;;  %v4040_v43 = vld [vmem:[%s4759_s29 + $0x10] sm:$0xff]   ;;  %v4041_v44 = vld [vmem:[%s4759_s29 + $0x58] sm:$0xff]  }
 0x8da   : > { %v2467_v50 = vsub.f32 %v2448_v31, %v2463_v14  ;;  %2473 = vadd.xlane.f32.xlu1 %v2469_v49  ;;  %v2470_v53 = vmul.f32 %v2466_v46, %v2466_v46  ;;  %v4043_v14 = vld [vmem:[%s4759_s29 + $0x60] sm:$0xff]  }
 0x8db   : > { %v2459_v28 = vpop.xlane.xlu0 %2458  ;;  %v4044_v49 = vld [vmem:[%s4759_s29 + $0x20] sm:$0xff]  }
 0x8dc   : > { %v2464_v56 = vmul.f32 0.0078125, %v2459_v28  ;;  %2475 = vadd.xlane.f32.xlu0 %v2470_v53  ;;  %v2471_v57 = vmul.f32 %v2467_v50, %v2467_v50  ;;  %v4046_v53 = vld [vmem:[%s4759_s29 + $0x28] sm:$0xff]   ;;  %v4047_v28 = vld [vmem:[%s4759_s29 + $0x70] sm:$0xff]  }
 0x8de   : > { %v2468_v48 = vsub.f32 %v2449_v33, %v2464_v56  ;;  %2477 = vadd.xlane.f32.xlu1 %v2471_v57  ;;  %v4048_v56 = vld [vmem:[%s4759_s29 + $0x30] sm:$0xff]   ;;  %v4049_v57 = vld [vmem:[%s4759_s29 + $0x78] sm:$0xff]  }
 0x8e0   : > { %v2472_v59 = vmul.f32 %v2468_v48, %v2468_v48 }
 0x8e2   : > { %2479 = vadd.xlane.f32.xlu0 %v2472_v59  ;;  %v2535_v59 = vld [vmem:[%s4797_s16] sm:$0x3] }
 0x8e3   : > { %v2540_v60 = vrot.slane %v2535_v59, %v1000_v20  ;;  %v2544_v41 = vrot.slane %v2535_v59, %v1004_v22 }
 0x967   : > { %v2474_v25 = vpop.xlane.xlu1 %2473 }
 0x968   : > { %v2481_v36 = vmul.f32 0.0078125, %v2474_v25 }
 0x969   : > { %v2476_v35 = vpop.xlane.xlu0 %2475 }
 0x96a   : > { %v2485_v10 = vadd.f32 1e-12, %v2481_v36  ;;  %v2482_v55 = vmul.f32 0.0078125, %v2476_v35 }
 0x96b   : > { %v2478_v0 = vpop.xlane.xlu1 %2477 }
 0x96c   : > { %4115 = vrsqrt.f32 %v2485_v10  ;;  %v2486_v12 = vadd.f32 1e-12, %v2482_v55  ;;  %v2483_v13 = vmul.f32 0.0078125, %v2478_v0 }
 0x96e   : > { %4117 = vrsqrt.f32 %v2486_v12  ;;  %v2487_v15 = vadd.f32 1e-12, %v2483_v13 }
 0x96f   : > { %v2480_v30 = vpop.xlane.xlu0 %2479 }
 0x970   : > { %4119 = vrsqrt.f32 %v2487_v15  ;;  %v2484_v17 = vmul.f32 0.0078125, %v2480_v30 }
 0x972   : > { %v2488_v18 = vadd.f32 1e-12, %v2484_v17 }
 0x974   : > { %4121 = vrsqrt.f32 %v2488_v18 }
 0x976   : > { %v4116_v21 = vpop.eup %4115 }
 0x977   : > { %v2493_v23 = vmul.f32 %v4116_v21, %v2465_v42  ;;  %v4038_v42 = vld [vmem:[%s4759_s29 + $0x8] sm:$0xff]  }
 0x978   : > { %v4118_v5 = vpop.eup %4117  ;;  %3653 = vmatpush3.bf16.msra.mxu1 %v4038_v42 }
 0x979   : > { %v2494_v24 = vmul.f32 %v4118_v5, %v2466_v46  ;;  %v2503_v45 = vmul.f32 %v3535_v11, %v2493_v23  ;;  %v4042_v46 = vld [vmem:[%s4759_s29 + $0x18] sm:$0xff]  }
 0x97a   : > { %v4120_v9 = vpop.eup %4119 }
 0x97b   : > { %v2504_v16 = vmul.f32 %v3535_v11, %v2494_v24  ;;  %v5207_v27 = vadd.f32 %v3536_v54, %v2503_v45  ;;  %v2495_v47 = vmul.f32 %v4120_v9, %v2467_v50  ;;  %v4045_v50 = vld [vmem:[%s4759_s29 + $0x68] sm:$0xff]  }
 0x97d   : > { %v5209_v51 = vadd.f32 %v3536_v54, %v2504_v16  ;;  %v2505_v33 = vmul.f32 %v3535_v11, %v2495_v47 }
 0x97e   : > { %v4122_v29 = vpop.eup %4121 }
 0x97f   : > { %v2517_v31 = vpack.c.bf16 %v5209_v51, %v5207_v27  ;;  %v2496_v58 = vmul.f32 %v4122_v29, %v2468_v48  ;;  %v5216_v38 = vadd.f32 %v3536_v54, %v2505_v33  ;;  %v4050_v48 = vld [vmem:[%s4759_s29 + $0x38] sm:$0xff]  }
 0x981   : > { %2660 = vmatmul.mubr.bf16.vlgmr.msra.gmra.mrb[44].mxu0 %v2517_v31  ;;  %v2506_v2 = vmul.f32 %v3535_v11, %v2496_v58 }
 0x982   : > { %2669 = vmatprep.mubr.bf16.mxu0 %v4398_v52  ;;  %v4039_v52 = vld [vmem:[%s4759_s29 + $0x50] sm:$0xff]  }
 0x983   : > { %v5214_v34 = vadd.f32 %v3536_v54, %v2506_v2  ;;  %3654 = vmatprep.subr.bf16.mxu1 %v4039_v52 }
 0x984   : > { %3655 = vmatpush3.bf16.msra.mxu1 %v4040_v43 }
 0x985   : > { %v2518_v39 = vpack.c.bf16 %v5214_v34, %v5216_v38  ;;  %3656 = vmatprep.subr.bf16.mxu1 %v4041_v44 }
 0x988   : > { %3657 = vmatpush3.bf16.msra.mxu1 %v4042_v46 }
 0x989   : > { %2670 = vmatmul.mubr.bf16.gmra.mrb[48].mxu0 %v2518_v39  ;;  %3658 = vmatprep.subr.bf16.mxu1 %v4043_v14 }
 0x98c   : > { %3659 = vmatpush3.bf16.msra.mxu1 %v4044_v49 }
 0x98d   : > { %3660 = vmatprep.subr.bf16.mxu1 %v4045_v50 }
 0x990   : > { %3661 = vmatpush3.bf16.msra.mxu1 %v4046_v53 }
 0x991   : > { %3662 = vmatprep.subr.bf16.mxu1 %v4047_v28 }
 0x994   : > { %3663 = vmatpush3.bf16.msra.mxu1 %v4048_v56 }
 0x995   : > { %3664 = vmatprep.subr.bf16.mxu1 %v4049_v57 }
 0x998   : > { %3665 = vmatpush3.bf16.msra.mxu1 %v4050_v48 }
 0xa54   : > { %v2661_v32 = vpop.f32.mrb[44].mxu0 }
 0xa55   : > { %v5241_v61 = vadd.f32 %v2661_v32, %v2540_v60  ;;  %v2663_v62 = vpop.f32.mrb[45].mxu0 }
 0xa56   : > { %v5243_v63 = vadd.f32 %v2663_v62, %v2544_v41  ;;  %v2665_v3 = vpop.f32.mrb[46].mxu0 }
 0xa57   : > { %v2688_v6 = vmul.f32 0.044715, %v5241_v61  ;;  %v5246_v4 = vadd.f32 %v2665_v3, %v2540_v60  ;;  %v2667_v8 = vpop.f32.mrb[47].mxu0  ;;  %v2680_v3 = vmul.f32 0.5, %v5241_v61 }
 0xa58   : > { %v2689_v26 = vmul.f32 0.044715, %v5243_v63  ;;  %v5249_v37 = vadd.f32 %v2667_v8, %v2544_v41 }
 0xa59   : > { %v2696_v20 = vmul.f32 %v2688_v6, %v5241_v61  ;;  %v2690_v19 = vmul.f32 0.044715, %v5246_v4  ;;  %v2682_v6 = vmul.f32 0.5, %v5246_v4 }
 0xa5a   : > { %v2697_v22 = vmul.f32 %v2689_v26, %v5243_v63  ;;  %v2691_v25 = vmul.f32 0.044715, %v5249_v37  ;;  %v2681_v26 = vmul.f32 0.5, %v5243_v63 }
 0xa5b   : > { %v2704_v36 = vmul.f32 %v2696_v20, %v5241_v61  ;;  %v2698_v35 = vmul.f32 %v2690_v19, %v5246_v4  ;;  %v2683_v20 = vmul.f32 0.5, %v5249_v37 }
 0xa5c   : > { %v2705_v10 = vmul.f32 %v2697_v22, %v5243_v63  ;;  %v2699_v55 = vmul.f32 %v2691_v25, %v5249_v37  ;;  %v2671_v0 = vpop.f32.mrb[48].mxu0 }
 0xa5d   : > { %v2712_v12 = vadd.f32 %v2704_v36, %v5241_v61  ;;  %v2706_v13 = vmul.f32 %v2698_v35, %v5246_v4  ;;  %v5261_v15 = vadd.f32 %v2671_v0, %v2540_v60  ;;  %v2673_v30 = vpop.f32.mrb[49].mxu0 }
 0xa5e   : > { %v2707_v17 = vmul.f32 %v2699_v55, %v5249_v37  ;;  %v5264_v18 = vadd.f32 %v2673_v30, %v2544_v41  ;;  %v2675_v21 = vpop.f32.mrb[50].mxu0  ;;  %v2713_v11 = vadd.f32 %v2705_v10, %v5243_v63 }
 0xa5f   : > { %v2720_v23 = vmul.f32 0.7978846, %v2712_v12  ;;  %v2714_v5 = vadd.f32 %v2706_v13, %v5246_v4  ;;  %v2692_v24 = vmul.f32 0.044715, %v5261_v15  ;;  %v2676_v45 = vadd.f32 %v2675_v21, %v2540_v60  ;;  %v2677_v9 = vpop.f32.mrb[51].mxu0 }
 0xa60   : > { %v2693_v54 = vmul.f32 0.044715, %v5264_v18  ;;  %v2678_v16 = vadd.f32 %v2677_v9, %v2544_v41  ;;  %v2715_v47 = vadd.f32 %v2707_v17, %v5249_v37  ;;  %v2721_v29 = vmul.f32 0.7978846, %v2713_v11 }
 0xa61   : > { %4123 = vtanh.f32 %v2720_v23  ;;  %v2722_v31 = vmul.f32 0.7978846, %v2714_v5  ;;  %v2700_v58 = vmul.f32 %v2692_v24, %v5261_v15  ;;  %v2694_v33 = vmul.f32 0.044715, %v2676_v45 }
 0xa62   : > { %v2701_v2 = vmul.f32 %v2693_v54, %v5264_v18  ;;  %v2695_v39 = vmul.f32 0.044715, %v2678_v16  ;;  %v2723_v1 = vmul.f32 0.7978846, %v2715_v47  ;;  %4125 = vtanh.f32 %v2721_v29 }
 0xa63   : > { %4127 = vtanh.f32 %v2722_v31  ;;  %v2708_v7 = vmul.f32 %v2700_v58, %v5261_v15  ;;  %v2702_v40 = vmul.f32 %v2694_v33, %v2676_v45  ;;  %v2684_v63 = vmul.f32 0.5, %v5261_v15 }
 0xa64   : > { %v2709_v42 = vmul.f32 %v2701_v2, %v5264_v18  ;;  %v2703_v52 = vmul.f32 %v2695_v39, %v2678_v16  ;;  %4129 = vtanh.f32 %v2723_v1  ;;  %v2686_v4 = vmul.f32 0.5, %v2676_v45 }
 0xa65   : > { %v2710_v43 = vmul.f32 %v2702_v40, %v2676_v45  ;;  %v2716_v44 = vadd.f32 %v2708_v7, %v5261_v15  ;;  %v2685_v21 = vmul.f32 0.5, %v5264_v18  ;;  %v2687_v11 = vmul.f32 0.5, %v2678_v16  ;;  %v3553_v15 = vld [vmem:[%s871_s4] ss:$0 sm:$0xff] }
 0xa66   : > { %v2711_v46 = vmul.f32 %v2703_v52, %v2678_v16  ;;  %v2717_v14 = vadd.f32 %v2709_v42, %v5264_v18 }
 0xa67   : > { %v2718_v49 = vadd.f32 %v2710_v43, %v2676_v45  ;;  %v2724_v50 = vmul.f32 0.7978846, %v2716_v44 }
 0xa68   : > { %v2719_v53 = vadd.f32 %v2711_v46, %v2678_v16  ;;  %v2725_v28 = vmul.f32 0.7978846, %v2717_v14 }
 0xa69   : > { %v2726_v56 = vmul.f32 0.7978846, %v2718_v49  ;;  %4131 = vtanh.f32 %v2724_v50 }
 0xa6a   : > { %v2727_v57 = vmul.f32 0.7978846, %v2719_v53  ;;  %4133 = vtanh.f32 %v2725_v28 }
 0xa6b   : > { %v4124_v48 = vpop.eup %4123  ;;  %4135 = vtanh.f32 %v2726_v56 }
 0xa6c   : > { %v4126_v59 = vpop.eup %4125  ;;  %v2736_v60 = vadd.f32 1.0, %v4124_v48  ;;  %4137 = vtanh.f32 %v2727_v57 }
 0xa6d   : > { %v4128_v41 = vpop.eup %4127  ;;  %v2737_v32 = vadd.f32 1.0, %v4126_v59 }
 0xa6e   : > { %v4130_v62 = vpop.eup %4129  ;;  %v2738_v8 = vadd.f32 1.0, %v4128_v41  ;;  %v2744_v22 = vmul.f32 %v2736_v60, %v2680_v3 }
 0xa6f   : > { %v2739_v19 = vadd.f32 1.0, %v4130_v62  ;;  %v2745_v36 = vmul.f32 %v2737_v32, %v2681_v26 }
 0xa70   : > { %v2746_v25 = vmul.f32 %v2738_v8, %v2682_v6 }
 0xa71   : > { %v2747_v35 = vmul.f32 %v2739_v19, %v2683_v20 }
 0xa72   : > { %v2752_v10 = vpack.c.bf16 %v2746_v25, %v2744_v22 }
 0xa73   : > { %v4132_v55 = vpop.eup %4131  ;;  %v2753_v0 = vpack.c.bf16 %v2747_v35, %v2745_v36 }
 0xa74   : > { %v4134_v12 = vpop.eup %4133  ;;  %v2740_v13 = vadd.f32 1.0, %v4132_v55 }
 0xa75   : > { %v4136_v30 = vpop.eup %4135  ;;  %2923 = vmatprep.mubr.bf16.mxu1 %v2753_v0  ;;  %v2741_v61 = vadd.f32 1.0, %v4134_v12 }
 0xa76   : > { %v4138_v17 = vpop.eup %4137  ;;  %2924 = vmatmul.mubr.bf16.vlgmr.msra.gmra.mrb[36].mxu1 %v2752_v10  ;;  %v2742_v37 = vadd.f32 1.0, %v4136_v30  ;;  %v2748_v5 = vmul.f32 %v2740_v13, %v2684_v63 }
 0xa77   : > { %v2743_v23 = vadd.f32 1.0, %v4138_v17  ;;  %v2749_v9 = vmul.f32 %v2741_v61, %v2685_v21  ;;  %v3570_v61 = vld [vmem:[%s874_s15] ss:$0 sm:$0xff] }
 0xa78   : > { %v2750_v24 = vmul.f32 %v2742_v37, %v2686_v4  ;;  %v3571_v4 = vld [vmem:[%s877_s28] ss:$0 sm:$0xff]  ;;  %s5470_s28 = sld [smem:[#allocation35_spill]] (!%p3572_p0) }
 0xa79   : > { %v2751_v54 = vmul.f32 %v2743_v23, %v2687_v11 }
 0xa7a   : > { %v2754_v47 = vpack.c.bf16 %v2750_v24, %v2748_v5 }
 0xa7b   : > { %v2755_v29 = vpack.c.bf16 %v2751_v54, %v2749_v9 }
 0xa7d   : > { %2931 = vmatprep.mubr.bf16.mxu1 %v2755_v29 }
 0xa7e   : > { %2932 = vmatmul.mubr.bf16.gmra.mrb[40].mxu1 %v2754_v47 }
 0xb49   : > { %v3666_v31 = vpop.f32.mrb[36].mxu1 }
 0xb4a   : > { %v3667_v45 = vpop.f32.mrb[37].mxu1 }
 0xb4b   : > { %v3668_v58 = vadd.f32 %v3667_v45, %v3666_v31  ;;  %v3669_v33 = vpop.f32.mrb[38].mxu1 }
 0xb4c   : > { %v3670_v18 = vpop.f32.mrb[39].mxu1 }
 0xb4d   : > { %v2926_v16 = vadd.f32 %v3668_v58, %v3553_v15  ;;  %v3671_v2 = vadd.f32 %v3670_v18, %v3669_v33  ;;  %v4151_v58 = vld [vmem:[%s5470_s28] sm:$0xff] (!%p3572_p0)   ;;  %v4404_v33 = vmov (!%p3572_p0), 0.0   ;;  %v4152_v18 = vld [vmem:[%s5470_s28 + $0x8] sm:$0xff] (!%p3572_p0)  }
 0xb4e   : > { %3832 = vmatprep.subr.bf16.mxu0 (!%p3572_p0), %v4404_v33  ;;  %3852 = vmatprep.subr.bf16.mxu1 (!%p3572_p0), %v4404_v33 }
 0xb4f   : > { %v2929_v39 = vadd.f32 %v3671_v2, %v3553_v15  ;;  %v2940_v1 = vadd.f32 %v2926_v16, %v5207_v27  ;;  %3833 = vmatpush3.bf16.msra.mxu0 (!%p3572_p0), %v4151_v58  ;;  %3848 = vmatprep.mubr.msk.bf16.mxu0 (!%p3572_p0), %vm4405_vm6, %v4404_v33  ;;  %v4153_v16 = vld [vmem:[%s5470_s28 + $0x10] sm:$0xff] (!%p3572_p0)   ;;  %v4159_v2 = vld [vmem:[#allocation12] sm:$0xff] (!%p3572_p0)  }
 0xb50   : > { %3834 = vmatprep.subr.bf16.mxu0 (!%p3572_p0), %v4404_v33  ;;  %3868 = vmatprep.mubr.msk.bf16.mxu1 (!%p3572_p0), %vm4405_vm6, %v4404_v33 }
 0xb51   : > { %v3672_v7 = vpop.f32.mrb[40].mxu1  ;;  %2946 = vadd.xlane.f32.xlu1 %v2940_v1  ;;  %v2941_v40 = vadd.f32 %v2929_v39, %v5209_v51  ;;  %v4154_v39 = vld [vmem:[%s5470_s28 + $0x18] sm:$0xff] (!%p3572_p0)   ;;  %3853 = vmatpush3.bf16.msra.mxu1 (!%p3572_p0), %v4159_v2 }
 0xb52   : > { %v3673_v42 = vpop.f32.mrb[41].mxu1  ;;  %3854 = vmatprep.subr.bf16.mxu1 (!%p3572_p0), %v4404_v33 }
 0xb53   : > { %v3674_v52 = vadd.f32 %v3673_v42, %v3672_v7  ;;  %v3675_v43 = vpop.f32.mrb[42].mxu1  ;;  %2948 = vadd.xlane.f32.xlu0 %v2941_v40  ;;  %3835 = vmatpush3.bf16.msra.mxu0 (!%p3572_p0), %v4152_v18  ;;  %v4155_v7 = vld [vmem:[%s5470_s28 + $0x20] sm:$0xff] (!%p3572_p0)   ;;  %v4156_v42 = vld [vmem:[%s5470_s28 + $0x28] sm:$0xff] (!%p3572_p0)  }
 0xb54   : > { %v3676_v44 = vpop.f32.mrb[43].mxu1  ;;  %3836 = vmatprep.subr.bf16.mxu0 (!%p3572_p0), %v4404_v33 }
 0xb55   : > { %v2934_v46 = vadd.f32 %v3674_v52, %v3553_v15  ;;  %v3677_v14 = vadd.f32 %v3676_v44, %v3675_v43  ;;  %v4162_v52 = vld [vmem:[#allocation12 + $0x18] sm:$0xff] (!%p3572_p0)   ;;  %v4157_v43 = vld [vmem:[%s5470_s28 + $0x30] sm:$0xff] (!%p3572_p0)  }
 0xb57   : > { %v2937_v49 = vadd.f32 %v3677_v14, %v3553_v15  ;;  %v2942_v50 = vadd.f32 %v2934_v46, %v5216_v38  ;;  %3837 = vmatpush3.bf16.msra.mxu0 (!%p3572_p0), %v4153_v16  ;;  %v4158_v46 = vld [vmem:[%s5470_s28 + $0x38] sm:$0xff] (!%p3572_p0)  }
 0xb58   : > { %3838 = vmatprep.subr.bf16.mxu0 (!%p3572_p0), %v4404_v33 }
 0xb59   : > { %2950 = vadd.xlane.f32.xlu1 %v2942_v50  ;;  %v2943_v53 = vadd.f32 %v2937_v49, %v5214_v34 }
 0xb5b   : > { %2952 = vadd.xlane.f32.xlu0 %v2943_v53  ;;  %3839 = vmatpush3.bf16.msra.mxu0 (!%p3572_p0), %v4154_v39 }
 0xb5c   : > { %3840 = vmatprep.subr.bf16.mxu0 (!%p3572_p0), %v4404_v33 }
 0xb5f   : > { %3841 = vmatpush3.bf16.msra.mxu0 (!%p3572_p0), %v4155_v7 }
 0xb60   : > { %3842 = vmatprep.subr.bf16.mxu0 (!%p3572_p0), %v4404_v33 }
 0xb63   : > { %3843 = vmatpush3.bf16.msra.mxu0 (!%p3572_p0), %v4156_v42 }
 0xb64   : > { %3844 = vmatprep.subr.bf16.mxu0 (!%p3572_p0), %v4404_v33 }
 0xb67   : > { %3845 = vmatpush3.bf16.msra.mxu0 (!%p3572_p0), %v4157_v43 }
 0xb68   : > { %3846 = vmatprep.subr.bf16.mxu0 (!%p3572_p0), %v4404_v33 }
 0xb6b   : > { %3847 = vmatpush3.bf16.msra.mxu0 (!%p3572_p0), %v4158_v46 }
 0xbde   : > { %v2947_v28 = vpop.xlane.xlu1 %2946 }
 0xbdf   : > { %v2954_v27 = vmul.f32 0.0078125, %v2947_v28  ;;  %v4165_v28 = vld [vmem:[#allocation12 + $0x30] sm:$0xff] (!%p3572_p0)  }
 0xbe0   : > { %v2949_v56 = vpop.xlane.xlu0 %2948 }
 0xbe1   : > { %v2958_v57 = vsub.f32 %v2940_v1, %v2954_v27  ;;  %v2955_v48 = vmul.f32 0.0078125, %v2949_v56  ;;  %v4160_v1 = vld [vmem:[#allocation12 + $0x8] sm:$0xff] (!%p3572_p0)   ;;  %v4166_v27 = vld [vmem:[#allocation12 + $0x38] sm:$0xff] (!%p3572_p0)  }
 0xbe2   : > { %3855 = vmatpush3.bf16.msra.mxu1 (!%p3572_p0), %v4160_v1  ;;  %v3573_v56 = vld [vmem:[#allocation10] ss:$0 sm:$0xff] (!%p3572_p0) }
 0xbe3   : > { %v2959_v51 = vsub.f32 %v2941_v40, %v2955_v48  ;;  %v2962_v59 = vmul.f32 %v2958_v57, %v2958_v57  ;;  %v4161_v40 = vld [vmem:[#allocation12 + $0x10] sm:$0xff] (!%p3572_p0)   ;;  %3856 = vmatprep.subr.bf16.mxu1 (!%p3572_p0), %v4404_v33 }
 0xbe5   : > { %2966 = vadd.xlane.f32.xlu1 %v2962_v59  ;;  %v2963_v60 = vmul.f32 %v2959_v51, %v2959_v51 }
 0xbe6   : > { %v2951_v41 = vpop.xlane.xlu1 %2950  ;;  %3857 = vmatpush3.bf16.msra.mxu1 (!%p3572_p0), %v4161_v40 }
 0xbe7   : > { %v2956_v32 = vmul.f32 0.0078125, %v2951_v41  ;;  %2968 = vadd.xlane.f32.xlu0 %v2963_v60  ;;  %3858 = vmatprep.subr.bf16.mxu1 (!%p3572_p0), %v4404_v33 }
 0xbe8   : > { %v2953_v62 = vpop.xlane.xlu0 %2952 }
 0xbe9   : > { %v2960_v3 = vsub.f32 %v2942_v50, %v2956_v32  ;;  %v2957_v6 = vmul.f32 0.0078125, %v2953_v62  ;;  %v4163_v50 = vld [vmem:[#allocation12 + $0x20] sm:$0xff] (!%p3572_p0)   ;;  %v3582_v62 = vld [vmem:[%s5471_s0] ss:$0 sm:$0xff] (!%p3572_p0) }
 0xbea   : > { %3859 = vmatpush3.bf16.msra.mxu1 (!%p3572_p0), %v4162_v52 }
 0xbeb   : > { %v2961_v38 = vsub.f32 %v2943_v53, %v2957_v6  ;;  %v2964_v8 = vmul.f32 %v2960_v3, %v2960_v3  ;;  %3860 = vmatprep.subr.bf16.mxu1 (!%p3572_p0), %v4404_v33  ;;  %v4164_v53 = vld [vmem:[#allocation12 + $0x28] sm:$0xff] (!%p3572_p0)  }
 0xbed   : > { %2970 = vadd.xlane.f32.xlu1 %v2964_v8  ;;  %v2965_v34 = vmul.f32 %v2961_v38, %v2961_v38 }
 0xbee   : > { %3861 = vmatpush3.bf16.msra.mxu1 (!%p3572_p0), %v4163_v50 }
 0xbef   : > { %2972 = vadd.xlane.f32.xlu0 %v2965_v34  ;;  %3862 = vmatprep.subr.bf16.mxu1 (!%p3572_p0), %v4404_v33 }
 0xbf2   : > { %3863 = vmatpush3.bf16.msra.mxu1 (!%p3572_p0), %v4164_v53 }
 0xbf3   : > { %3864 = vmatprep.subr.bf16.mxu1 (!%p3572_p0), %v4404_v33 }
 0xbf6   : > { %3865 = vmatpush3.bf16.msra.mxu1 (!%p3572_p0), %v4165_v28 }
 0xbf7   : > { %3866 = vmatprep.subr.bf16.mxu1 (!%p3572_p0), %v4404_v33 }
 0xbfa   : > { %3867 = vmatpush3.bf16.msra.mxu1 (!%p3572_p0), %v4166_v27 }
 0xc72   : > { %v2967_v26 = vpop.xlane.xlu1 %2966 }
 0xc73   : > { %v2974_v20 = vmul.f32 0.0078125, %v2967_v26 }
 0xc74   : > { %v2969_v19 = vpop.xlane.xlu0 %2968 }
 0xc75   : > { %v2978_v22 = vadd.f32 1e-12, %v2974_v20  ;;  %v2975_v25 = vmul.f32 0.0078125, %v2969_v19 }
 0xc77   : > { %4139 = vrsqrt.f32 %v2978_v22  ;;  %v2979_v36 = vadd.f32 1e-12, %v2975_v25 }
 0xc79   : > { %4141 = vrsqrt.f32 %v2979_v36 }
 0xc7a   : > { %v2971_v35 = vpop.xlane.xlu1 %2970 }
 0xc7b   : > { %v2976_v10 = vmul.f32 0.0078125, %v2971_v35 }
 0xc7c   : > { %v2973_v55 = vpop.xlane.xlu0 %2972 }
 0xc7d   : > { %v2980_v0 = vadd.f32 1e-12, %v2976_v10  ;;  %v2977_v12 = vmul.f32 0.0078125, %v2973_v55 }
 0xc7f   : > { %4143 = vrsqrt.f32 %v2980_v0  ;;  %v2981_v13 = vadd.f32 1e-12, %v2977_v12 }
 0xc81   : > { %v4140_v30 = vpop.eup %4139  ;;  %4145 = vrsqrt.f32 %v2981_v13 }
 0xc82   : > { %v2986_v17 = vmul.f32 %v4140_v30, %v2958_v57 }
 0xc83   : > { %v4142_v63 = vpop.eup %4141 }
 0xc84   : > { %v2996_v37 = vmul.f32 %v3570_v61, %v2986_v17  ;;  %v2987_v21 = vmul.f32 %v4142_v63, %v2959_v51 }
 0xc86   : > { %v3006_v11 = vadd.f32 %v3571_v4, %v2996_v37  ;;  %v2997_v23 = vmul.f32 %v3570_v61, %v2987_v21 }
 0xc88   : > { %3010 = vst [vmem:[#allocation2] sm:$0xff] %v3006_v11  ;;  %v3007_v5 = vadd.f32 %v3571_v4, %v2997_v23 }
 0xc89   : > { %v4144_v24 = vpop.eup %4143 }
 0xc8a   : > { %3011 = vst [vmem:[#allocation2 + $0x8] sm:$0xff] %v3007_v5  ;;  %v2988_v9 = vmul.f32 %v4144_v24, %v2960_v3 }
 0xc8b   : > { %v4146_v54 = vpop.eup %4145 }
 0xc8c   : > { %v2998_v47 = vmul.f32 %v3570_v61, %v2988_v9  ;;  %v2989_v29 = vmul.f32 %v4146_v54, %v2961_v38  ;;  %3017 = sbr.rel (%p3572_p0) target bundleno = 3665 (0xe51), region = 128 }
 0xc8e   : > { %v3008_v31 = vadd.f32 %v3571_v4, %v2998_v47  ;;  %v2999_v15 = vmul.f32 %v3570_v61, %v2989_v29 }
 0xc90   : > { %3012 = vst [vmem:[#allocation2 + $0x10] sm:$0xff] %v3008_v31  ;;  %v3009_v45 = vadd.f32 %v3571_v4, %v2999_v15  ;;  %v3019_v44 = vrot.slane (!%p3572_p0), %v3008_v31, 7 }
 0xc92   : > { %3013 = vst [vmem:[#allocation2 + $0x18] sm:$0xff] %v3009_v45  ;;  %v3022_v14 = vsel (!%p3572_p0), %vm3021_vm7, %v3006_v11, %v3019_v44 }
 0xc93   : > { %v3023_v49 = vpack.c.bf16 %v3022_v14, %v3022_v14 }
 0xc95   : > { %3849 = vmatmul.mubr.bf16.vlgmr.msra.gmra.mrb[0].mxu0 %v3023_v49 }
 0xd68   : > { %v3129_v57 = vpop.f32.mrb[0].mxu0 }
 0xd69   : > { %v3130_v48 = vadd.f32 %v3573_v56, %v3129_v57  ;;  %v3850_v51 = vpop.f32.mrb[1].mxu0 }
 0xd6a   : > { %v3132_v59 = vpop.f32.mrb[2].mxu0 }
 0xd6b   : > { %4167 = vtanh.f32 %v3130_v48  ;;  %v3851_v60 = vpop.f32.mrb[3].mxu0 }
 0xd75   : > { %v4168_v41 = vpop.eup %4167 }
 0xd76   : > { %v3136_v32 = vpack.c.bf16 %v4168_v41, %v4168_v41 }
 0xd78   : > { %3869 = vmatmul.mubr.bf16.vlgmr.msra.gmra.mrb[0].mxu1 %v3136_v32 }
 0xe4b   : > { %v3242_v3 = vpop.f32.mrb[0].mxu1 }
 0xe4c   : > { %v3243_v6 = vadd.f32 %v3582_v62, %v3242_v3  ;;  %v3870_v38 = vpop.f32.mrb[1].mxu1 }
 0xe4d   : > { %v3245_v8 = vpop.f32.mrb[2].mxu1 }
 0xe4e   : > { %v3248_v34 = vmax.f32 %v3243_v6, 0.0  ;;  %v3871_v26 = vpop.f32.mrb[3].mxu1 }
 0xe50   : > { %3249 = vst [vmem:[#allocation13] sm:$0x3] %v3248_v34 }
 0xe51 PF: > { %p3914_p8 = scmp.eq.s32.totalorder %s4531_s2, 1  ;;  %s4406_s19 = smov [#allocation13]  }
 0xe52   : > { %s3257_s26 = sshll.u32 %s4406_s19, 4  ;;  %s3258_s26 = int_to_ptr.vmem [resolvable:$true] %s3257_s26 }
 0xe53   : > { %s4315_s5 = scalar_lea.vmem %s3258_s26, 32  ;;  %p4322_p7 = scmp.lt.s32.totalorder %s3258_s26, %s3258_s26 }
 0xe54   : > { %p4316_p13 = scmp.ne.s32.totalorder %s3258_s26, %s4315_s5  ;;  %p4323_p12 = scmp.lt.s32.totalorder %s4315_s5, %s4315_s5 }
 0xe56   : > { %p4317_p6 = pnand %p4316_p13, %p3914_p8  ;;  %p4324_p5 = por %p4323_p12, %p4322_p7 }
 0xe58   : > { %p4318_p4 = pneg %p4317_p6 }
 0xe5a   : > { %p4325_p9 = pnand %p4324_p5, %p4318_p4 }
 0xe5c   : > { %4328 = shalt.err (!%p4325_p9)
}
 0xe5d   : > { %s5472_s15 = sld [smem:[#allocation38_spill]] }
 0xe63   : > { %s4329_s14 = scalar_lea.hbm %s5472_s15, 32 }
 0xe64   : > { %p4330_p11 = scmp.ne.s32.totalorder %s5472_s15, %s4329_s14  ;;  %p4335_p1 = scmp.lt.u32.totalorder %s4329_s14, %s5472_s15 }
 0xe66   : > { %p4331_p2 = pnand %p4330_p11, %p3914_p8 }
 0xe68   : > { %p4332_p10 = pneg %p4331_p2 }
 0xe6a   : > { %p4337_p3 = pnand %p4335_p1, %p4332_p10 }
 0xe6c   : > { %4340 = shalt.err (!%p4337_p3)
}
 0xe6d   : > { %3889 = dma.vmem_to_hbm [thread:$0]  (%p3914_p8), %s3258_s26, 32, %s5472_s15, [#allocation6]  }
 0xe6e   : > { %4370 = dma.done.wait (%p3914_p8), [#allocation6], 32  }
 0xe6f   : > { %4372 = vsyncadd (%p3914_p8), [#allocation6], 4294967264 }
 0xe70 PF: > { %s5473_s24 = sld [smem:[#allocation19_spill]]  ;;  %s5474_s13 = sld [smem:[#allocation18_spill]] }
 0xe71   : > { %s5475_s23 = sld [smem:[#allocation20_spill]]  ;;  %s5476_s1 = smov %s4379_s22 }
 0xe76   : > { %p35_p0 = scmp.ge.s32.totalorder %s5473_s24, 4   ;;  %s5477_s22 = smov %s5474_s13 }
 0xe78   :  { %37 = sbr.rel (!%p35_p0) target bundleno = 26 (0x1a), region = 204 }
 0xe7f   :  { %3270 = vsyncpa [#allocation5], 1 }
 0xe80   :  { %3272 = vsyncpa [#allocation5 + $0x1], 1 }
 0xe81   :  { %3273 = vsyncpa [#allocation8], 1 }
 0xe82   :  { %3275 = vsyncpa [#allocation8 + $0x1], 1 }
 0xe83   :  { %3276 = vsyncpa [#allocation11], 1 }
 0xe84   :  { %3277 = vsyncpa [#allocation6], 1 }
 0xe85   :  { %3279 = vsyncpa [#allocation6 + $0x1], 1 }

</bundles_post_ra>
